<compile_context>
chip_gen: v6e
topology: v6e:2x2x1
jax: 0.10.0
libtpu: 0.0.40
codegen_flags: <defaults>
</compile_context>

<pallas_src>
import functools

import jax
import jax.numpy as jnp
from jax.experimental import pallas as pl
from jax.experimental.pallas import tpu as pltpu

BN_EPS = 1e-5
# Modest scoped-VMEM limit; re-derive per generation (<= ~48 MiB on v7x).
VMEM_LIMIT = 48 * 1024 * 1024


def _round_up(x, m):
    return (x + m - 1) // m * m


# ---------------- parameters ----------------

def init_params(key, in_planes, planes):
    expansion = 4
    ks = jax.random.split(key, 6)

    def bn(k, c):
        k1, k2, k3, k4 = jax.random.split(k, 4)
        return (jax.random.uniform(k1, (c,), minval=0.5, maxval=1.5),   # gamma
                0.1 * jax.random.normal(k2, (c,)),                      # beta
                0.1 * jax.random.normal(k3, (c,)),                      # running_mean
                jax.random.uniform(k4, (c,), minval=0.5, maxval=1.5))   # running_var

    g1, be1, m1, v1 = bn(ks[0], planes)
    g2, be2, m2, v2 = bn(ks[1], planes)
    g3, be3, m3, v3 = bn(ks[2], planes * expansion)
    return dict(
        w1=0.2 * jax.random.normal(ks[3], (in_planes, planes), jnp.float32),
        w2=0.2 * jax.random.normal(ks[4], (3, 3, 3, planes, planes), jnp.float32),
        w3=0.2 * jax.random.normal(ks[5], (planes, planes * expansion), jnp.float32),
        g1=g1, be1=be1, m1=m1, v1=v1,
        g2=g2, be2=be2, m2=m2, v2=v2,
        g3=g3, be3=be3, m3=m3, v3=v3)


def prepare_params(p):
    """Fold inference-mode BN into the conv weights; pack conv2 taps.

    conv2 packing: K = (kh, ci) -> 3*c1, N = (kw, co) -> 3*c1, one (3*c1,3*c1)
    matrix per kd tap, i.e. w2 has shape (3, 3*c1, 3*c1).
    """
    def fold(g, be, m, v):
        s = g / jnp.sqrt(v + BN_EPS)
        return s, (be - m * s).astype(jnp.float32)

    c1 = p['w1'].shape[1]
    s1, b1 = fold(p['g1'], p['be1'], p['m1'], p['v1'])
    s2, b2 = fold(p['g2'], p['be2'], p['m2'], p['v2'])
    s3, b3 = fold(p['g3'], p['be3'], p['m3'], p['v3'])

    w1f = (p['w1'] * s1[None, :]).astype(jnp.bfloat16)
    w2f = p['w2'] * s2[None, None, None, None, :]            # (kd, kh, kw, ci, co)
    w2p = jnp.transpose(w2f, (0, 1, 3, 2, 4))                # (kd, kh, ci, kw, co)
    w2p = w2p.reshape(3, 3 * c1, 3 * c1).astype(jnp.bfloat16)
    w3f = (p['w3'] * s3[None, :]).astype(jnp.bfloat16)
    return dict(w1=w1f, b1=b1[None, :], w2=w2p, b2=b2[None, :],
                w3=w3f, b3=b3[None, :])


# ---------------- fused Pallas kernel ----------------

def _bottleneck_kernel(x_lo_ref, x_int_ref, x_hi_ref,
                       w1_ref, b1_ref, w2_ref, b2_ref, w3_ref, b3_ref,
                       o_ref, y1_scr, y1k_scr,
                       *, td, h, w, wp8, c1, cout):
    ii = pl.program_id(1)
    ni = pl.num_programs(1)
    cin = x_int_ref.shape[-1]

    # ---- conv1x1x1 + BN1 + ReLU -> zero-padded, depth-halo'd bf16 slab
    # held entirely in VMEM (never touches HBM). ----
    # Full zero init supplies the H/W zero padding, the wp8 tail columns and
    # the out-of-volume depth-halo rows (cheap: VMEM-only store).
    y1_scr[...] = jnp.zeros_like(y1_scr)

    def pw1(x2d):
        y = jnp.dot(x2d, w1_ref[...], preferred_element_type=jnp.float32)
        return jnp.maximum(y + b1_ref[...], 0.0).astype(jnp.bfloat16)

    yi = pw1(x_int_ref[...].reshape(td * h * w, cin)).reshape(td, h, w, c1)
    y1_scr[1:td + 1, 1:h + 1, 1:w + 1, :] = yi

    # Depth-halo rows (clamped DMAs from the wrapper; masked at the volume
    # boundaries so the zero padding of the scratch is preserved there).
    @pl.when(ii > 0)
    def _():
        yl = pw1(x_lo_ref[...].reshape(h * w, cin)).reshape(h, w, c1)
        y1_scr[0, 1:h + 1, 1:w + 1, :] = yl

    @pl.when(ii < ni - 1)
    def _():
        yh = pw1(x_hi_ref[...].reshape(h * w, cin)).reshape(h, w, c1)
        y1_scr[td + 1, 1:h + 1, 1:w + 1, :] = yh

    # ---- pack the 3 kh taps into the contraction axis once per slab:
    # y1k[dz, oh, wz, kh*c1 + ci] = y1_pad[dz, oh + kh, wz, ci]  (K = 3*c1) ----
    y1full = y1_scr[...]
    y1k_scr[...] = jnp.concatenate(
        [y1full[:, kh:kh + h, :, :] for kh in range(3)], axis=-1)

    # ---- per output depth row (keeps the live f32 accumulator small):
    # conv3x3x3 + BN2 + ReLU, then conv1x1x1 + BN3 + residual + ReLU. ----
    def row_body(od, carry):
        acc = jnp.zeros((h * wp8, 3 * c1), jnp.float32)
        for kd in range(3):                       # kw taps live in the N axis
            lhs = y1k_scr[od + kd].reshape(h * wp8, 3 * c1)
            acc = acc + jnp.dot(lhs, w2_ref[kd],
                                preferred_element_type=jnp.float32)
        acc = acc.reshape(h, wp8, 3 * c1)
        y2 = (acc[:, 0:w, 0:c1]
              + acc[:, 1:w + 1, c1:2 * c1]
              + acc[:, 2:w + 2, 2 * c1:3 * c1])
        y2 = jnp.maximum(y2 + b2_ref[...], 0.0)

        y2m = y2.reshape(h * w, c1).astype(jnp.bfloat16)
        y3 = jnp.dot(y2m, w3_ref[...], preferred_element_type=jnp.float32)
        res = x_int_ref[od].astype(jnp.float32).reshape(h * w, cout)
        out = jnp.maximum(y3 + b3_ref[...] + res, 0.0)
        o_ref[od] = out.reshape(h, w, cout)       # lane-dense (cout=128) store
        return carry

    jax.lax.fori_loop(0, td, row_body, 0)


# ---------------- forward wrapper ----------------

def bottleneck_forward(x_ncdhw, params, *, td=4):
    n, cin, d, h, w = x_ncdhw.shape
    planes = params['w1'].shape[1]
    cout = params['w3'].shape[1]
    assert cin == cout, "identity residual requires in_planes == planes * 4"
    td = min(td, d)
    assert d % td == 0, "depth must be divisible by the depth tile"
    ni = d // td
    hp = h + 2
    wp8 = _round_up(w + 2, 8)        # sublane-aligned padded width

    q = prepare_params(params)
    x_nd = jnp.transpose(x_ncdhw, (0, 2, 3, 4, 1)).astype(jnp.bfloat16)   # NDHWC

    kern = functools.partial(_bottleneck_kernel, td=td, h=h, w=w,
                             wp8=wp8, c1=planes, cout=cout)

    out_nd = pl.pallas_call(
        kern,
        out_shape=jax.ShapeDtypeStruct((n, d, h, w, cout), jnp.float32),
        grid_spec=pltpu.PrefetchScalarGridSpec(
            num_scalar_prefetch=0,
            grid=(n, ni),
            in_specs=[
                # depth-halo row below the slab (clamped; unused at ii == 0)
                pl.BlockSpec(
                    (None, None, h, w, cin),
                    lambda nn, ii: (nn, jnp.maximum(ii * td - 1, 0), 0, 0, 0)),
                # td-deep interior slab (conv1 input AND identity residual)
                pl.BlockSpec((None, td, h, w, cin),
                             lambda nn, ii: (nn, ii, 0, 0, 0)),
                # depth-halo row above the slab (clamped; unused at ii == ni-1)
                pl.BlockSpec(
                    (None, None, h, w, cin),
                    lambda nn, ii: (nn, jnp.minimum(ii * td + td, d - 1), 0, 0, 0)),
                # folded weights / biases: constant index_maps (VMEM resident)
                pl.BlockSpec((cin, planes), lambda nn, ii: (0, 0)),
                pl.BlockSpec((1, planes), lambda nn, ii: (0, 0)),
                pl.BlockSpec((3, 3 * planes, 3 * planes),
                             lambda nn, ii: (0, 0, 0)),
                pl.BlockSpec((1, planes), lambda nn, ii: (0, 0)),
                pl.BlockSpec((planes, cout), lambda nn, ii: (0, 0)),
                pl.BlockSpec((1, cout), lambda nn, ii: (0, 0)),
            ],
            out_specs=pl.BlockSpec((None, td, h, w, cout),
                                   lambda nn, ii: (nn, ii, 0, 0, 0)),
            scratch_shapes=[
                pltpu.VMEM((td + 2, hp, wp8, planes), jnp.bfloat16),      # y1 slab
                pltpu.VMEM((td + 2, h, wp8, 3 * planes), jnp.bfloat16),   # kh-packed
            ],
        ),
        compiler_params=pltpu.CompilerParams(
            dimension_semantics=("parallel", "parallel"),
            vmem_limit_bytes=VMEM_LIMIT),
    )(x_nd, x_nd, x_nd,
      q['w1'], q['b1'], q['w2'], q['b2'], q['w3'], q['b3'])

    return jnp.transpose(out_nd, (0, 4, 1, 2, 3))   # back to NCDHW


# ---------------- pure-JAX reference (mirrors the kernel's bf16 rounding) ----

def reference_forward(x_ncdhw, params):
    q = prepare_params(params)
    n, cin, d, h, w = x_ncdhw.shape
    c1 = params['w1'].shape[1]

    xb = jnp.transpose(x_ncdhw, (0, 2, 3, 4, 1))
    xb = xb.astype(jnp.bfloat16).astype(jnp.float32)

    y1 = jnp.einsum('ndhwc,ck->ndhwk', xb, q['w1'].astype(jnp.float32))
    y1 = jnp.maximum(y1 + q['b1'][0], 0.0)
    y1 = y1.astype(jnp.bfloat16).astype(jnp.float32)

    w2 = q['w2'].astype(jnp.float32).reshape(3, 3, c1, 3, c1)   # (kd,kh,ci,kw,co)
    w2 = jnp.transpose(w2, (0, 1, 3, 2, 4))                     # (kd,kh,kw,ci,co)
    y1p = jnp.pad(y1, ((0, 0), (1, 1), (1, 1), (1, 1), (0, 0)))
    y2 = jnp.zeros((n, d, h, w, c1), jnp.float32)
    for kd in range(3):
        for kh in range(3):
            for kw in range(3):
                patch = y1p[:, kd:kd + d, kh:kh + h, kw:kw + w, :]
                y2 = y2 + jnp.einsum('ndhwc,ck->ndhwk', patch, w2[kd, kh, kw])
    y2 = jnp.maximum(y2 + q['b2'][0], 0.0)
    y2 = y2.astype(jnp.bfloat16).astype(jnp.float32)

    y3 = jnp.einsum('ndhwc,ck->ndhwk', y2, q['w3'].astype(jnp.float32))
    out = jnp.maximum(y3 + q['b3'][0] + xb, 0.0)
    return jnp.transpose(out, (0, 4, 1, 2, 3))


if __name__ == "__main__":
    in_planes, planes = 128, 32      # identity residual: in_planes == 4 * planes
    n, d, h, w = 2, 8, 8, 8
    key = jax.random.PRNGKey(0)
    kx, kp = jax.random.split(key)
    x = jax.random.normal(kx, (n, in_planes, d, h, w), jnp.float32)   # NCDHW
    params = init_params(kp, in_planes, planes)

    fwd = jax.jit(lambda xx, pp: bottleneck_forward(xx, pp, td=4))
    out = jax.block_until_ready(fwd(x, params))
    ref = jax.block_until_ready(reference_forward(x, params))

    assert out.shape == (n, planes * 4, d, h, w), out.shape
    max_err = float(jnp.max(jnp.abs(out - ref)))
    assert jnp.allclose(out, ref, rtol=1e-2, atol=1e-2), max_err
    print("KERNEL_OK")
</pallas_src>

<mosaic_0001>
module attributes {stable_mosaic.version = 11 : i64} {
  func.func @_bottleneck_kernel(%arg0: i32, %arg1: i32, %arg2: memref<1x1x8x8x128xbf16, #tpu.memory_space<vmem>>, %arg3: memref<1x4x8x8x128xbf16, #tpu.memory_space<vmem>>, %arg4: memref<1x1x8x8x128xbf16, #tpu.memory_space<vmem>>, %arg5: memref<128x32xbf16, #tpu.memory_space<vmem>>, %arg6: memref<1x32xf32, #tpu.memory_space<vmem>>, %arg7: memref<3x96x96xbf16, #tpu.memory_space<vmem>>, %arg8: memref<1x32xf32, #tpu.memory_space<vmem>>, %arg9: memref<32x128xbf16, #tpu.memory_space<vmem>>, %arg10: memref<1x128xf32, #tpu.memory_space<vmem>>, %arg11: memref<1x4x8x8x128xf32, #tpu.memory_space<vmem>>, %arg12: memref<6x10x16x32xbf16, #tpu.memory_space<vmem>>, %arg13: memref<6x8x16x96xbf16, #tpu.memory_space<vmem>>) attributes {dimension_semantics = [#tpu.dimension_semantics<parallel>, #tpu.dimension_semantics<parallel>], iteration_bounds = array<i64: 2, 2>, scalar_prefetch = 0 : i64, scratch_operands = 2 : i64, tpu.core_type = #tpu.core_type<tc>, window_params = [{transform_indices = @transform_0, window_bounds = array<i64: 1, 1, 8, 8, 128>}, {transform_indices = @transform_1, window_bounds = array<i64: 1, 4, 8, 8, 128>}, {transform_indices = @transform_2, window_bounds = array<i64: 1, 1, 8, 8, 128>}, {pipeline_mode = #tpu.pipeline_mode<synchronous>, transform_indices = @transform_3, window_bounds = array<i64: 128, 32>}, {pipeline_mode = #tpu.pipeline_mode<synchronous>, transform_indices = @transform_4, window_bounds = array<i64: 1, 32>}, {pipeline_mode = #tpu.pipeline_mode<synchronous>, transform_indices = @transform_5, window_bounds = array<i64: 3, 96, 96>}, {pipeline_mode = #tpu.pipeline_mode<synchronous>, transform_indices = @transform_6, window_bounds = array<i64: 1, 32>}, {pipeline_mode = #tpu.pipeline_mode<synchronous>, transform_indices = @transform_7, window_bounds = array<i64: 32, 128>}, {pipeline_mode = #tpu.pipeline_mode<synchronous>, transform_indices = @transform_8, window_bounds = array<i64: 1, 128>}, {transform_indices = @transform_9, window_bounds = array<i64: 1, 4, 8, 8, 128>}]} {
    %cst = arith.constant 0.000000e+00 : bf16
    %0 = vector.broadcast %cst : bf16 to vector<6x10x16x32xbf16>
    %c0 = arith.constant 0 : index
    %c0_0 = arith.constant 0 : index
    %c0_1 = arith.constant 0 : index
    %c0_2 = arith.constant 0 : index
    %1 = vector.load %arg12[%c0, %c0_0, %c0_1, %c0_2] : memref<6x10x16x32xbf16, #tpu.memory_space<vmem>>, vector<6x10x16x32xbf16>
    tpu.vector_store %arg12[%c0, %c0_0, %c0_1, %c0_2], %0 {strides = array<i32>} : memref<6x10x16x32xbf16, #tpu.memory_space<vmem>>, vector<6x10x16x32xbf16>,
    %c0_3 = arith.constant 0 : index
    %c0_4 = arith.constant 0 : index
    %c0_5 = arith.constant 0 : index
    %c0_6 = arith.constant 0 : index
    %c0_7 = arith.constant 0 : index
    %2 = vector.load %arg3[%c0_3, %c0_4, %c0_5, %c0_6, %c0_7] : memref<1x4x8x8x128xbf16, #tpu.memory_space<vmem>>, vector<1x4x8x8x128xbf16>
    %3 = vector.shape_cast %2 : vector<1x4x8x8x128xbf16> to vector<4x8x8x128xbf16>
    %4 = vector.shape_cast %3 : vector<4x8x8x128xbf16> to vector<256x128xbf16>
    %c0_8 = arith.constant 0 : index
    %c0_9 = arith.constant 0 : index
    %5 = vector.load %arg5[%c0_8, %c0_9] : memref<128x32xbf16, #tpu.memory_space<vmem>>, vector<128x32xbf16>
    %cst_10 = arith.constant dense<0.000000e+00> : vector<256x32xf32>
    %6 = tpu.matmul %4, %5, %cst_10 {dimension_numbers = #tpu.dot_dimension_numbers<[1], [0], [0], [1], [0, 0, 1, 1], [], []>} : vector<256x128xbf16>, vector<128x32xbf16>, vector<256x32xf32> -> vector<256x32xf32>
    %c0_11 = arith.constant 0 : index
    %c0_12 = arith.constant 0 : index
    %7 = vector.load %arg6[%c0_11, %c0_12] : memref<1x32xf32, #tpu.memory_space<vmem>>, vector<1x32xf32>
    %8 = vector.broadcast %7 : vector<1x32xf32> to vector<256x32xf32>
    %9 = arith.addf %6, %8 : vector<256x32xf32>
    %cst_13 = arith.constant 0.000000e+00 : f32
    %10 = vector.broadcast %cst_13 : f32 to vector<256x32xf32>
    %11 = arith.maximumf %9, %10 : vector<256x32xf32>
    %12 = arith.truncf %11 : vector<256x32xf32> to vector<256x32xbf16>
    %13 = vector.shape_cast %12 : vector<256x32xbf16> to vector<4x8x8x32xbf16>
    %c1 = arith.constant 1 : index
    %c1_14 = arith.constant 1 : index
    %c1_15 = arith.constant 1 : index
    %c0_16 = arith.constant 0 : index
    %14 = vector.load %arg12[%c1, %c1_14, %c1_15, %c0_16] : memref<6x10x16x32xbf16, #tpu.memory_space<vmem>>, vector<4x8x8x32xbf16>
    tpu.vector_store %arg12[%c1, %c1_14, %c1_15, %c0_16], %13 {strides = array<i32>} : memref<6x10x16x32xbf16, #tpu.memory_space<vmem>>, vector<4x8x8x32xbf16>,
    %c0_i32 = arith.constant 0 : i32
    %15 = arith.cmpi sgt, %arg1, %c0_i32 : i32
    %16 = arith.extui %15 : i1 to i32
    %c0_i32_17 = arith.constant 0 : i32
    %17 = arith.cmpi ne, %16, %c0_i32_17 : i32
    scf.if %17 {
      %c0_30 = arith.constant 0 : index
      %c0_31 = arith.constant 0 : index
      %c0_32 = arith.constant 0 : index
      %c0_33 = arith.constant 0 : index
      %c0_34 = arith.constant 0 : index
      %28 = vector.load %arg2[%c0_30, %c0_31, %c0_32, %c0_33, %c0_34] : memref<1x1x8x8x128xbf16, #tpu.memory_space<vmem>>, vector<1x1x8x8x128xbf16>
      %29 = vector.shape_cast %28 : vector<1x1x8x8x128xbf16> to vector<8x8x128xbf16>
      %30 = vector.shape_cast %29 : vector<8x8x128xbf16> to vector<64x128xbf16>
      %c0_35 = arith.constant 0 : index
      %c0_36 = arith.constant 0 : index
      %31 = vector.load %arg5[%c0_35, %c0_36] : memref<128x32xbf16, #tpu.memory_space<vmem>>, vector<128x32xbf16>
      %cst_37 = arith.constant dense<0.000000e+00> : vector<64x32xf32>
      %32 = tpu.matmul %30, %31, %cst_37 {dimension_numbers = #tpu.dot_dimension_numbers<[1], [0], [0], [1], [0, 0, 1, 1], [], []>} : vector<64x128xbf16>, vector<128x32xbf16>, vector<64x32xf32> -> vector<64x32xf32>
      %c0_38 = arith.constant 0 : index
      %c0_39 = arith.constant 0 : index
      %33 = vector.load %arg6[%c0_38, %c0_39] : memref<1x32xf32, #tpu.memory_space<vmem>>, vector<1x32xf32>
      %34 = vector.broadcast %33 : vector<1x32xf32> to vector<64x32xf32>
      %35 = arith.addf %32, %34 : vector<64x32xf32>
      %cst_40 = arith.constant 0.000000e+00 : f32
      %36 = vector.broadcast %cst_40 : f32 to vector<64x32xf32>
      %37 = arith.maximumf %35, %36 : vector<64x32xf32>
      %38 = arith.truncf %37 : vector<64x32xf32> to vector<64x32xbf16>
      %39 = vector.shape_cast %38 : vector<64x32xbf16> to vector<8x8x32xbf16>
      %c0_41 = arith.constant 0 : index
      %c1_42 = arith.constant 1 : index
      %c1_43 = arith.constant 1 : index
      %c0_44 = arith.constant 0 : index
      %40 = vector.load %arg12[%c0_41, %c1_42, %c1_43, %c0_44] : memref<6x10x16x32xbf16, #tpu.memory_space<vmem>>, vector<1x8x8x32xbf16>
      %41 = vector.shape_cast %40 : vector<1x8x8x32xbf16> to vector<8x8x32xbf16>
      %42 = vector.shape_cast %39 : vector<8x8x32xbf16> to vector<1x8x8x32xbf16>
      tpu.vector_store %arg12[%c0_41, %c1_42, %c1_43, %c0_44], %42 {strides = array<i32>} : memref<6x10x16x32xbf16, #tpu.memory_space<vmem>>, vector<1x8x8x32xbf16>,
    } else {
    }
    %c1_i32 = arith.constant 1 : i32
    %18 = arith.cmpi slt, %arg1, %c1_i32 : i32
    %19 = arith.extui %18 : i1 to i32
    %c0_i32_18 = arith.constant 0 : i32
    %20 = arith.cmpi ne, %19, %c0_i32_18 : i32
    scf.if %20 {
      %c0_30 = arith.constant 0 : index
      %c0_31 = arith.constant 0 : index
      %c0_32 = arith.constant 0 : index
      %c0_33 = arith.constant 0 : index
      %c0_34 = arith.constant 0 : index
      %28 = vector.load %arg4[%c0_30, %c0_31, %c0_32, %c0_33, %c0_34] : memref<1x1x8x8x128xbf16, #tpu.memory_space<vmem>>, vector<1x1x8x8x128xbf16>
      %29 = vector.shape_cast %28 : vector<1x1x8x8x128xbf16> to vector<8x8x128xbf16>
      %30 = vector.shape_cast %29 : vector<8x8x128xbf16> to vector<64x128xbf16>
      %c0_35 = arith.constant 0 : index
      %c0_36 = arith.constant 0 : index
      %31 = vector.load %arg5[%c0_35, %c0_36] : memref<128x32xbf16, #tpu.memory_space<vmem>>, vector<128x32xbf16>
      %cst_37 = arith.constant dense<0.000000e+00> : vector<64x32xf32>
      %32 = tpu.matmul %30, %31, %cst_37 {dimension_numbers = #tpu.dot_dimension_numbers<[1], [0], [0], [1], [0, 0, 1, 1], [], []>} : vector<64x128xbf16>, vector<128x32xbf16>, vector<64x32xf32> -> vector<64x32xf32>
      %c0_38 = arith.constant 0 : index
      %c0_39 = arith.constant 0 : index
      %33 = vector.load %arg6[%c0_38, %c0_39] : memref<1x32xf32, #tpu.memory_space<vmem>>, vector<1x32xf32>
      %34 = vector.broadcast %33 : vector<1x32xf32> to vector<64x32xf32>
      %35 = arith.addf %32, %34 : vector<64x32xf32>
      %cst_40 = arith.constant 0.000000e+00 : f32
      %36 = vector.broadcast %cst_40 : f32 to vector<64x32xf32>
      %37 = arith.maximumf %35, %36 : vector<64x32xf32>
      %38 = arith.truncf %37 : vector<64x32xf32> to vector<64x32xbf16>
      %39 = vector.shape_cast %38 : vector<64x32xbf16> to vector<8x8x32xbf16>
      %c5 = arith.constant 5 : index
      %c1_41 = arith.constant 1 : index
      %c1_42 = arith.constant 1 : index
      %c0_43 = arith.constant 0 : index
      %40 = vector.load %arg12[%c5, %c1_41, %c1_42, %c0_43] : memref<6x10x16x32xbf16, #tpu.memory_space<vmem>>, vector<1x8x8x32xbf16>
      %41 = vector.shape_cast %40 : vector<1x8x8x32xbf16> to vector<8x8x32xbf16>
      %42 = vector.shape_cast %39 : vector<8x8x32xbf16> to vector<1x8x8x32xbf16>
      tpu.vector_store %arg12[%c5, %c1_41, %c1_42, %c0_43], %42 {strides = array<i32>} : memref<6x10x16x32xbf16, #tpu.memory_space<vmem>>, vector<1x8x8x32xbf16>,
    } else {
    }
    %c0_19 = arith.constant 0 : index
    %c0_20 = arith.constant 0 : index
    %c0_21 = arith.constant 0 : index
    %c0_22 = arith.constant 0 : index
    %21 = vector.load %arg12[%c0_19, %c0_20, %c0_21, %c0_22] : memref<6x10x16x32xbf16, #tpu.memory_space<vmem>>, vector<6x10x16x32xbf16>
    %22 = vector.extract_strided_slice %21 {offsets = [0, 0, 0, 0], sizes = [6, 8, 16, 32], strides = [1, 1, 1, 1]} : vector<6x10x16x32xbf16> to vector<6x8x16x32xbf16>
    %23 = vector.extract_strided_slice %21 {offsets = [0, 1, 0, 0], sizes = [6, 8, 16, 32], strides = [1, 1, 1, 1]} : vector<6x10x16x32xbf16> to vector<6x8x16x32xbf16>
    %24 = vector.extract_strided_slice %21 {offsets = [0, 2, 0, 0], sizes = [6, 8, 16, 32], strides = [1, 1, 1, 1]} : vector<6x10x16x32xbf16> to vector<6x8x16x32xbf16>
    %25 = tpu.concatenate %22, %23, %24 in 3 : vector<6x8x16x32xbf16>, vector<6x8x16x32xbf16>, vector<6x8x16x32xbf16> -> vector<6x8x16x96xbf16>
    %c0_23 = arith.constant 0 : index
    %c0_24 = arith.constant 0 : index
    %c0_25 = arith.constant 0 : index
    %c0_26 = arith.constant 0 : index
    %26 = vector.load %arg13[%c0_23, %c0_24, %c0_25, %c0_26] : memref<6x8x16x96xbf16, #tpu.memory_space<vmem>>, vector<6x8x16x96xbf16>
    tpu.vector_store %arg13[%c0_23, %c0_24, %c0_25, %c0_26], %25 {strides = array<i32>} : memref<6x8x16x96xbf16, #tpu.memory_space<vmem>>, vector<6x8x16x96xbf16>,
    %c0_i32_27 = arith.constant 0 : i32
    %c4_i32 = arith.constant 4 : i32
    %27 = arith.addi %c0_i32_27, %c4_i32 : i32
    %c1_i32_28 = arith.constant 1 : i32
    scf.for %arg14 = %c0_i32_27 to %27 step %c1_i32_28  : i32 {
      %cst_30 = arith.constant 0.000000e+00 : f32
      %28 = vector.broadcast %cst_30 : f32 to vector<128x96xf32>
      %c0_i32_31 = arith.constant 0 : i32
      %29 = arith.addi %arg14, %c0_i32_31 : i32
      %30 = arith.index_cast %29 : i32 to index
      %c0_32 = arith.constant 0 : index
      %c0_33 = arith.constant 0 : index
      %c0_34 = arith.constant 0 : index
      %31 = vector.load %arg13[%30, %c0_32, %c0_33, %c0_34] : memref<6x8x16x96xbf16, #tpu.memory_space<vmem>>, vector<1x8x16x96xbf16>
      %32 = vector.shape_cast %31 : vector<1x8x16x96xbf16> to vector<8x16x96xbf16>
      %33 = vector.shape_cast %32 : vector<8x16x96xbf16> to vector<128x96xbf16>
      %c0_35 = arith.constant 0 : index
      %c0_36 = arith.constant 0 : index
      %c0_37 = arith.constant 0 : index
      %34 = vector.load %arg7[%c0_35, %c0_36, %c0_37] : memref<3x96x96xbf16, #tpu.memory_space<vmem>>, vector<1x96x96xbf16>
      %35 = vector.shape_cast %34 : vector<1x96x96xbf16> to vector<96x96xbf16>
      %cst_38 = arith.constant dense<0.000000e+00> : vector<128x96xf32>
      %36 = tpu.matmul %33, %35, %cst_38 {dimension_numbers = #tpu.dot_dimension_numbers<[1], [0], [0], [1], [0, 0, 1, 1], [], []>} : vector<128x96xbf16>, vector<96x96xbf16>, vector<128x96xf32> -> vector<128x96xf32>
      %37 = arith.addf %28, %36 : vector<128x96xf32>
      %c1_i32_39 = arith.constant 1 : i32
      %38 = arith.addi %arg14, %c1_i32_39 : i32
      %39 = arith.index_cast %38 : i32 to index
      %c0_40 = arith.constant 0 : index
      %c0_41 = arith.constant 0 : index
      %c0_42 = arith.constant 0 : index
      %40 = vector.load %arg13[%39, %c0_40, %c0_41, %c0_42] : memref<6x8x16x96xbf16, #tpu.memory_space<vmem>>, vector<1x8x16x96xbf16>
      %41 = vector.shape_cast %40 : vector<1x8x16x96xbf16> to vector<8x16x96xbf16>
      %42 = vector.shape_cast %41 : vector<8x16x96xbf16> to vector<128x96xbf16>
      %c1_43 = arith.constant 1 : index
      %c0_44 = arith.constant 0 : index
      %c0_45 = arith.constant 0 : index
      %43 = vector.load %arg7[%c1_43, %c0_44, %c0_45] : memref<3x96x96xbf16, #tpu.memory_space<vmem>>, vector<1x96x96xbf16>
      %44 = vector.shape_cast %43 : vector<1x96x96xbf16> to vector<96x96xbf16>
      %cst_46 = arith.constant dense<0.000000e+00> : vector<128x96xf32>
      %45 = tpu.matmul %42, %44, %cst_46 {dimension_numbers = #tpu.dot_dimension_numbers<[1], [0], [0], [1], [0, 0, 1, 1], [], []>} : vector<128x96xbf16>, vector<96x96xbf16>, vector<128x96xf32> -> vector<128x96xf32>
      %46 = arith.addf %37, %45 : vector<128x96xf32>
      %c2_i32 = arith.constant 2 : i32
      %47 = arith.addi %arg14, %c2_i32 : i32
      %48 = arith.index_cast %47 : i32 to index
      %c0_47 = arith.constant 0 : index
      %c0_48 = arith.constant 0 : index
      %c0_49 = arith.constant 0 : index
      %49 = vector.load %arg13[%48, %c0_47, %c0_48, %c0_49] : memref<6x8x16x96xbf16, #tpu.memory_space<vmem>>, vector<1x8x16x96xbf16>
      %50 = vector.shape_cast %49 : vector<1x8x16x96xbf16> to vector<8x16x96xbf16>
      %51 = vector.shape_cast %50 : vector<8x16x96xbf16> to vector<128x96xbf16>
      %c2 = arith.constant 2 : index
      %c0_50 = arith.constant 0 : index
      %c0_51 = arith.constant 0 : index
      %52 = vector.load %arg7[%c2, %c0_50, %c0_51] : memref<3x96x96xbf16, #tpu.memory_space<vmem>>, vector<1x96x96xbf16>
      %53 = vector.shape_cast %52 : vector<1x96x96xbf16> to vector<96x96xbf16>
      %cst_52 = arith.constant dense<0.000000e+00> : vector<128x96xf32>
      %54 = tpu.matmul %51, %53, %cst_52 {dimension_numbers = #tpu.dot_dimension_numbers<[1], [0], [0], [1], [0, 0, 1, 1], [], []>} : vector<128x96xbf16>, vector<96x96xbf16>, vector<128x96xf32> -> vector<128x96xf32>
      %55 = arith.addf %46, %54 : vector<128x96xf32>
      %56 = vector.shape_cast %55 : vector<128x96xf32> to vector<8x16x96xf32>
      %57 = vector.extract_strided_slice %56 {offsets = [0, 0, 0], sizes = [8, 8, 32], strides = [1, 1, 1]} : vector<8x16x96xf32> to vector<8x8x32xf32>
      %58 = vector.extract_strided_slice %56 {offsets = [0, 1, 32], sizes = [8, 8, 32], strides = [1, 1, 1]} : vector<8x16x96xf32> to vector<8x8x32xf32>
      %59 = arith.addf %57, %58 : vector<8x8x32xf32>
      %60 = vector.extract_strided_slice %56 {offsets = [0, 2, 64], sizes = [8, 8, 32], strides = [1, 1, 1]} : vector<8x16x96xf32> to vector<8x8x32xf32>
      %61 = arith.addf %59, %60 : vector<8x8x32xf32>
      %c0_53 = arith.constant 0 : index
      %c0_54 = arith.constant 0 : index
      %62 = vector.load %arg8[%c0_53, %c0_54] : memref<1x32xf32, #tpu.memory_space<vmem>>, vector<1x32xf32>
      %63 = vector.shape_cast %62 : vector<1x32xf32> to vector<1x1x32xf32>
      %64 = vector.broadcast %63 : vector<1x1x32xf32> to vector<8x8x32xf32>
      %65 = arith.addf %61, %64 : vector<8x8x32xf32>
      %cst_55 = arith.constant 0.000000e+00 : f32
      %66 = vector.broadcast %cst_55 : f32 to vector<8x8x32xf32>
      %67 = arith.maximumf %65, %66 : vector<8x8x32xf32>
      %68 = vector.shape_cast %67 : vector<8x8x32xf32> to vector<64x32xf32>
      %69 = arith.truncf %68 : vector<64x32xf32> to vector<64x32xbf16>
      %c0_56 = arith.constant 0 : index
      %c0_57 = arith.constant 0 : index
      %70 = vector.load %arg9[%c0_56, %c0_57] : memref<32x128xbf16, #tpu.memory_space<vmem>>, vector<32x128xbf16>
      %cst_58 = arith.constant dense<0.000000e+00> : vector<64x128xf32>
      %71 = tpu.matmul %69, %70, %cst_58 {dimension_numbers = #tpu.dot_dimension_numbers<[1], [0], [0], [1], [0, 0, 1, 1], [], []>} : vector<64x32xbf16>, vector<32x128xbf16>, vector<64x128xf32> -> vector<64x128xf32>
      %c0_59 = arith.constant 0 : index
      %72 = arith.index_cast %arg14 : i32 to index
      %c0_60 = arith.constant 0 : index
      %c0_61 = arith.constant 0 : index
      %c0_62 = arith.constant 0 : index
      %73 = vector.load %arg3[%c0_59, %72, %c0_60, %c0_61, %c0_62] : memref<1x4x8x8x128xbf16, #tpu.memory_space<vmem>>, vector<1x1x8x8x128xbf16>
      %74 = vector.shape_cast %73 : vector<1x1x8x8x128xbf16> to vector<8x8x128xbf16>
      %75 = arith.extf %74 : vector<8x8x128xbf16> to vector<8x8x128xf32>
      %76 = vector.shape_cast %75 : vector<8x8x128xf32> to vector<64x128xf32>
      %c0_63 = arith.constant 0 : index
      %c0_64 = arith.constant 0 : index
      %77 = vector.load %arg10[%c0_63, %c0_64] : memref<1x128xf32, #tpu.memory_space<vmem>>, vector<1x128xf32>
      %78 = vector.broadcast %77 : vector<1x128xf32> to vector<64x128xf32>
      %79 = arith.addf %71, %78 : vector<64x128xf32>
      %80 = arith.addf %79, %76 : vector<64x128xf32>
      %cst_65 = arith.constant 0.000000e+00 : f32
      %81 = vector.broadcast %cst_65 : f32 to vector<64x128xf32>
      %82 = arith.maximumf %80, %81 : vector<64x128xf32>
      %83 = vector.shape_cast %82 : vector<64x128xf32> to vector<8x8x128xf32>
      %c0_66 = arith.constant 0 : index
      %84 = arith.index_cast %arg14 : i32 to index
      %c0_67 = arith.constant 0 : index
      %c0_68 = arith.constant 0 : index
      %c0_69 = arith.constant 0 : index
      %85 = vector.load %arg11[%c0_66, %84, %c0_67, %c0_68, %c0_69] : memref<1x4x8x8x128xf32, #tpu.memory_space<vmem>>, vector<1x1x8x8x128xf32>
      %86 = vector.shape_cast %85 : vector<1x1x8x8x128xf32> to vector<8x8x128xf32>
      %87 = vector.shape_cast %83 : vector<8x8x128xf32> to vector<1x1x8x8x128xf32>
      tpu.vector_store %arg11[%c0_66, %84, %c0_67, %c0_68, %c0_69], %87 {strides = array<i32>} : memref<1x4x8x8x128xf32, #tpu.memory_space<vmem>>, vector<1x1x8x8x128xf32>,
    }
    %c4_i32_29 = arith.constant 4 : i32
    return
  }
  func.func @transform_0(%arg0: i32, %arg1: i32) -> (i32, i32, i32, i32, i32) {
    %c4_i32 = arith.constant 4 : i32
    %0 = arith.muli %arg1, %c4_i32 : i32
    %c1_i32 = arith.constant 1 : i32
    %1 = arith.subi %0, %c1_i32 : i32
    %c0_i32 = arith.constant 0 : i32
    %2 = arith.maxsi %1, %c0_i32 : i32
    %c0_i32_0 = arith.constant 0 : i32
    %c0_i32_1 = arith.constant 0 : i32
    %c0_i32_2 = arith.constant 0 : i32
    %c0_i32_3 = arith.constant 0 : i32
    return %arg0, %2, %c0_i32_0, %c0_i32_1, %c0_i32_2 : i32, i32, i32, i32, i32
  }
  func.func @transform_1(%arg0: i32, %arg1: i32) -> (i32, i32, i32, i32, i32) {
    %c0_i32 = arith.constant 0 : i32
    %c0_i32_0 = arith.constant 0 : i32
    %c0_i32_1 = arith.constant 0 : i32
    %c0_i32_2 = arith.constant 0 : i32
    return %arg0, %arg1, %c0_i32, %c0_i32_0, %c0_i32_1 : i32, i32, i32, i32, i32
  }
  func.func @transform_2(%arg0: i32, %arg1: i32) -> (i32, i32, i32, i32, i32) {
    %c4_i32 = arith.constant 4 : i32
    %0 = arith.muli %arg1, %c4_i32 : i32
    %c4_i32_0 = arith.constant 4 : i32
    %1 = arith.addi %0, %c4_i32_0 : i32
    %c7_i32 = arith.constant 7 : i32
    %2 = arith.minsi %1, %c7_i32 : i32
    %c0_i32 = arith.constant 0 : i32
    %c0_i32_1 = arith.constant 0 : i32
    %c0_i32_2 = arith.constant 0 : i32
    %c0_i32_3 = arith.constant 0 : i32
    return %arg0, %2, %c0_i32, %c0_i32_1, %c0_i32_2 : i32, i32, i32, i32, i32
  }
  func.func @transform_3(%arg0: i32, %arg1: i32) -> (i32, i32) {
    %c0_i32 = arith.constant 0 : i32
    %c0_i32_0 = arith.constant 0 : i32
    %c0_i32_1 = arith.constant 0 : i32
    return %c0_i32, %c0_i32_0 : i32, i32
  }
  func.func @transform_4(%arg0: i32, %arg1: i32) -> (i32, i32) {
    %c0_i32 = arith.constant 0 : i32
    %c0_i32_0 = arith.constant 0 : i32
    %c0_i32_1 = arith.constant 0 : i32
    return %c0_i32, %c0_i32_0 : i32, i32
  }
  func.func @transform_5(%arg0: i32, %arg1: i32) -> (i32, i32, i32) {
    %c0_i32 = arith.constant 0 : i32
    %c0_i32_0 = arith.constant 0 : i32
    %c0_i32_1 = arith.constant 0 : i32
    %c0_i32_2 = arith.constant 0 : i32
    return %c0_i32, %c0_i32_0, %c0_i32_1 : i32, i32, i32
  }
  func.func @transform_6(%arg0: i32, %arg1: i32) -> (i32, i32) {
    %c0_i32 = arith.constant 0 : i32
    %c0_i32_0 = arith.constant 0 : i32
    %c0_i32_1 = arith.constant 0 : i32
    return %c0_i32, %c0_i32_0 : i32, i32
  }
  func.func @transform_7(%arg0: i32, %arg1: i32) -> (i32, i32) {
    %c0_i32 = arith.constant 0 : i32
    %c0_i32_0 = arith.constant 0 : i32
    %c0_i32_1 = arith.constant 0 : i32
    return %c0_i32, %c0_i32_0 : i32, i32
  }
  func.func @transform_8(%arg0: i32, %arg1: i32) -> (i32, i32) {
    %c0_i32 = arith.constant 0 : i32
    %c0_i32_0 = arith.constant 0 : i32
    %c0_i32_1 = arith.constant 0 : i32
    return %c0_i32, %c0_i32_0 : i32, i32
  }
  func.func @transform_9(%arg0: i32, %arg1: i32) -> (i32, i32, i32, i32, i32) {
    %c0_i32 = arith.constant 0 : i32
    %c0_i32_0 = arith.constant 0 : i32
    %c0_i32_1 = arith.constant 0 : i32
    %c0_i32_2 = arith.constant 0 : i32
    return %arg0, %arg1, %c0_i32, %c0_i32_0, %c0_i32_1 : i32, i32, i32, i32, i32
  }
}

</mosaic_0001>

<bundles_post_ra>
// kernel: _lambda_.1
= control target key start
LH: loop header
LB: loop body
LE: loop exit
PB: predicated region body
PF: predicated region fallthrough
CT: control target
= control target key end

     0   :  { %14 = vsyncpa [#allocation5], 0  ;;  %s7729_s0 = inlined_call_operand.vmem [shape: bf16[2,8,8,8,128], index: 0, kind: input, shape index: {}, may-alias: {0,1,2}]   ;;  %s7730_s1 = inlined_call_operand.vmem [shape: bf16[2,8,8,8,128], index: 1, kind: input, shape index: {}, may-alias: {0,1,2}]   ;;  %s7731_s2 = inlined_call_operand.vmem [shape: bf16[2,8,8,8,128], index: 2, kind: input, shape index: {}, may-alias: {0,1,2}]   ;;  %s7732_s3 = inlined_call_operand.vmem [shape: bf16[128,32], index: 3, kind: input, shape index: {}]   ;;  %s7733_s4 = inlined_call_operand.vmem [shape: f32[1,32], index: 4, kind: input, shape index: {}]   ;;  %s7734_s5 = inlined_call_operand.vmem [shape: bf16[3,96,96], index: 5, kind: input, shape index: {}]   ;;  %s7735_s6 = inlined_call_operand.vmem [shape: f32[1,32], index: 6, kind: input, shape index: {}]   ;;  %s7736_s7 = inlined_call_operand.vmem [shape: bf16[32,128], index: 7, kind: input, shape index: {}]   ;;  %s7737_s8 = inlined_call_operand.vmem [shape: f32[1,128], index: 8, kind: input, shape index: {}]   ;;  %s7738_s9 = inlined_call_operand.hbm [shape: f32[2,8,8,8,128], index: 9, kind: output, shape index: {}]  }
   0x1   :  { %16 = vsyncpa [#allocation5 + $0x1], 0  ;;  %s5997_s30 = smov 0   ;;  %s5999_s10 = smov 0  }
   0x2   :  { %s6001_s11 = smov 0   ;;  %s6003_s12 = smov 0  }
   0x3   :  { %s6005_s13 = smov 0   ;;  %s6007_s14 = smov 0  }
   0x4   :  { %s6009_s15 = smov 0   ;;  %s6011_s16 = smov 0  }
   0x5 LB: > { %7769 = sst [smem:[#allocation7_spill]] %s5905_s30  ;;  %s4745_s17 = sadd.s32 4294967295, %s5933_s16   ;;  %s5933_s16 = sphi %s6011_s16, %s22_s16   ;;  %s5929_s15 = sphi %s6009_s15, %s7870_s15   ;;  %s5925_s14 = sphi %s6007_s14, %s7869_s14   ;;  %s5921_s13 = sphi %s6005_s13, %s7868_s13   ;;  %s5917_s12 = sphi %s6003_s12, %s7873_s12   ;;  %s5913_s11 = sphi %s6001_s11, %s7866_s11   ;;  %s5909_s10 = sphi %s5999_s10, %s7872_s10   ;;  %s5905_s30 = sphi %s5997_s30, %s7871_s30  }
   0x6   : > { %7770 = sst [smem:[#allocation8_spill]] %s5913_s11  ;;  %s4746_s18 = sadd.s32 4294967294, %s5933_s16  }
   0x7   : > { %7771 = sst [smem:[#allocation9_spill]] %s5925_s14  ;;  %s31_s19 = sadd.s32 1, %s5925_s14 }
   0x8   : > { %7772 = sst [smem:[#allocation10_spill]] %s5929_s15  ;;  %p32_p0 = scmp.ge.s32.totalorder %s31_s19, 2 }
   0x9   : > { %7773 = sst [smem:[#allocation11_spill]] %s5933_s16  ;;  %s34_s20 = sadd.s32 1, %s5929_s15 }
   0xa   : > { %p279_p1 = scmp.ne.s32.totalorder %s5913_s11, %s5909_s10  ;;  %p280_p2 = scmp.eq.s32.totalorder %s4745_s17, 3 }
   0xb   : > { %s7875_s19 = smov (%p32_p0, %s31_s19), 0  ;;  %s7877_s20 = smov (!%p32_p0, %s34_s20), %s5929_s15 }
   0xc   : > { %7774 = sst [smem:[#allocation12_spill]] %s7875_s19  ;;  %s265_s21 = ssub.s32 %s5925_s14, %s7875_s19 }
   0xd   : > { %p6048_p3 = por %p280_p2, %p279_p1  ;;  %p36_p4 = scmp.ge.s32.totalorder %s7877_s20, 2 }
   0xe   : > { %p285_p5 = scmp.ne.s32.totalorder %s5909_s10, %s5905_s30  ;;  %p286_p6 = scmp.eq.s32.totalorder %s4746_s18, 3 }
   0xf   : > { %p4755_p7 = scmp.ge.s32.totalorder %s5933_s16, 1  ;;  %s7879_s20 = smov (%p36_p4, %s7877_s20), 0 }
  0x10   : > { %7776 = sst [smem:[#allocation13_spill]] %s7879_s20  ;;  %p6057_p8 = por %p286_p6, %p285_p5 }
  0x11   : > { %p376_p9 = scmp.lt.s32.totalorder %s5933_s16, 5  ;;  %s264_s24 = ssub.s32 %s5929_s15, %s7879_s20 }
  0x12   : > { %s7777_s23 = scalar_select %p6057_p8, 1, 0 }
  0x13   : > { %s269_s25 = sadd.s32 1, %s5913_s11  ;;  %s266_s26 = sor.u32 %s265_s21, %s264_s24 }
  0x14   : > { %7778 = sst [smem:[#allocation14_spill]] %s7777_s23  ;;  %p377_p10 = pnand %p4755_p7, %p376_p9 }
  0x15   : > { %p267_p11 = scmp.eq.s32.totalorder %s266_s26, 0 }
  0x16   : > { %380 = sbr.rel (%p377_p10) target bundleno = 1797 (0x705), region = 56 }
  0x17   : > { %s6066_s27 = scalar_select %p267_p11, %s5913_s11, %s269_s25  }
  0x19   : > { %7779 = sst [smem:[#allocation15_spill]] %s6066_s27 }
  0x1b   : > { %s7741_s28 = sand.u32 1, %s5909_s10   ;;  %v5685_v0 = vld [vmem:[%s7732_s3 + $0x38] sm:$0xff]   ;;  %v5686_v1 = vld [vmem:[%s7732_s3 + $0x30] sm:$0xff]   ;;  %s6080_s21 = sshll.u32 %s5917_s12, 2  ;;  %v6085_v2 = vld [vmem:[%s7732_s3 + $0x28] sm:$0xff]   ;;  %vm490_vm0 = vcmask 257024  }
  0x1c   : > { %s6074_s18 = sshll.u32 %s7741_s28, 8  ;;  %5347 = vmatprep.subr.bf16.mxu0 %v5685_v0  ;;  %5539 = vmatprep.subr.bf16.mxu1 %v5685_v0  ;;  %s6088_s26 = sadd.s32 4294967295, %s6080_s21  ;;  %v6100_v3 = vld [vmem:[%s7732_s3 + $0x20] sm:$0xff]   ;;  %v5939_v4 = vmov 0   ;;  %v5689_v5 = vld [vmem:[%s7732_s3 + $0x18] sm:$0xff]   ;;  %v5690_v6 = vld [vmem:[%s7732_s3 + $0x10] sm:$0xff]  }
  0x1d   : > { %5348 = vmatpush3.bf16.msra.mxu0 %v5685_v0  ;;  %5547 = vmatpush3.bf16.msra.mxu1 %v5685_v0  ;;  %p445_p12 = scmp.gt.s32.totalorder %s6088_s26, 0  ;;  %p447_p13 = scmp.lt.s32.totalorder %s5921_s13, 1  ;;  %491 = vst.msk [vmem:[#allocation2] sm:$0xf] %vm490_vm0, %v5939_v4  ;;  %492 = vst.msk [vmem:[#allocation2 + $0x4] sm:$0xf] %vm490_vm0, %v5939_v4 }
  0x1e   : > { %5349 = vmatprep.subr.bf16.mxu0 %v5686_v1  ;;  %5540 = vmatprep.subr.bf16.mxu1 %v5686_v1  ;;  %p4759_p0 = scmp.lt.s32.totalorder %s6088_s26, 7  ;;  %p463_p1 = scmp.lt.s32.totalorder %s6080_s21, 7  ;;  %493 = vst.msk [vmem:[#allocation2 + $0x8] sm:$0xf] %vm490_vm0, %v5939_v4  ;;  %494 = vst.msk [vmem:[#allocation2 + $0xc] sm:$0xf] %vm490_vm0, %v5939_v4 }
  0x1f   : > { %s6093_s19 = scalar_select %p445_p12, %s6088_s26, 0  ;;  %495 = vst.msk [vmem:[#allocation2 + $0x10] sm:$0xf] %vm490_vm0, %v5939_v4  ;;  %496 = vst.msk [vmem:[#allocation2 + $0x14] sm:$0xf] %vm490_vm0, %v5939_v4  ;;  %v5691_v9 = vld [vmem:[%s7732_s3 + $0x8] sm:$0xff]  }
  0x20   : > { %s6103_s17 = scalar_select %p447_p13, %s5921_s13, 1  ;;  %497 = vst.msk [vmem:[#allocation2 + $0x18] sm:$0xf] %vm490_vm0, %v5939_v4  ;;  %498 = vst.msk [vmem:[#allocation2 + $0x1c] sm:$0xf] %vm490_vm0, %v5939_v4  ;;  %v5692_v10 = vld [vmem:[%s7732_s3] sm:$0xff]  }
  0x21   : > { %5350 = vmatpush3.bf16.msra.mxu0 %v5686_v1  ;;  %5548 = vmatpush3.bf16.msra.mxu1 %v5686_v1  ;;  %499 = vst.msk [vmem:[#allocation2 + $0x20] sm:$0xf] %vm490_vm0, %v5939_v4  ;;  %500 = vst.msk [vmem:[#allocation2 + $0x24] sm:$0xf] %vm490_vm0, %v5939_v4  ;;  %s472_s25 = sadd.s32 4, %s6080_s21  ;;  %s7881_s19 = smov (!%p4759_p0, %s6093_s19), 7 }
  0x22   : > { %5351 = vmatprep.subr.bf16.mxu0 %v6085_v2  ;;  %5541 = vmatprep.subr.bf16.mxu1 %v6085_v2  ;;  %501 = vst.msk [vmem:[#allocation2 + $0x28] sm:$0xf] %vm490_vm0, %v5939_v4  ;;  %502 = vst.msk [vmem:[#allocation2 + $0x2c] sm:$0xf] %vm490_vm0, %v5939_v4  ;;  %s6348_s24 = sshll.u32 %s6103_s17, 6  ;;  %s7883_s21 = smov (!%p463_p1, %s6080_s21), 7 }
  0x23   : > { %503 = vst.msk [vmem:[#allocation2 + $0x30] sm:$0xf] %vm490_vm0, %v5939_v4  ;;  %504 = vst.msk [vmem:[#allocation2 + $0x34] sm:$0xf] %vm490_vm0, %v5939_v4  ;;  %s4764_s17 = sshll.u32 %s7881_s19, 3  ;;  %p6364_p2 = scmp.lt.s32.totalorder %s472_s25, 7 }
  0x24   : > { %505 = vst.msk [vmem:[#allocation2 + $0x38] sm:$0xf] %vm490_vm0, %v5939_v4  ;;  %506 = vst.msk [vmem:[#allocation2 + $0x3c] sm:$0xf] %vm490_vm0, %v5939_v4  ;;  %s453_s15 = sadd.s32 %s6348_s24, %s4764_s17  ;;  %s4768_s14 = sshll.u32 %s7883_s21, 3  ;;  %vm1426_vm2 = vcmask 253952  }
  0x25   : > { %507 = vst.msk [vmem:[#allocation2 + $0x40] sm:$0xf] %vm490_vm0, %v5939_v4  ;;  %508 = vst.msk [vmem:[#allocation2 + $0x44] sm:$0xf] %vm490_vm0, %v5939_v4  ;;  %5352 = vmatpush3.bf16.msra.mxu0 %v6085_v2  ;;  %5549 = vmatpush3.bf16.msra.mxu1 %v6085_v2  ;;  %s4766_s26 = sshll.u32 %s453_s15, 2  ;;  %s467_s27 = sadd.s32 %s4768_s14, %s6348_s24 }
  0x26   : > { %509 = vst.msk [vmem:[#allocation2 + $0x48] sm:$0xf] %vm490_vm0, %v5939_v4  ;;  %510 = vst.msk [vmem:[#allocation2 + $0x4c] sm:$0xf] %vm490_vm0, %v5939_v4  ;;  %5353 = vmatprep.subr.bf16.mxu0 %v6100_v3  ;;  %5542 = vmatprep.subr.bf16.mxu1 %v6100_v3  ;;  %s6378_s23 = scalar_lea.vmem %s7729_s0, %s4766_s26  ;;  %s4770_s17 = sshll.u32 %s467_s27, 2 }
  0x27   : > { %511 = vst.msk [vmem:[#allocation2 + $0x50] sm:$0xf] %vm490_vm0, %v5939_v4  ;;  %512 = vst.msk [vmem:[#allocation2 + $0x54] sm:$0xf] %vm490_vm0, %v5939_v4  ;;  %s6383_s16 = scalar_lea.vmem %s7730_s1, %s4770_s17  ;;  %s7885_s25 = smov (!%p6364_p2, %s472_s25), 7 }
  0x28   : > { %517 = vst.msk [vmem:[#allocation2 + $0x68] sm:$0xf] %vm490_vm0, %v5939_v4  ;;  %518 = vst.msk [vmem:[#allocation2 + $0x6c] sm:$0xf] %vm490_vm0, %v5939_v4  ;;  %v5693_v7 = vld [vmem:[%s6383_s16] sm:$0xff]   ;;  %s7887_s25 = smov (!%p6364_p2, %s7885_s25), 7 }
  0x29   : > { %529 = vst.msk [vmem:[#allocation2 + $0x98] sm:$0xf] %vm490_vm0, %v5939_v4  ;;  %530 = vst.msk [vmem:[#allocation2 + $0x9c] sm:$0xf] %vm490_vm0, %v5939_v4  ;;  %5354 = vmatpush3.bf16.msra.mxu0 %v6100_v3  ;;  %5550 = vmatpush3.bf16.msra.mxu1 %v6100_v3  ;;  %v5694_v8 = vld [vmem:[%s6383_s16 + $0x40] sm:$0xff]   ;;  %s4775_s30 = sshll.u32 %s7887_s25, 3 }
  0x2a   : > { %531 = vst.msk [vmem:[#allocation2 + $0xa0] sm:$0xf] %vm490_vm0, %v5939_v4  ;;  %532 = vst.msk [vmem:[#allocation2 + $0xa4] sm:$0xf] %vm490_vm0, %v5939_v4  ;;  %5355 = vmatprep.subr.bf16.mxu0 %v5689_v5  ;;  %5543 = vmatprep.subr.bf16.mxu1 %v5689_v5  ;;  %s481_s15 = sadd.s32 %s4775_s30, %s6348_s24  ;;  %v5695_v11 = vld [vmem:[%s6383_s16 + $0x8] sm:$0xff]   ;;  %v5697_v13 = vld [vmem:[%s6383_s16 + $0x10] sm:$0xff]  }
  0x2b   : > { %549 = vst.msk [vmem:[#allocation2 + $0xe8] sm:$0xf] %vm490_vm0, %v5939_v4  ;;  %550 = vst.msk [vmem:[#allocation2 + $0xec] sm:$0xf] %vm490_vm0, %v5939_v4  ;;  %5363 = vmatprep.mubr.bf16.mxu0 %v5693_v7  ;;  %5379 = vmatprep.mubr.bf16.mxu1 %v5694_v8  ;;  %s4777_s20 = sshll.u32 %s481_s15, 2  ;;  %v5696_v12 = vld [vmem:[%s6383_s16 + $0x48] sm:$0xff]  }
  0x2c   : > { %551 = vst.msk [vmem:[#allocation2 + $0xf0] sm:$0xf] %vm490_vm0, %v5939_v4  ;;  %552 = vst.msk [vmem:[#allocation2 + $0xf4] sm:$0xf] %vm490_vm0, %v5939_v4  ;;  %s6401_s19 = scalar_lea.vmem %s7731_s2, %s4777_s20  ;;  %v5698_v14 = vld [vmem:[%s6383_s16 + $0x50] sm:$0xff]   ;;  %v5699_v15 = vld [vmem:[%s6383_s16 + $0x18] sm:$0xff]  }
  0x2d   : > { %569 = vst.msk [vmem:[#allocation2 + $0x138] sm:$0xf] %vm490_vm0, %v5939_v4  ;;  %570 = vst.msk [vmem:[#allocation2 + $0x13c] sm:$0xf] %vm490_vm0, %v5939_v4  ;;  %5356 = vmatpush3.bf16.msra.mxu0 %v5689_v5  ;;  %5551 = vmatpush3.bf16.msra.mxu1 %v5689_v5  ;;  %v5700_v16 = vld [vmem:[%s6383_s16 + $0x58] sm:$0xff]   ;;  %v5701_v17 = vld [vmem:[%s6383_s16 + $0x20] sm:$0xff]  }
  0x2e   : > { %571 = vst.msk [vmem:[#allocation2 + $0x140] sm:$0xf] %vm490_vm0, %v5939_v4  ;;  %572 = vst.msk [vmem:[#allocation2 + $0x144] sm:$0xf] %vm490_vm0, %v5939_v4  ;;  %5357 = vmatprep.subr.bf16.mxu0 %v5690_v6  ;;  %5544 = vmatprep.subr.bf16.mxu1 %v5690_v6  ;;  %v5702_v18 = vld [vmem:[%s6383_s16 + $0x60] sm:$0xff]   ;;  %v5703_v19 = vld [vmem:[%s6383_s16 + $0x28] sm:$0xff]  }
  0x2f   : > { %589 = vst.msk [vmem:[#allocation2 + $0x188] sm:$0xf] %vm490_vm0, %v5939_v4  ;;  %590 = vst.msk [vmem:[#allocation2 + $0x18c] sm:$0xf] %vm490_vm0, %v5939_v4  ;;  %v5704_v20 = vld [vmem:[%s6383_s16 + $0x68] sm:$0xff]   ;;  %v5705_v21 = vld [vmem:[%s6383_s16 + $0x30] sm:$0xff]  }
  0x30   : > { %591 = vst.msk [vmem:[#allocation2 + $0x190] sm:$0xf] %vm490_vm0, %v5939_v4  ;;  %592 = vst.msk [vmem:[#allocation2 + $0x194] sm:$0xf] %vm490_vm0, %v5939_v4  ;;  %v5706_v22 = vld [vmem:[%s6383_s16 + $0x70] sm:$0xff]   ;;  %v5707_v23 = vld [vmem:[%s6383_s16 + $0x38] sm:$0xff]  }
  0x31   : > { %593 = vst.msk [vmem:[#allocation2 + $0x198] sm:$0xf] %vm490_vm0, %v5939_v4  ;;  %594 = vst.msk [vmem:[#allocation2 + $0x19c] sm:$0xf] %vm490_vm0, %v5939_v4  ;;  %5358 = vmatpush3.bf16.msra.mxu0 %v5690_v6  ;;  %5552 = vmatpush3.bf16.msra.mxu1 %v5690_v6  ;;  %v5708_v24 = vld [vmem:[%s6383_s16 + $0x78] sm:$0xff]   ;;  %s442_s17 = scalar_lea.vmem [#allocation4], %s6074_s18 }
  0x32   : > { %595 = vst.msk [vmem:[#allocation2 + $0x1a0] sm:$0xf] %vm490_vm0, %v5939_v4  ;;  %596 = vst.msk [vmem:[#allocation2 + $0x1a4] sm:$0xf] %vm490_vm0, %v5939_v4  ;;  %5359 = vmatprep.subr.bf16.mxu0 %v5691_v9  ;;  %5545 = vmatprep.subr.bf16.mxu1 %v5691_v9  ;;  %v6420_v25 = vld [vmem:[%s7733_s4] ss:$0 sm:$0xff] }
  0x33   : > { %597 = vst.msk [vmem:[#allocation2 + $0x1a8] sm:$0xf] %vm490_vm0, %v5939_v4  ;;  %598 = vst.msk [vmem:[#allocation2 + $0x1ac] sm:$0xf] %vm490_vm0, %v5939_v4  ;;  %vm1421_vm1 = vsmask.f32 7938 }
  0x34   : > { %599 = vst.msk [vmem:[#allocation2 + $0x1b0] sm:$0xf] %vm490_vm0, %v5939_v4  ;;  %600 = vst.msk [vmem:[#allocation2 + $0x1b4] sm:$0xf] %vm490_vm0, %v5939_v4  ;;  %vm1427_vm3 = vsmask.f32 256 }
  0x35   : > { %601 = vst.msk [vmem:[#allocation2 + $0x1b8] sm:$0xf] %vm490_vm0, %v5939_v4  ;;  %602 = vst.msk [vmem:[#allocation2 + $0x1bc] sm:$0xf] %vm490_vm0, %v5939_v4  ;;  %5360 = vmatpush3.bf16.msra.mxu0 %v5691_v9  ;;  %5553 = vmatpush3.bf16.msra.mxu1 %v5691_v9  ;;  %v1438_v50 = vld [vmem:[#allocation2 + $0x68] sm:$0xf] }
  0x36   : > { %603 = vst.msk [vmem:[#allocation2 + $0x1c0] sm:$0xf] %vm490_vm0, %v5939_v4  ;;  %604 = vst.msk [vmem:[#allocation2 + $0x1c4] sm:$0xf] %vm490_vm0, %v5939_v4  ;;  %5361 = vmatprep.subr.bf16.mxu0 %v5692_v10  ;;  %5546 = vmatprep.subr.bf16.mxu1 %v5692_v10  ;;  %v1441_v57 = vld [vmem:[#allocation2 + $0x6c] sm:$0x1] }
  0x37   : > { %605 = vst.msk [vmem:[#allocation2 + $0x1c8] sm:$0xf] %vm490_vm0, %v5939_v4  ;;  %606 = vst.msk [vmem:[#allocation2 + $0x1cc] sm:$0xf] %vm490_vm0, %v5939_v4  ;;  %p4835_p4 = scmp.le.s32.totalorder %s5917_s12, 0 }
  0x38   : > { %607 = vst.msk [vmem:[#allocation2 + $0x1d0] sm:$0xf] %vm490_vm0, %v5939_v4  ;;  %608 = vst.msk [vmem:[#allocation2 + $0x1d4] sm:$0xf] %vm490_vm0, %v5939_v4 }
  0x39   : > { %609 = vst.msk [vmem:[#allocation2 + $0x1d8] sm:$0xf] %vm490_vm0, %v5939_v4  ;;  %610 = vst.msk [vmem:[#allocation2 + $0x1dc] sm:$0xf] %vm490_vm0, %v5939_v4  ;;  %5362 = vmatpush3.bf16.msra.mxu0 %v5692_v10  ;;  %5554 = vmatpush3.bf16.msra.mxu1 %v5692_v10 }
  0x3a   : > { %513 = vst.msk [vmem:[#allocation2 + $0x58] sm:$0xf] %vm490_vm0, %v5939_v4  ;;  %514 = vst.msk [vmem:[#allocation2 + $0x5c] sm:$0xf] %vm490_vm0, %v5939_v4 }
  0x3b   : > { %515 = vst.msk [vmem:[#allocation2 + $0x60] sm:$0xf] %vm490_vm0, %v5939_v4  ;;  %516 = vst.msk [vmem:[#allocation2 + $0x64] sm:$0xf] %vm490_vm0, %v5939_v4 }
  0x3c   : > { %519 = vst.msk [vmem:[#allocation2 + $0x70] sm:$0xf] %vm490_vm0, %v5939_v4  ;;  %520 = vst.msk [vmem:[#allocation2 + $0x74] sm:$0xf] %vm490_vm0, %v5939_v4  ;;  %5364 = vmatmul.mubr.bf16.vlgmr.msra.gmra.mxu0 %v5695_v11  ;;  %5380 = vmatmul.mubr.bf16.vlgmr.msra.gmra.mxu1 %v5696_v12 }
  0x3d   : > { %521 = vst.msk [vmem:[#allocation2 + $0x78] sm:$0xf] %vm490_vm0, %v5939_v4  ;;  %522 = vst.msk [vmem:[#allocation2 + $0x7c] sm:$0xf] %vm490_vm0, %v5939_v4  ;;  %5367 = vmatprep.mubr.bf16.mxu0 %v5697_v13  ;;  %5383 = vmatprep.mubr.bf16.mxu1 %v5698_v14 }
  0x3e   : > { %523 = vst.msk [vmem:[#allocation2 + $0x80] sm:$0xf] %vm490_vm0, %v5939_v4  ;;  %524 = vst.msk [vmem:[#allocation2 + $0x84] sm:$0xf] %vm490_vm0, %v5939_v4 }
  0x3f   : > { %525 = vst.msk [vmem:[#allocation2 + $0x88] sm:$0xf] %vm490_vm0, %v5939_v4  ;;  %526 = vst.msk [vmem:[#allocation2 + $0x8c] sm:$0xf] %vm490_vm0, %v5939_v4 }
  0x40   : > { %527 = vst.msk [vmem:[#allocation2 + $0x90] sm:$0xf] %vm490_vm0, %v5939_v4  ;;  %528 = vst.msk [vmem:[#allocation2 + $0x94] sm:$0xf] %vm490_vm0, %v5939_v4 }
  0x41   : > { %533 = vst.msk [vmem:[#allocation2 + $0xa8] sm:$0xf] %vm490_vm0, %v5939_v4  ;;  %534 = vst.msk [vmem:[#allocation2 + $0xac] sm:$0xf] %vm490_vm0, %v5939_v4  ;;  %v1423_v11 = vld [vmem:[#allocation2 + $0x58] sm:$0xf] }
  0x42   : > { %535 = vst.msk [vmem:[#allocation2 + $0xb0] sm:$0xf] %vm490_vm0, %v5939_v4  ;;  %536 = vst.msk [vmem:[#allocation2 + $0xb4] sm:$0xf] %vm490_vm0, %v5939_v4 }
  0x43   : > { %537 = vst.msk [vmem:[#allocation2 + $0xb8] sm:$0xf] %vm490_vm0, %v5939_v4  ;;  %538 = vst.msk [vmem:[#allocation2 + $0xbc] sm:$0xf] %vm490_vm0, %v5939_v4 }
  0x44   : > { %539 = vst.msk [vmem:[#allocation2 + $0xc0] sm:$0xf] %vm490_vm0, %v5939_v4  ;;  %540 = vst.msk [vmem:[#allocation2 + $0xc4] sm:$0xf] %vm490_vm0, %v5939_v4  ;;  %5368 = vmatmul.mubr.bf16.gmra.mxu0 %v5699_v15  ;;  %5384 = vmatmul.mubr.bf16.gmra.mxu1 %v5700_v16 }
  0x45   : > { %541 = vst.msk [vmem:[#allocation2 + $0xc8] sm:$0xf] %vm490_vm0, %v5939_v4  ;;  %542 = vst.msk [vmem:[#allocation2 + $0xcc] sm:$0xf] %vm490_vm0, %v5939_v4  ;;  %5371 = vmatprep.mubr.bf16.mxu0 %v5701_v17  ;;  %5387 = vmatprep.mubr.bf16.mxu1 %v5702_v18 }
  0x46   : > { %543 = vst.msk [vmem:[#allocation2 + $0xd0] sm:$0xf] %vm490_vm0, %v5939_v4  ;;  %544 = vst.msk [vmem:[#allocation2 + $0xd4] sm:$0xf] %vm490_vm0, %v5939_v4 }
  0x47   : > { %545 = vst.msk [vmem:[#allocation2 + $0xd8] sm:$0xf] %vm490_vm0, %v5939_v4  ;;  %546 = vst.msk [vmem:[#allocation2 + $0xdc] sm:$0xf] %vm490_vm0, %v5939_v4 }
  0x48   : > { %547 = vst.msk [vmem:[#allocation2 + $0xe0] sm:$0xf] %vm490_vm0, %v5939_v4  ;;  %548 = vst.msk [vmem:[#allocation2 + $0xe4] sm:$0xf] %vm490_vm0, %v5939_v4 }
  0x49   : > { %553 = vst.msk [vmem:[#allocation2 + $0xf8] sm:$0xf] %vm490_vm0, %v5939_v4  ;;  %554 = vst.msk [vmem:[#allocation2 + $0xfc] sm:$0xf] %vm490_vm0, %v5939_v4 }
  0x4a   : > { %555 = vst.msk [vmem:[#allocation2 + $0x100] sm:$0xf] %vm490_vm0, %v5939_v4  ;;  %556 = vst.msk [vmem:[#allocation2 + $0x104] sm:$0xf] %vm490_vm0, %v5939_v4 }
  0x4b   : > { %557 = vst.msk [vmem:[#allocation2 + $0x108] sm:$0xf] %vm490_vm0, %v5939_v4  ;;  %558 = vst.msk [vmem:[#allocation2 + $0x10c] sm:$0xf] %vm490_vm0, %v5939_v4 }
  0x4c   : > { %559 = vst.msk [vmem:[#allocation2 + $0x110] sm:$0xf] %vm490_vm0, %v5939_v4  ;;  %560 = vst.msk [vmem:[#allocation2 + $0x114] sm:$0xf] %vm490_vm0, %v5939_v4  ;;  %5372 = vmatmul.mubr.bf16.gmra.mxu0 %v5703_v19  ;;  %5388 = vmatmul.mubr.bf16.gmra.mxu1 %v5704_v20  ;;  %v1429_v19 = vld [vmem:[#allocation2 + $0x5c] sm:$0x1] }
  0x4d   : > { %561 = vst.msk [vmem:[#allocation2 + $0x118] sm:$0xf] %vm490_vm0, %v5939_v4  ;;  %562 = vst.msk [vmem:[#allocation2 + $0x11c] sm:$0xf] %vm490_vm0, %v5939_v4  ;;  %5375 = vmatprep.mubr.bf16.mxu0 %v5705_v21  ;;  %5391 = vmatprep.mubr.bf16.mxu1 %v5706_v22 }
  0x4e   : > { %563 = vst.msk [vmem:[#allocation2 + $0x120] sm:$0xf] %vm490_vm0, %v5939_v4  ;;  %564 = vst.msk [vmem:[#allocation2 + $0x124] sm:$0xf] %vm490_vm0, %v5939_v4 }
  0x4f   : > { %565 = vst.msk [vmem:[#allocation2 + $0x128] sm:$0xf] %vm490_vm0, %v5939_v4  ;;  %566 = vst.msk [vmem:[#allocation2 + $0x12c] sm:$0xf] %vm490_vm0, %v5939_v4 }
  0x50   : > { %567 = vst.msk [vmem:[#allocation2 + $0x130] sm:$0xf] %vm490_vm0, %v5939_v4  ;;  %568 = vst.msk [vmem:[#allocation2 + $0x134] sm:$0xf] %vm490_vm0, %v5939_v4  ;;  %v1522_v20 = vld [vmem:[#allocation2 + $0xf8] sm:$0xf] }
  0x51   : > { %573 = vst.msk [vmem:[#allocation2 + $0x148] sm:$0xf] %vm490_vm0, %v5939_v4  ;;  %574 = vst.msk [vmem:[#allocation2 + $0x14c] sm:$0xf] %vm490_vm0, %v5939_v4  ;;  %v1525_v21 = vld [vmem:[#allocation2 + $0xfc] sm:$0x1] }
  0x52   : > { %575 = vst.msk [vmem:[#allocation2 + $0x150] sm:$0xf] %vm490_vm0, %v5939_v4  ;;  %576 = vst.msk [vmem:[#allocation2 + $0x154] sm:$0xf] %vm490_vm0, %v5939_v4  ;;  %v1534_v59 = vld [vmem:[#allocation2 + $0x108] sm:$0xf] }
  0x53   : > { %577 = vst.msk [vmem:[#allocation2 + $0x158] sm:$0xf] %vm490_vm0, %v5939_v4  ;;  %578 = vst.msk [vmem:[#allocation2 + $0x15c] sm:$0xf] %vm490_vm0, %v5939_v4  ;;  %v1537_v63 = vld [vmem:[#allocation2 + $0x10c] sm:$0x1] }
  0x54   : > { %579 = vst.msk [vmem:[#allocation2 + $0x160] sm:$0xf] %vm490_vm0, %v5939_v4  ;;  %580 = vst.msk [vmem:[#allocation2 + $0x164] sm:$0xf] %vm490_vm0, %v5939_v4  ;;  %5376 = vmatmul.mubr.bf16.gmra.mxu0 %v5707_v23  ;;  %5392 = vmatmul.mubr.bf16.gmra.mxu1 %v5708_v24 }
  0x55   : > { %581 = vst.msk [vmem:[#allocation2 + $0x168] sm:$0xf] %vm490_vm0, %v5939_v4  ;;  %582 = vst.msk [vmem:[#allocation2 + $0x16c] sm:$0xf] %vm490_vm0, %v5939_v4 }
  0x56   : > { %583 = vst.msk [vmem:[#allocation2 + $0x170] sm:$0xf] %vm490_vm0, %v5939_v4  ;;  %584 = vst.msk [vmem:[#allocation2 + $0x174] sm:$0xf] %vm490_vm0, %v5939_v4 }
  0x57   : > { %585 = vst.msk [vmem:[#allocation2 + $0x178] sm:$0xf] %vm490_vm0, %v5939_v4  ;;  %586 = vst.msk [vmem:[#allocation2 + $0x17c] sm:$0xf] %vm490_vm0, %v5939_v4 }
  0x58   : > { %587 = vst.msk [vmem:[#allocation2 + $0x180] sm:$0xf] %vm490_vm0, %v5939_v4  ;;  %588 = vst.msk [vmem:[#allocation2 + $0x184] sm:$0xf] %vm490_vm0, %v5939_v4 }
  0x59   : > { %vm6430_vm4 = vmand %vm490_vm0, %vm1421_vm1 }
  0x5a   : > { %vm6442_vm5 = vmand %vm1426_vm2, %vm1427_vm3 }
  0xfc   : > { %v5365_v26 = vpop.f32.mrf.mxu0  ;;  %v5381_v27 = vpop.f32.mrf.mxu1 }
  0xfd   : > { %v853_v28 = vadd.f32 %v5365_v26, %v6420_v25  ;;  %v917_v29 = vadd.f32 %v5381_v27, %v6420_v25 }
  0xfe   : > { %v844_v30 = vpop.f32.mrf.mxu0  ;;  %v908_v31 = vpop.f32.mrf.mxu1 }
  0xff   : > { %v973_v32 = vmax.f32 %v853_v28, 0.0  ;;  %v989_v33 = vmax.f32 %v917_v29, 0.0  ;;  %v845_v34 = vadd.f32 %v6420_v25, %v844_v30  ;;  %v909_v35 = vadd.f32 %v6420_v25, %v908_v31 }
 0x100   : > { %v5366_v36 = vpop.f32.mrf.mxu0  ;;  %v5382_v37 = vpop.f32.mrf.mxu1 }
 0x101   : > { %v5183_v38 = vpack.c.bf16 %v973_v32, %v973_v32  ;;  %v5199_v39 = vpack.c.bf16 %v989_v33, %v989_v33  ;;  %v971_v40 = vmax.f32 %v845_v34, 0.0  ;;  %v987_v41 = vmax.f32 %v909_v35, 0.0 }
 0x102   : > { %v856_v42 = vadd.f32 %v5366_v36, %v6420_v25  ;;  %v920_v43 = vadd.f32 %v5382_v37, %v6420_v25  ;;  %v847_v44 = vpop.f32.mrf.mxu0  ;;  %v911_v45 = vpop.f32.mrf.mxu1 }
 0x103   : > { %v1116_v46 = vshrl.u32 %v5183_v38, 16  ;;  %v1119_v47 = vshll.u32 %v5183_v38, 16  ;;  %v1244_v48 = vshrl.u32 %v5199_v39, 16  ;;  %v1247_v49 = vshll.u32 %v5199_v39, 16  ;;  %v1444_v38 = vld [vmem:[#allocation2 + $0x70] sm:$0xf] }
 0x104   : > { %v5181_v51 = vpack.c.bf16 %v971_v40, %v971_v40  ;;  %v5197_v52 = vpack.c.bf16 %v987_v41, %v987_v41  ;;  %v974_v53 = vmax.f32 %v856_v42, 0.0  ;;  %v990_v54 = vmax.f32 %v920_v43, 0.0  ;;  %v5369_v8 = vpop.f32.mrf.mxu0  ;;  %v5385_v9 = vpop.f32.mrf.mxu1  ;;  %v1447_v42 = vld [vmem:[#allocation2 + $0x74] sm:$0x1]  ;;  %v1540_v43 = vld [vmem:[#allocation2 + $0x110] sm:$0xf] }
 0x105   : > { %v1118_v55 = vrot.slane %v1116_v46, 7  ;;  %v1246_v58 = vrot.slane %v1244_v48, 7  ;;  %v6435_v60 = vadd.f32 %v6420_v25, %v847_v44  ;;  %v6438_v61 = vadd.f32 %v6420_v25, %v911_v45  ;;  %v1543_v44 = vld [vmem:[#allocation2 + $0x114] sm:$0x1] }
 0x106   : > { %v1100_v0 = vshrl.u32 %v5181_v51, 16  ;;  %v1103_v1 = vshll.u32 %v5181_v51, 16  ;;  %v1228_v2 = vshrl.u32 %v5197_v52, 16  ;;  %v1231_v3 = vshll.u32 %v5197_v52, 16  ;;  %v860_v31 = vpop.f32.mrf.mxu0  ;;  %v924_v32 = vpop.f32.mrf.mxu1 }
 0x107   : > { %v1121_v4 = vor.u32 %v1119_v47, %v1118_v55  ;;  %v1122_v5 = vrot.slane %v1118_v55, 4  ;;  %v1249_v6 = vor.u32 %v1247_v49, %v1246_v58  ;;  %v1250_v7 = vrot.slane %v1246_v58, 4 }
 0x108   : > { %v1102_v10 = vrot.slane %v1100_v0, 7  ;;  %v1230_v12 = vrot.slane %v1228_v2, 7  ;;  %v5184_v13 = vpack.c.bf16 %v974_v53, %v974_v53  ;;  %v5200_v14 = vpack.c.bf16 %v990_v54, %v990_v54  ;;  %v5386_v0 = vpop.f32.mrf.mxu1 }
 0x109   : > { %v1439_v15 = vsel %vm6430_vm4, %v1121_v4, %v1438_v50  ;;  %v1442_v16 = vsel %vm6442_vm5, %v1122_v5, %v1441_v57  ;;  %v1535_v17 = vsel %vm6430_vm4, %v1249_v6, %v1534_v59  ;;  %v1538_v18 = vsel %vm6442_vm5, %v1250_v7, %v1537_v63  ;;  %v5370_v63 = vpop.f32.mrf.mxu0  ;;  %v1432_v5 = vld [vmem:[#allocation2 + $0x60] sm:$0xf] }
 0x10a   : > { %1440 = vst [vmem:[#allocation2 + $0x68] sm:$0xf] %v1439_v15  ;;  %1443 = vst [vmem:[#allocation2 + $0x6c] sm:$0x1] %v1442_v16  ;;  %v1105_v22 = vor.u32 %v1103_v1, %v1102_v10  ;;  %v1106_v23 = vrot.slane %v1102_v10, 4  ;;  %v1233_v24 = vor.u32 %v1231_v3, %v1230_v12  ;;  %v1234_v26 = vrot.slane %v1230_v12, 4 }
 0x10b   : > { %1536 = vst [vmem:[#allocation2 + $0x108] sm:$0xf] %v1535_v17  ;;  %1539 = vst [vmem:[#allocation2 + $0x10c] sm:$0x1] %v1538_v18  ;;  %v1124_v27 = vshrl.u32 %v5184_v13, 16  ;;  %v1127_v28 = vshll.u32 %v5184_v13, 16  ;;  %v869_v45 = vadd.f32 %v5369_v8, %v6420_v25  ;;  %v933_v46 = vadd.f32 %v5385_v9, %v6420_v25 }
 0x10c   : > { %v1252_v29 = vshrl.u32 %v5200_v14, 16  ;;  %v1255_v30 = vshll.u32 %v5200_v14, 16  ;;  %v1424_v33 = vsel %vm6430_vm4, %v1105_v22, %v1423_v11  ;;  %v1430_v34 = vsel %vm6442_vm5, %v1106_v23, %v1429_v19  ;;  %v1435_v11 = vld [vmem:[#allocation2 + $0x64] sm:$0x1]  ;;  %v1528_v13 = vld [vmem:[#allocation2 + $0x100] sm:$0xf] }
 0x10d   : > { %v1523_v35 = vsel %vm6430_vm4, %v1233_v24, %v1522_v20  ;;  %v1526_v36 = vsel %vm6442_vm5, %v1234_v26, %v1525_v21  ;;  %1425 = vst [vmem:[#allocation2 + $0x58] sm:$0xf] %v1424_v33  ;;  %1431 = vst [vmem:[#allocation2 + $0x5c] sm:$0x1] %v1430_v34  ;;  %v1126_v37 = vrot.slane %v1124_v27, 7  ;;  %v972_v40 = vmax.f32 %v6435_v60, 0.0  ;;  %v863_v26 = vpop.f32.mrf.mxu0  ;;  %v927_v27 = vpop.f32.mrf.mxu1 }
 0x10e   : > { %1524 = vst [vmem:[#allocation2 + $0xf8] sm:$0xf] %v1523_v35  ;;  %1527 = vst [vmem:[#allocation2 + $0xfc] sm:$0x1] %v1526_v36  ;;  %v1254_v39 = vrot.slane %v1252_v29, 7  ;;  %v988_v41 = vmax.f32 %v6438_v61, 0.0  ;;  %v861_v47 = vadd.f32 %v6420_v25, %v860_v31  ;;  %v925_v48 = vadd.f32 %v6420_v25, %v924_v32 }
 0x10f   : > { %v1129_v49 = vor.u32 %v1127_v28, %v1126_v37  ;;  %v1130_v50 = vrot.slane %v1126_v37, 4  ;;  %v5182_v53 = vpack.c.bf16 %v972_v40, %v972_v40  ;;  %v977_v55 = vmax.f32 %v869_v45, 0.0  ;;  %v1531_v16 = vld [vmem:[#allocation2 + $0x104] sm:$0x1]  ;;  %v1462_v29 = vld [vmem:[#allocation2 + $0x88] sm:$0xf] }
 0x110   : > { %v1257_v51 = vor.u32 %v1255_v30, %v1254_v39  ;;  %v1258_v52 = vrot.slane %v1254_v39, 4  ;;  %v5198_v54 = vpack.c.bf16 %v988_v41, %v988_v41  ;;  %v993_v57 = vmax.f32 %v933_v46, 0.0  ;;  %v1465_v37 = vld [vmem:[#allocation2 + $0x8c] sm:$0x1] }
 0x111   : > { %v1445_v58 = vsel %vm6430_vm4, %v1129_v49, %v1444_v38  ;;  %v1448_v59 = vsel %vm6442_vm5, %v1130_v50, %v1447_v42  ;;  %v1108_v1 = vshrl.u32 %v5182_v53, 16  ;;  %v1111_v2 = vshll.u32 %v5182_v53, 16  ;;  %v1558_v38 = vld [vmem:[#allocation2 + $0x128] sm:$0xf]  ;;  %v1561_v39 = vld [vmem:[#allocation2 + $0x12c] sm:$0x1]  ;;  %v5389_v49 = vpop.f32.mrf.mxu1 }
 0x112   : > { %v1541_v60 = vsel %vm6430_vm4, %v1257_v51, %v1540_v43  ;;  %v1544_v61 = vsel %vm6442_vm5, %v1258_v52, %v1543_v44  ;;  %1446 = vst [vmem:[#allocation2 + $0x70] sm:$0xf] %v1445_v58  ;;  %1449 = vst [vmem:[#allocation2 + $0x74] sm:$0x1] %v1448_v59  ;;  %v1236_v3 = vshrl.u32 %v5198_v54, 16  ;;  %v1239_v4 = vshll.u32 %v5198_v54, 16 }
 0x113   : > { %1542 = vst [vmem:[#allocation2 + $0x110] sm:$0xf] %v1541_v60  ;;  %1545 = vst [vmem:[#allocation2 + $0x114] sm:$0x1] %v1544_v61  ;;  %v5187_v6 = vpack.c.bf16 %v977_v55, %v977_v55  ;;  %v5203_v7 = vpack.c.bf16 %v993_v57, %v993_v57  ;;  %v975_v8 = vmax.f32 %v861_v47, 0.0  ;;  %v991_v9 = vmax.f32 %v925_v48, 0.0  ;;  %v5373_v48 = vpop.f32.mrf.mxu0 }
 0x114   : > { %v1110_v10 = vrot.slane %v1108_v1, 7  ;;  %v1238_v12 = vrot.slane %v1236_v3, 7  ;;  %v6477_v14 = vadd.f32 %v5370_v63, %v6420_v25  ;;  %v6480_v15 = vadd.f32 %v5386_v0, %v6420_v25  ;;  %v1450_v55 = vld [vmem:[#allocation2 + $0x78] sm:$0xf]  ;;  %v1453_v60 = vld [vmem:[#allocation2 + $0x7c] sm:$0x1] }
 0x115   : > { %v1148_v17 = vshrl.u32 %v5187_v6, 16  ;;  %v1151_v18 = vshll.u32 %v5187_v6, 16  ;;  %v1276_v19 = vshrl.u32 %v5203_v7, 16  ;;  %v1279_v20 = vshll.u32 %v5203_v7, 16  ;;  %v1546_v61 = vld [vmem:[#allocation2 + $0x118] sm:$0xf] }
 0x116   : > { %v1113_v21 = vor.u32 %v1111_v2, %v1110_v10  ;;  %v1114_v22 = vrot.slane %v1110_v10, 4  ;;  %v1241_v23 = vor.u32 %v1239_v4, %v1238_v12  ;;  %v1242_v24 = vrot.slane %v1238_v12, 4  ;;  %v1549_v63 = vld [vmem:[#allocation2 + $0x11c] sm:$0x1] }
 0x117   : > { %v1150_v28 = vrot.slane %v1148_v17, 7  ;;  %v1278_v30 = vrot.slane %v1276_v19, 7  ;;  %v5185_v31 = vpack.c.bf16 %v975_v8, %v975_v8  ;;  %v5201_v32 = vpack.c.bf16 %v991_v9, %v991_v9  ;;  %v940_v17 = vpop.f32.mrf.mxu1 }
 0x118   : > { %v1433_v33 = vsel %vm6430_vm4, %v1113_v21, %v1432_v5  ;;  %v1436_v34 = vsel %vm6442_vm5, %v1114_v22, %v1435_v11  ;;  %v1529_v35 = vsel %vm6430_vm4, %v1241_v23, %v1528_v13  ;;  %v1532_v36 = vsel %vm6442_vm5, %v1242_v24, %v1531_v16  ;;  %v876_v16 = vpop.f32.mrf.mxu0  ;;  %v1468_v22 = vld [vmem:[#allocation2 + $0x90] sm:$0xf] }
 0x119   : > { %1434 = vst [vmem:[#allocation2 + $0x60] sm:$0xf] %v1433_v33  ;;  %1437 = vst [vmem:[#allocation2 + $0x64] sm:$0x1] %v1436_v34  ;;  %v1153_v40 = vor.u32 %v1151_v18, %v1150_v28  ;;  %v1154_v41 = vrot.slane %v1150_v28, 4  ;;  %v1281_v42 = vor.u32 %v1279_v20, %v1278_v30  ;;  %v1282_v43 = vrot.slane %v1278_v30, 4 }
 0x11a   : > { %1530 = vst [vmem:[#allocation2 + $0x100] sm:$0xf] %v1529_v35  ;;  %1533 = vst [vmem:[#allocation2 + $0x104] sm:$0x1] %v1532_v36  ;;  %v1132_v44 = vshrl.u32 %v5185_v31, 16  ;;  %v1135_v45 = vshll.u32 %v5185_v31, 16  ;;  %v864_v0 = vadd.f32 %v6420_v25, %v863_v26  ;;  %v928_v1 = vadd.f32 %v6420_v25, %v927_v27 }
 0x11b   : > { %v1260_v46 = vshrl.u32 %v5201_v32, 16  ;;  %v1263_v47 = vshll.u32 %v5201_v32, 16  ;;  %v1463_v50 = vsel %vm6430_vm4, %v1153_v40, %v1462_v29  ;;  %v1466_v51 = vsel %vm6442_vm5, %v1154_v41, %v1465_v37  ;;  %v1471_v29 = vld [vmem:[#allocation2 + $0x94] sm:$0x1]  ;;  %v1564_v31 = vld [vmem:[#allocation2 + $0x130] sm:$0xf] }
 0x11c   : > { %v1559_v52 = vsel %vm6430_vm4, %v1281_v42, %v1558_v38  ;;  %v1562_v53 = vsel %vm6442_vm5, %v1282_v43, %v1561_v39  ;;  %1464 = vst [vmem:[#allocation2 + $0x88] sm:$0xf] %v1463_v50  ;;  %1467 = vst [vmem:[#allocation2 + $0x8c] sm:$0x1] %v1466_v51  ;;  %v1134_v54 = vrot.slane %v1132_v44, 7  ;;  %v978_v58 = vmax.f32 %v6477_v14, 0.0  ;;  %v5374_v43 = vpop.f32.mrf.mxu0  ;;  %v5390_v44 = vpop.f32.mrf.mxu1 }
 0x11d   : > { %1560 = vst [vmem:[#allocation2 + $0x128] sm:$0xf] %v1559_v52  ;;  %1563 = vst [vmem:[#allocation2 + $0x12c] sm:$0x1] %v1562_v53  ;;  %v1262_v57 = vrot.slane %v1260_v46, 7  ;;  %v994_v59 = vmax.f32 %v6480_v15, 0.0  ;;  %v885_v2 = vadd.f32 %v5373_v48, %v6420_v25  ;;  %v949_v3 = vadd.f32 %v5389_v49, %v6420_v25 }
 0x11e   : > { %v1137_v4 = vor.u32 %v1135_v45, %v1134_v54  ;;  %v1138_v5 = vrot.slane %v1134_v54, 4  ;;  %v5188_v8 = vpack.c.bf16 %v978_v58, %v978_v58  ;;  %v976_v10 = vmax.f32 %v864_v0, 0.0  ;;  %v1567_v34 = vld [vmem:[#allocation2 + $0x134] sm:$0x1]  ;;  %v1456_v46 = vld [vmem:[#allocation2 + $0x80] sm:$0xf] }
 0x11f   : > { %v1265_v6 = vor.u32 %v1263_v47, %v1262_v57  ;;  %v1266_v7 = vrot.slane %v1262_v57, 4  ;;  %v5204_v9 = vpack.c.bf16 %v994_v59, %v994_v59  ;;  %v992_v11 = vmax.f32 %v928_v1, 0.0  ;;  %v1459_v54 = vld [vmem:[#allocation2 + $0x84] sm:$0x1] }
 0x120   : > { %v1451_v12 = vsel %vm6430_vm4, %v1137_v4, %v1450_v55  ;;  %v1454_v13 = vsel %vm6442_vm5, %v1138_v5, %v1453_v60  ;;  %v1156_v18 = vshrl.u32 %v5188_v8, 16  ;;  %v1159_v19 = vshll.u32 %v5188_v8, 16  ;;  %v1552_v55 = vld [vmem:[#allocation2 + $0x120] sm:$0xf]  ;;  %v1555_v57 = vld [vmem:[#allocation2 + $0x124] sm:$0x1]  ;;  %v943_v4 = vpop.f32.mrf.mxu1 }
 0x121   : > { %v1547_v14 = vsel %vm6430_vm4, %v1265_v6, %v1546_v61  ;;  %v1550_v15 = vsel %vm6442_vm5, %v1266_v7, %v1549_v63  ;;  %1452 = vst [vmem:[#allocation2 + $0x78] sm:$0xf] %v1451_v12  ;;  %1455 = vst [vmem:[#allocation2 + $0x7c] sm:$0x1] %v1454_v13  ;;  %v1284_v20 = vshrl.u32 %v5204_v9, 16  ;;  %v1287_v21 = vshll.u32 %v5204_v9, 16 }
 0x122   : > { %1548 = vst [vmem:[#allocation2 + $0x118] sm:$0xf] %v1547_v14  ;;  %1551 = vst [vmem:[#allocation2 + $0x11c] sm:$0x1] %v1550_v15  ;;  %v5186_v23 = vpack.c.bf16 %v976_v10, %v976_v10  ;;  %v5202_v24 = vpack.c.bf16 %v992_v11, %v992_v11  ;;  %v981_v26 = vmax.f32 %v885_v2, 0.0  ;;  %v997_v27 = vmax.f32 %v949_v3, 0.0  ;;  %v879_v3 = vpop.f32.mrf.mxu0 }
 0x123   : > { %v1158_v28 = vrot.slane %v1156_v18, 7  ;;  %v1286_v30 = vrot.slane %v1284_v20, 7  ;;  %v6513_v32 = vadd.f32 %v6420_v25, %v876_v16  ;;  %v6516_v33 = vadd.f32 %v6420_v25, %v940_v17  ;;  %v1486_v10 = vld [vmem:[#allocation2 + $0xb8] sm:$0xf]  ;;  %v1489_v14 = vld [vmem:[#allocation2 + $0xbc] sm:$0x1] }
 0x124   : > { %v1140_v35 = vshrl.u32 %v5186_v23, 16  ;;  %v1143_v36 = vshll.u32 %v5186_v23, 16  ;;  %v1268_v37 = vshrl.u32 %v5202_v24, 16  ;;  %v1271_v38 = vshll.u32 %v5202_v24, 16  ;;  %v1582_v15 = vld [vmem:[#allocation2 + $0x158] sm:$0xf] }
 0x125   : > { %v1161_v39 = vor.u32 %v1159_v19, %v1158_v28  ;;  %v1162_v40 = vrot.slane %v1158_v28, 4  ;;  %v1289_v41 = vor.u32 %v1287_v21, %v1286_v30  ;;  %v1290_v42 = vrot.slane %v1286_v30, 4  ;;  %v1585_v16 = vld [vmem:[#allocation2 + $0x15c] sm:$0x1] }
 0x126   : > { %v1142_v45 = vrot.slane %v1140_v35, 7  ;;  %v1270_v47 = vrot.slane %v1268_v37, 7  ;;  %v5191_v48 = vpack.c.bf16 %v981_v26, %v981_v26  ;;  %v5207_v49 = vpack.c.bf16 %v997_v27, %v997_v27  ;;  %v5393_v35 = vpop.f32.mrf.mxu1 }
 0x127   : > { %v1469_v50 = vsel %vm6430_vm4, %v1161_v39, %v1468_v22  ;;  %v1472_v51 = vsel %vm6442_vm5, %v1162_v40, %v1471_v29  ;;  %v1565_v52 = vsel %vm6430_vm4, %v1289_v41, %v1564_v31  ;;  %v1568_v53 = vsel %vm6442_vm5, %v1290_v42, %v1567_v34  ;;  %v5377_v34 = vpop.f32.mrf.mxu0  ;;  %v1474_v40 = vld [vmem:[#allocation2 + $0xa8] sm:$0xf] }
 0x128   : > { %1470 = vst [vmem:[#allocation2 + $0x90] sm:$0xf] %v1469_v50  ;;  %1473 = vst [vmem:[#allocation2 + $0x94] sm:$0x1] %v1472_v51  ;;  %v1145_v58 = vor.u32 %v1143_v36, %v1142_v45  ;;  %v1146_v59 = vrot.slane %v1142_v45, 4  ;;  %v1273_v60 = vor.u32 %v1271_v38, %v1270_v47  ;;  %v1274_v61 = vrot.slane %v1270_v47, 4 }
 0x129   : > { %1566 = vst [vmem:[#allocation2 + $0x130] sm:$0xf] %v1565_v52  ;;  %1569 = vst [vmem:[#allocation2 + $0x134] sm:$0x1] %v1568_v53  ;;  %v1180_v63 = vshrl.u32 %v5191_v48, 16  ;;  %v1183_v0 = vshll.u32 %v5191_v48, 16  ;;  %v888_v17 = vadd.f32 %v5374_v43, %v6420_v25  ;;  %v952_v18 = vadd.f32 %v5390_v44, %v6420_v25 }
 0x12a   : > { %v1308_v1 = vshrl.u32 %v5207_v49, 16  ;;  %v1311_v2 = vshll.u32 %v5207_v49, 16  ;;  %v1457_v5 = vsel %vm6430_vm4, %v1145_v58, %v1456_v46  ;;  %v1460_v6 = vsel %vm6442_vm5, %v1146_v59, %v1459_v54  ;;  %v1477_v46 = vld [vmem:[#allocation2 + $0xac] sm:$0x1]  ;;  %v1570_v48 = vld [vmem:[#allocation2 + $0x148] sm:$0xf] }
 0x12b   : > { %v1553_v7 = vsel %vm6430_vm4, %v1273_v60, %v1552_v55  ;;  %v1556_v8 = vsel %vm6442_vm5, %v1274_v61, %v1555_v57  ;;  %1458 = vst [vmem:[#allocation2 + $0x80] sm:$0xf] %v1457_v5  ;;  %1461 = vst [vmem:[#allocation2 + $0x84] sm:$0x1] %v1460_v6  ;;  %v1182_v9 = vrot.slane %v1180_v63, 7  ;;  %v979_v12 = vmax.f32 %v6513_v32, 0.0  ;;  %v892_v61 = vpop.f32.mrf.mxu0  ;;  %v956_v63 = vpop.f32.mrf.mxu1 }
 0x12c   : > { %1554 = vst [vmem:[#allocation2 + $0x120] sm:$0xf] %v1553_v7  ;;  %1557 = vst [vmem:[#allocation2 + $0x124] sm:$0x1] %v1556_v8  ;;  %v1310_v11 = vrot.slane %v1308_v1, 7  ;;  %v995_v13 = vmax.f32 %v6516_v33, 0.0  ;;  %v880_v19 = vadd.f32 %v6420_v25, %v879_v3  ;;  %v944_v20 = vadd.f32 %v6420_v25, %v943_v4 }
 0x12d   : > { %v1185_v21 = vor.u32 %v1183_v0, %v1182_v9  ;;  %v1186_v22 = vrot.slane %v1182_v9, 4  ;;  %v5189_v26 = vpack.c.bf16 %v979_v12, %v979_v12  ;;  %v982_v28 = vmax.f32 %v888_v17, 0.0  ;;  %v1573_v51 = vld [vmem:[#allocation2 + $0x14c] sm:$0x1]  ;;  %v1492_v1 = vld [vmem:[#allocation2 + $0xc0] sm:$0xf] }
 0x12e   : > { %v1313_v23 = vor.u32 %v1311_v2, %v1310_v11  ;;  %v1314_v24 = vrot.slane %v1310_v11, 4  ;;  %v5205_v27 = vpack.c.bf16 %v995_v13, %v995_v13  ;;  %v998_v29 = vmax.f32 %v952_v18, 0.0  ;;  %v1495_v9 = vld [vmem:[#allocation2 + $0xc4] sm:$0x1] }
 0x12f   : > { %v1487_v30 = vsel %vm6430_vm4, %v1185_v21, %v1486_v10  ;;  %v1490_v31 = vsel %vm6442_vm5, %v1186_v22, %v1489_v14  ;;  %v1164_v36 = vshrl.u32 %v5189_v26, 16  ;;  %v1167_v37 = vshll.u32 %v5189_v26, 16  ;;  %v1588_v10 = vld [vmem:[#allocation2 + $0x160] sm:$0xf]  ;;  %v1591_v11 = vld [vmem:[#allocation2 + $0x164] sm:$0x1]  ;;  %v5394_v21 = vpop.f32.mrf.mxu1 }
 0x130   : > { %v1583_v32 = vsel %vm6430_vm4, %v1313_v23, %v1582_v15  ;;  %v1586_v33 = vsel %vm6442_vm5, %v1314_v24, %v1585_v16  ;;  %1488 = vst [vmem:[#allocation2 + $0xb8] sm:$0xf] %v1487_v30  ;;  %1491 = vst [vmem:[#allocation2 + $0xbc] sm:$0x1] %v1490_v31  ;;  %v1292_v38 = vshrl.u32 %v5205_v27, 16  ;;  %v1295_v39 = vshll.u32 %v5205_v27, 16 }
 0x131   : > { %1584 = vst [vmem:[#allocation2 + $0x158] sm:$0xf] %v1583_v32  ;;  %1587 = vst [vmem:[#allocation2 + $0x15c] sm:$0x1] %v1586_v33  ;;  %v5192_v41 = vpack.c.bf16 %v982_v28, %v982_v28  ;;  %v5208_v42 = vpack.c.bf16 %v998_v29, %v998_v29  ;;  %v980_v43 = vmax.f32 %v880_v19, 0.0  ;;  %v996_v44 = vmax.f32 %v944_v20, 0.0  ;;  %v5378_v20 = vpop.f32.mrf.mxu0 }
 0x132   : > { %v1166_v45 = vrot.slane %v1164_v36, 7  ;;  %v1294_v47 = vrot.slane %v1292_v38, 7  ;;  %v6549_v49 = vadd.f32 %v5377_v34, %v6420_v25  ;;  %v6552_v50 = vadd.f32 %v5393_v35, %v6420_v25  ;;  %v1480_v28 = vld [vmem:[#allocation2 + $0xb0] sm:$0xf]  ;;  %v1483_v32 = vld [vmem:[#allocation2 + $0xb4] sm:$0x1] }
 0x133   : > { %v1188_v52 = vshrl.u32 %v5192_v41, 16  ;;  %v1191_v53 = vshll.u32 %v5192_v41, 16  ;;  %v1316_v54 = vshrl.u32 %v5208_v42, 16  ;;  %v1319_v55 = vshll.u32 %v5208_v42, 16  ;;  %v1576_v33 = vld [vmem:[#allocation2 + $0x150] sm:$0xf] }
 0x134   : > { %v1169_v57 = vor.u32 %v1167_v37, %v1166_v45  ;;  %v1170_v58 = vrot.slane %v1166_v45, 4  ;;  %v1297_v59 = vor.u32 %v1295_v39, %v1294_v47  ;;  %v1298_v60 = vrot.slane %v1294_v47, 4  ;;  %v1579_v34 = vld [vmem:[#allocation2 + $0x154] sm:$0x1] }
 0x135   : > { %v1190_v0 = vrot.slane %v1188_v52, 7  ;;  %v1318_v2 = vrot.slane %v1316_v54, 7  ;;  %v5190_v3 = vpack.c.bf16 %v980_v43, %v980_v43  ;;  %v5206_v4 = vpack.c.bf16 %v996_v44, %v996_v44  ;;  %v959_v52 = vpop.f32.mrf.mxu1 }
 0x136   : > { %v1475_v5 = vsel %vm6430_vm4, %v1169_v57, %v1474_v40  ;;  %v1478_v6 = vsel %vm6442_vm5, %v1170_v58, %v1477_v46  ;;  %v1571_v7 = vsel %vm6430_vm4, %v1297_v59, %v1570_v48  ;;  %v1574_v8 = vsel %vm6442_vm5, %v1298_v60, %v1573_v51  ;;  %v895_v51 = vpop.f32.mrf.mxu0  ;;  %v1510_v58 = vld [vmem:[#allocation2 + $0xd8] sm:$0xf] }
 0x137   : > { %1476 = vst [vmem:[#allocation2 + $0xa8] sm:$0xf] %v1475_v5  ;;  %1479 = vst [vmem:[#allocation2 + $0xac] sm:$0x1] %v1478_v6  ;;  %v1193_v12 = vor.u32 %v1191_v53, %v1190_v0  ;;  %v1194_v13 = vrot.slane %v1190_v0, 4  ;;  %v1321_v14 = vor.u32 %v1319_v55, %v1318_v2  ;;  %v1322_v15 = vrot.slane %v1318_v2, 4 }
 0x138   : > { %1572 = vst [vmem:[#allocation2 + $0x148] sm:$0xf] %v1571_v7  ;;  %1575 = vst [vmem:[#allocation2 + $0x14c] sm:$0x1] %v1574_v8  ;;  %v1172_v16 = vshrl.u32 %v5190_v3, 16  ;;  %v1175_v17 = vshll.u32 %v5190_v3, 16  ;;  %v893_v35 = vadd.f32 %v6420_v25, %v892_v61  ;;  %v957_v36 = vadd.f32 %v6420_v25, %v956_v63 }
 0x139   : > { %v1300_v18 = vshrl.u32 %v5206_v4, 16  ;;  %v1303_v19 = vshll.u32 %v5206_v4, 16  ;;  %v1493_v22 = vsel %vm6430_vm4, %v1193_v12, %v1492_v1  ;;  %v1496_v23 = vsel %vm6442_vm5, %v1194_v13, %v1495_v9  ;;  %v1513_v1 = vld [vmem:[#allocation2 + $0xdc] sm:$0x1]  ;;  %v1606_v3 = vld [vmem:[#allocation2 + $0x178] sm:$0xf] }
 0x13a   : > { %v1589_v24 = vsel %vm6430_vm4, %v1321_v14, %v1588_v10  ;;  %v1592_v26 = vsel %vm6442_vm5, %v1322_v15, %v1591_v11  ;;  %1494 = vst [vmem:[#allocation2 + $0xc0] sm:$0xf] %v1493_v22  ;;  %1497 = vst [vmem:[#allocation2 + $0xc4] sm:$0x1] %v1496_v23  ;;  %v1174_v27 = vrot.slane %v1172_v16, 7  ;;  %v985_v30 = vmax.f32 %v6549_v49, 0.0 }
 0x13b   : > { %1590 = vst [vmem:[#allocation2 + $0x160] sm:$0xf] %v1589_v24  ;;  %1593 = vst [vmem:[#allocation2 + $0x164] sm:$0x1] %v1592_v26  ;;  %v1302_v29 = vrot.slane %v1300_v18, 7  ;;  %v1001_v31 = vmax.f32 %v6552_v50, 0.0  ;;  %v904_v37 = vadd.f32 %v5378_v20, %v6420_v25  ;;  %v968_v38 = vadd.f32 %v5394_v21, %v6420_v25 }
 0x13c   : > { %v1177_v39 = vor.u32 %v1175_v17, %v1174_v27  ;;  %v1178_v40 = vrot.slane %v1174_v27, 4  ;;  %v5195_v43 = vpack.c.bf16 %v985_v30, %v985_v30  ;;  %v983_v45 = vmax.f32 %v893_v35, 0.0  ;;  %v1609_v6 = vld [vmem:[#allocation2 + $0x17c] sm:$0x1]  ;;  %v1498_v16 = vld [vmem:[#allocation2 + $0xc8] sm:$0xf] }
 0x13d   : > { %v1305_v41 = vor.u32 %v1303_v19, %v1302_v29  ;;  %v1306_v42 = vrot.slane %v1302_v29, 4  ;;  %v5211_v44 = vpack.c.bf16 %v1001_v31, %v1001_v31  ;;  %v999_v46 = vmax.f32 %v957_v36, 0.0  ;;  %v1501_v23 = vld [vmem:[#allocation2 + $0xcc] sm:$0x1]  ;;  %v1594_v24 = vld [vmem:[#allocation2 + $0x168] sm:$0xf] }
 0x13e   : > { %v1481_v47 = vsel %vm6430_vm4, %v1177_v39, %v1480_v28  ;;  %v1484_v48 = vsel %vm6442_vm5, %v1178_v40, %v1483_v32  ;;  %v1212_v53 = vshrl.u32 %v5195_v43, 16  ;;  %v1215_v54 = vshll.u32 %v5195_v43, 16  ;;  %v1597_v26 = vld [vmem:[#allocation2 + $0x16c] sm:$0x1]  ;;  %v1516_v40 = vld [vmem:[#allocation2 + $0xe0] sm:$0xf] }
 0x13f   : > { %v1577_v49 = vsel %vm6430_vm4, %v1305_v41, %v1576_v33  ;;  %v1580_v50 = vsel %vm6442_vm5, %v1306_v42, %v1579_v34  ;;  %1482 = vst [vmem:[#allocation2 + $0xb0] sm:$0xf] %v1481_v47  ;;  %1485 = vst [vmem:[#allocation2 + $0xb4] sm:$0x1] %v1484_v48  ;;  %v1340_v55 = vshrl.u32 %v5211_v44, 16  ;;  %v1343_v57 = vshll.u32 %v5211_v44, 16 }
 0x140   : > { %1578 = vst [vmem:[#allocation2 + $0x150] sm:$0xf] %v1577_v49  ;;  %1581 = vst [vmem:[#allocation2 + $0x154] sm:$0x1] %v1580_v50  ;;  %v5193_v59 = vpack.c.bf16 %v983_v45, %v983_v45  ;;  %v5209_v60 = vpack.c.bf16 %v999_v46, %v999_v46  ;;  %v986_v61 = vmax.f32 %v904_v37, 0.0  ;;  %v1002_v63 = vmax.f32 %v968_v38, 0.0 }
 0x141   : > { %v1214_v0 = vrot.slane %v1212_v53, 7  ;;  %v1342_v2 = vrot.slane %v1340_v55, 7  ;;  %v896_v4 = vadd.f32 %v6420_v25, %v895_v51  ;;  %v960_v5 = vadd.f32 %v6420_v25, %v959_v52  ;;  %v1519_v44 = vld [vmem:[#allocation2 + $0xe4] sm:$0x1]  ;;  %v1612_v45 = vld [vmem:[#allocation2 + $0x180] sm:$0xf] }
 0x142   : > { %v1196_v7 = vshrl.u32 %v5193_v59, 16  ;;  %v1199_v8 = vshll.u32 %v5193_v59, 16  ;;  %v1324_v9 = vshrl.u32 %v5209_v60, 16  ;;  %v1327_v10 = vshll.u32 %v5209_v60, 16  ;;  %v1615_v46 = vld [vmem:[#allocation2 + $0x184] sm:$0x1] }
 0x143   : > { %v1217_v11 = vor.u32 %v1215_v54, %v1214_v0  ;;  %v1218_v12 = vrot.slane %v1214_v0, 4  ;;  %v1345_v13 = vor.u32 %v1343_v57, %v1342_v2  ;;  %v1346_v14 = vrot.slane %v1342_v2, 4  ;;  %v1507_v2 = vld [vmem:[#allocation2 + $0xd4] sm:$0x1] }
 0x144   : > { %v1198_v15 = vrot.slane %v1196_v7, 7  ;;  %v1326_v17 = vrot.slane %v1324_v9, 7  ;;  %v5196_v18 = vpack.c.bf16 %v986_v61, %v986_v61  ;;  %v5212_v19 = vpack.c.bf16 %v1002_v63, %v1002_v63  ;;  %v1504_v63 = vld [vmem:[#allocation2 + $0xd0] sm:$0xf] }
 0x145   : > { %v1511_v20 = vsel %vm6430_vm4, %v1217_v11, %v1510_v58  ;;  %v1514_v25 = vsel %vm6442_vm5, %v1218_v12, %v1513_v1  ;;  %v1607_v21 = vsel %vm6430_vm4, %v1345_v13, %v1606_v3  ;;  %v1610_v22 = vsel %vm6442_vm5, %v1346_v14, %v1609_v6  ;;  %v1600_v3 = vld [vmem:[#allocation2 + $0x170] sm:$0xf] }
 0x146   : > { %1512 = vst [vmem:[#allocation2 + $0xd8] sm:$0xf] %v1511_v20  ;;  %1515 = vst [vmem:[#allocation2 + $0xdc] sm:$0x1] %v1514_v25  ;;  %v1201_v27 = vor.u32 %v1199_v8, %v1198_v15  ;;  %v1202_v28 = vrot.slane %v1198_v15, 4  ;;  %v1329_v29 = vor.u32 %v1327_v10, %v1326_v17  ;;  %v1330_v30 = vrot.slane %v1326_v17, 4 }
 0x147   : > { %1608 = vst [vmem:[#allocation2 + $0x178] sm:$0xf] %v1607_v21  ;;  %1611 = vst [vmem:[#allocation2 + $0x17c] sm:$0x1] %v1610_v22  ;;  %v1220_v31 = vshrl.u32 %v5196_v18, 16  ;;  %v1223_v32 = vshll.u32 %v5196_v18, 16 }
 0x148   : > { %v1348_v33 = vshrl.u32 %v5212_v19, 16  ;;  %v1351_v34 = vshll.u32 %v5212_v19, 16  ;;  %v1499_v35 = vsel %vm6430_vm4, %v1201_v27, %v1498_v16  ;;  %v1502_v36 = vsel %vm6442_vm5, %v1202_v28, %v1501_v23 }
 0x149   : > { %v1595_v37 = vsel %vm6430_vm4, %v1329_v29, %v1594_v24  ;;  %v1598_v38 = vsel %vm6442_vm5, %v1330_v30, %v1597_v26  ;;  %1500 = vst [vmem:[#allocation2 + $0xc8] sm:$0xf] %v1499_v35  ;;  %1503 = vst [vmem:[#allocation2 + $0xcc] sm:$0x1] %v1502_v36  ;;  %v1222_v39 = vrot.slane %v1220_v31, 7  ;;  %v984_v42 = vmax.f32 %v896_v4, 0.0 }
 0x14a   : > { %1596 = vst [vmem:[#allocation2 + $0x168] sm:$0xf] %v1595_v37  ;;  %1599 = vst [vmem:[#allocation2 + $0x16c] sm:$0x1] %v1598_v38  ;;  %v1350_v41 = vrot.slane %v1348_v33, 7  ;;  %v1000_v43 = vmax.f32 %v960_v5, 0.0 }
 0x14b   : > { %v1225_v47 = vor.u32 %v1223_v32, %v1222_v39  ;;  %v1226_v48 = vrot.slane %v1222_v39, 4  ;;  %v5194_v51 = vpack.c.bf16 %v984_v42, %v984_v42  ;;  %v1603_v4 = vld [vmem:[#allocation2 + $0x174] sm:$0x1] }
 0x14c   : > { %v1353_v49 = vor.u32 %v1351_v34, %v1350_v41  ;;  %v1354_v50 = vrot.slane %v1350_v41, 4  ;;  %v5210_v52 = vpack.c.bf16 %v1000_v43, %v1000_v43 }
 0x14d   : > { %v1517_v53 = vsel %vm6430_vm4, %v1225_v47, %v1516_v40  ;;  %v1520_v54 = vsel %vm6442_vm5, %v1226_v48, %v1519_v44  ;;  %v1204_v58 = vshrl.u32 %v5194_v51, 16  ;;  %v1207_v61 = vshll.u32 %v5194_v51, 16 }
 0x14e   : > { %v1613_v55 = vsel %vm6430_vm4, %v1353_v49, %v1612_v45  ;;  %v1616_v57 = vsel %vm6442_vm5, %v1354_v50, %v1615_v46  ;;  %1518 = vst [vmem:[#allocation2 + $0xe0] sm:$0xf] %v1517_v53  ;;  %1521 = vst [vmem:[#allocation2 + $0xe4] sm:$0x1] %v1520_v54  ;;  %v1332_v59 = vshrl.u32 %v5210_v52, 16  ;;  %v1335_v1 = vshll.u32 %v5210_v52, 16 }
 0x14f   : > { %1614 = vst [vmem:[#allocation2 + $0x180] sm:$0xf] %v1613_v55  ;;  %1617 = vst [vmem:[#allocation2 + $0x184] sm:$0x1] %v1616_v57  ;;  %v1206_v60 = vrot.slane %v1204_v58, 7 }
 0x150   : > { %v1334_v0 = vrot.slane %v1332_v59, 7 }
 0x151   : > { %v1209_v5 = vor.u32 %v1207_v61, %v1206_v60  ;;  %v1210_v6 = vrot.slane %v1206_v60, 4  ;;  %1621 = sbr.rel (%p4835_p4) target bundleno = 597 (0x255), region = 60 }
 0x152   : > { %v1337_v7 = vor.u32 %v1335_v1, %v1334_v0  ;;  %v1338_v8 = vrot.slane %v1334_v0, 4 }
 0x153   : > { %v1505_v9 = vsel %vm6430_vm4, %v1209_v5, %v1504_v63  ;;  %v1508_v10 = vsel %vm6442_vm5, %v1210_v6, %v1507_v2 }
 0x154   : > { %v1601_v11 = vsel %vm6430_vm4, %v1337_v7, %v1600_v3  ;;  %v1604_v12 = vsel %vm6442_vm5, %v1338_v8, %v1603_v4  ;;  %1506 = vst [vmem:[#allocation2 + $0xd0] sm:$0xf] %v1505_v9  ;;  %1509 = vst [vmem:[#allocation2 + $0xd4] sm:$0x1] %v1508_v10 }
 0x155   : > { %1602 = vst [vmem:[#allocation2 + $0x170] sm:$0xf] %v1601_v11  ;;  %1605 = vst [vmem:[#allocation2 + $0x174] sm:$0x1] %v1604_v12 }
 0x156   : > { %v5709_v13 = vld [vmem:[%s7732_s3 + $0x38] sm:$0xff]   ;;  %v5710_v14 = vld [vmem:[%s7732_s3 + $0x30] sm:$0xff]   ;;  %v5711_v15 = vld [vmem:[%s7732_s3 + $0x28] sm:$0xff]  }
 0x157   : > { %5395 = vmatprep.subr.bf16.mxu0 %v5709_v13  ;;  %5555 = vmatprep.subr.bf16.mxu1 %v5709_v13  ;;  %v5712_v16 = vld [vmem:[%s7732_s3 + $0x20] sm:$0xff]   ;;  %v5718_v18 = vld [vmem:[%s6378_s23 + $0x10] sm:$0xff]   ;;  %v5713_v19 = vld [vmem:[%s7732_s3 + $0x18] sm:$0xff]  }
 0x158   : > { %5396 = vmatpush3.bf16.msra.mxu0 %v5709_v13  ;;  %5563 = vmatpush3.bf16.msra.mxu1 %v5709_v13  ;;  %v5717_v17 = vld [vmem:[%s6378_s23] sm:$0xff]   ;;  %v5714_v20 = vld [vmem:[%s7732_s3 + $0x10] sm:$0xff]   ;;  %v5715_v25 = vld [vmem:[%s7732_s3 + $0x8] sm:$0xff]  }
 0x159   : > { %5397 = vmatprep.subr.bf16.mxu0 %v5710_v14  ;;  %5556 = vmatprep.subr.bf16.mxu1 %v5710_v14  ;;  %v5716_v21 = vld [vmem:[%s7732_s3] sm:$0xff]   ;;  %v5719_v22 = vld [vmem:[%s6378_s23 + $0x8] sm:$0xff]   ;;  %v5720_v23 = vld [vmem:[%s6378_s23 + $0x18] sm:$0xff]  }
 0x15a   : > { %5411 = vmatprep.mubr.bf16.mxu0 %v5717_v17  ;;  %5415 = vmatprep.mubr.bf16.mxu1 %v5718_v18  ;;  %v4836_v24 = vld [vmem:[%s7733_s4] ss:$0 sm:$0xff]  ;;  %v1915_v50 = vld [vmem:[#allocation2 + $0x18] sm:$0xf]  ;;  %v1918_v57 = vld [vmem:[#allocation2 + $0x1c] sm:$0x1] }
 0x15b   : > { %v1939_v59 = vld [vmem:[#allocation2 + $0x38] sm:$0xf]  ;;  %v1942_v63 = vld [vmem:[#allocation2 + $0x3c] sm:$0x1]  ;;  %v1903_v9 = vld [vmem:[#allocation2 + $0x8] sm:$0xf] }
 0x15c   : > { %5398 = vmatpush3.bf16.msra.mxu0 %v5710_v14  ;;  %5564 = vmatpush3.bf16.msra.mxu1 %v5710_v14  ;;  %v1906_v17 = vld [vmem:[#allocation2 + $0xc] sm:$0x1]  ;;  %v1927_v18 = vld [vmem:[#allocation2 + $0x28] sm:$0xf] }
 0x15d   : > { %5399 = vmatprep.subr.bf16.mxu0 %v5711_v15  ;;  %5557 = vmatprep.subr.bf16.mxu1 %v5711_v15 }
 0x160   : > { %5400 = vmatpush3.bf16.msra.mxu0 %v5711_v15  ;;  %5565 = vmatpush3.bf16.msra.mxu1 %v5711_v15 }
 0x161   : > { %5401 = vmatprep.subr.bf16.mxu0 %v5712_v16  ;;  %5558 = vmatprep.subr.bf16.mxu1 %v5712_v16 }
 0x164   : > { %5402 = vmatpush3.bf16.msra.mxu0 %v5712_v16  ;;  %5566 = vmatpush3.bf16.msra.mxu1 %v5712_v16 }
 0x165   : > { %5403 = vmatprep.subr.bf16.mxu0 %v5713_v19  ;;  %5559 = vmatprep.subr.bf16.mxu1 %v5713_v19 }
 0x168   : > { %5404 = vmatpush3.bf16.msra.mxu0 %v5713_v19  ;;  %5567 = vmatpush3.bf16.msra.mxu1 %v5713_v19  ;;  %v1930_v19 = vld [vmem:[#allocation2 + $0x2c] sm:$0x1] }
 0x169   : > { %5405 = vmatprep.subr.bf16.mxu0 %v5714_v20  ;;  %5560 = vmatprep.subr.bf16.mxu1 %v5714_v20 }
 0x16c   : > { %5406 = vmatpush3.bf16.msra.mxu0 %v5714_v20  ;;  %5568 = vmatpush3.bf16.msra.mxu1 %v5714_v20 }
 0x16d   : > { %5407 = vmatprep.subr.bf16.mxu0 %v5715_v25  ;;  %5561 = vmatprep.subr.bf16.mxu1 %v5715_v25 }
 0x170   : > { %5408 = vmatpush3.bf16.msra.mxu0 %v5715_v25  ;;  %5569 = vmatpush3.bf16.msra.mxu1 %v5715_v25 }
 0x171   : > { %5409 = vmatprep.subr.bf16.mxu0 %v5716_v21  ;;  %5562 = vmatprep.subr.bf16.mxu1 %v5716_v21 }
 0x174   : > { %5410 = vmatpush3.bf16.msra.mxu0 %v5716_v21  ;;  %5570 = vmatpush3.bf16.msra.mxu1 %v5716_v21 }
 0x177   : > { %5412 = vmatmul.mubr.bf16.vlgmr.msra.gmra.mxu0 %v5719_v22  ;;  %5416 = vmatmul.mubr.bf16.vlgmr.msra.gmra.mxu1 %v5720_v23 }
 0x237   : > { %v5413_v26 = vpop.f32.mrf.mxu0  ;;  %v5417_v27 = vpop.f32.mrf.mxu1 }
 0x238   : > { %v1768_v28 = vadd.f32 %v5413_v26, %v4836_v24  ;;  %v1784_v29 = vadd.f32 %v5417_v27, %v4836_v24 }
 0x239   : > { %v1759_v30 = vpop.f32.mrf.mxu0  ;;  %v1775_v31 = vpop.f32.mrf.mxu1 }
 0x23a   : > { %v1792_v32 = vmax.f32 %v1768_v28, 0.0  ;;  %v1796_v33 = vmax.f32 %v1784_v29, 0.0  ;;  %v1760_v34 = vadd.f32 %v4836_v24, %v1759_v30  ;;  %v1776_v35 = vadd.f32 %v4836_v24, %v1775_v31 }
 0x23b   : > { %v5414_v36 = vpop.f32.mrf.mxu0  ;;  %v5418_v37 = vpop.f32.mrf.mxu1 }
 0x23c   : > { %v5215_v38 = vpack.c.bf16 %v1792_v32, %v1792_v32  ;;  %v5219_v39 = vpack.c.bf16 %v1796_v33, %v1796_v33  ;;  %v1790_v40 = vmax.f32 %v1760_v34, 0.0  ;;  %v1794_v41 = vmax.f32 %v1776_v35, 0.0  ;;  %v1921_v33 = vld [vmem:[#allocation2 + $0x20] sm:$0xf] }
 0x23d   : > { %v1771_v42 = vadd.f32 %v5414_v36, %v4836_v24  ;;  %v1787_v43 = vadd.f32 %v5418_v37, %v4836_v24  ;;  %v1762_v44 = vpop.f32.mrf.mxu0  ;;  %v1778_v45 = vpop.f32.mrf.mxu1  ;;  %v1924_v37 = vld [vmem:[#allocation2 + $0x24] sm:$0x1] }
 0x23e   : > { %v1839_v46 = vshrl.u32 %v5215_v38, 16  ;;  %v1842_v47 = vshll.u32 %v5215_v38, 16  ;;  %v1871_v48 = vshrl.u32 %v5219_v39, 16  ;;  %v1874_v49 = vshll.u32 %v5219_v39, 16  ;;  %v1945_v38 = vld [vmem:[#allocation2 + $0x40] sm:$0xf] }
 0x23f   : > { %v5213_v51 = vpack.c.bf16 %v1790_v40, %v1790_v40  ;;  %v5217_v52 = vpack.c.bf16 %v1794_v41, %v1794_v41  ;;  %v1793_v53 = vmax.f32 %v1771_v42, 0.0  ;;  %v1797_v54 = vmax.f32 %v1787_v43, 0.0  ;;  %v1948_v39 = vld [vmem:[#allocation2 + $0x44] sm:$0x1] }
 0x240   : > { %v1841_v55 = vrot.slane %v1839_v46, 7  ;;  %v1873_v58 = vrot.slane %v1871_v48, 7  ;;  %v1763_v60 = vadd.f32 %v4836_v24, %v1762_v44  ;;  %v1779_v61 = vadd.f32 %v4836_v24, %v1778_v45 }
 0x241   : > { %v1823_v0 = vshrl.u32 %v5213_v51, 16  ;;  %v1826_v1 = vshll.u32 %v5213_v51, 16  ;;  %v1855_v2 = vshrl.u32 %v5217_v52, 16  ;;  %v1858_v3 = vshll.u32 %v5217_v52, 16 }
 0x242   : > { %v1844_v4 = vor.u32 %v1842_v47, %v1841_v55  ;;  %v1845_v5 = vrot.slane %v1841_v55, 4  ;;  %v1876_v6 = vor.u32 %v1874_v49, %v1873_v58  ;;  %v1877_v7 = vrot.slane %v1873_v58, 4  ;;  %v1912_v58 = vld [vmem:[#allocation2 + $0x14] sm:$0x1] }
 0x243   : > { %v1825_v8 = vrot.slane %v1823_v0, 7  ;;  %v1857_v10 = vrot.slane %v1855_v2, 7  ;;  %v5216_v11 = vpack.c.bf16 %v1793_v53, %v1793_v53  ;;  %v5220_v12 = vpack.c.bf16 %v1797_v54, %v1797_v54  ;;  %v1909_v54 = vld [vmem:[#allocation2 + $0x10] sm:$0xf] }
 0x244   : > { %v1916_v13 = vsel %vm6430_vm4, %v1844_v4, %v1915_v50  ;;  %v1919_v14 = vsel %vm6442_vm5, %v1845_v5, %v1918_v57  ;;  %v1940_v15 = vsel %vm6430_vm4, %v1876_v6, %v1939_v59  ;;  %v1943_v16 = vsel %vm6442_vm5, %v1877_v7, %v1942_v63  ;;  %v1933_v59 = vld [vmem:[#allocation2 + $0x30] sm:$0xf] }
 0x245   : > { %1917 = vst [vmem:[#allocation2 + $0x18] sm:$0xf] %v1916_v13  ;;  %1920 = vst [vmem:[#allocation2 + $0x1c] sm:$0x1] %v1919_v14  ;;  %v1828_v20 = vor.u32 %v1826_v1, %v1825_v8  ;;  %v1829_v25 = vrot.slane %v1825_v8, 4  ;;  %v1860_v21 = vor.u32 %v1858_v3, %v1857_v10  ;;  %v1861_v22 = vrot.slane %v1857_v10, 4 }
 0x246   : > { %1941 = vst [vmem:[#allocation2 + $0x38] sm:$0xf] %v1940_v15  ;;  %1944 = vst [vmem:[#allocation2 + $0x3c] sm:$0x1] %v1943_v16  ;;  %v1847_v23 = vshrl.u32 %v5216_v11, 16  ;;  %v1850_v24 = vshll.u32 %v5216_v11, 16 }
 0x247   : > { %v1879_v26 = vshrl.u32 %v5220_v12, 16  ;;  %v1882_v27 = vshll.u32 %v5220_v12, 16  ;;  %v1904_v28 = vsel %vm6430_vm4, %v1828_v20, %v1903_v9  ;;  %v1907_v29 = vsel %vm6442_vm5, %v1829_v25, %v1906_v17 }
 0x248   : > { %v1928_v30 = vsel %vm6430_vm4, %v1860_v21, %v1927_v18  ;;  %v1931_v31 = vsel %vm6442_vm5, %v1861_v22, %v1930_v19  ;;  %1905 = vst [vmem:[#allocation2 + $0x8] sm:$0xf] %v1904_v28  ;;  %1908 = vst [vmem:[#allocation2 + $0xc] sm:$0x1] %v1907_v29  ;;  %v1849_v32 = vrot.slane %v1847_v23, 7  ;;  %v1791_v35 = vmax.f32 %v1763_v60, 0.0 }
 0x249   : > { %1929 = vst [vmem:[#allocation2 + $0x28] sm:$0xf] %v1928_v30  ;;  %1932 = vst [vmem:[#allocation2 + $0x2c] sm:$0x1] %v1931_v31  ;;  %v1881_v34 = vrot.slane %v1879_v26, 7  ;;  %v1795_v36 = vmax.f32 %v1779_v61, 0.0 }
 0x24a   : > { %v1852_v40 = vor.u32 %v1850_v24, %v1849_v32  ;;  %v1853_v41 = vrot.slane %v1849_v32, 4  ;;  %v5214_v44 = vpack.c.bf16 %v1791_v35, %v1791_v35  ;;  %v1936_v60 = vld [vmem:[#allocation2 + $0x34] sm:$0x1] }
 0x24b   : > { %v1884_v42 = vor.u32 %v1882_v27, %v1881_v34  ;;  %v1885_v43 = vrot.slane %v1881_v34, 4  ;;  %v5218_v45 = vpack.c.bf16 %v1795_v36, %v1795_v36 }
 0x24c   : > { %v1922_v46 = vsel %vm6430_vm4, %v1852_v40, %v1921_v33  ;;  %v1925_v47 = vsel %vm6442_vm5, %v1853_v41, %v1924_v37  ;;  %v1831_v50 = vshrl.u32 %v5214_v44, 16  ;;  %v1834_v53 = vshll.u32 %v5214_v44, 16 }
 0x24d   : > { %v1946_v48 = vsel %vm6430_vm4, %v1884_v42, %v1945_v38  ;;  %v1949_v49 = vsel %vm6442_vm5, %v1885_v43, %v1948_v39  ;;  %1923 = vst [vmem:[#allocation2 + $0x20] sm:$0xf] %v1922_v46  ;;  %1926 = vst [vmem:[#allocation2 + $0x24] sm:$0x1] %v1925_v47  ;;  %v1863_v51 = vshrl.u32 %v5218_v45, 16  ;;  %v1866_v57 = vshll.u32 %v5218_v45, 16 }
 0x24e   : > { %1947 = vst [vmem:[#allocation2 + $0x40] sm:$0xf] %v1946_v48  ;;  %1950 = vst [vmem:[#allocation2 + $0x44] sm:$0x1] %v1949_v49  ;;  %v1833_v52 = vrot.slane %v1831_v50, 7 }
 0x24f   : > { %v1865_v55 = vrot.slane %v1863_v51, 7 }
 0x250   : > { %v1836_v61 = vor.u32 %v1834_v53, %v1833_v52  ;;  %v1837_v63 = vrot.slane %v1833_v52, 4 }
 0x251   : > { %v1868_v0 = vor.u32 %v1866_v57, %v1865_v55  ;;  %v1869_v1 = vrot.slane %v1865_v55, 4 }
 0x252   : > { %v1910_v2 = vsel %vm6430_vm4, %v1836_v61, %v1909_v54  ;;  %v1913_v3 = vsel %vm6442_vm5, %v1837_v63, %v1912_v58 }
 0x253   : > { %v1934_v4 = vsel %vm6430_vm4, %v1868_v0, %v1933_v59  ;;  %v1937_v5 = vsel %vm6442_vm5, %v1869_v1, %v1936_v60  ;;  %1911 = vst [vmem:[#allocation2 + $0x10] sm:$0xf] %v1910_v2  ;;  %1914 = vst [vmem:[#allocation2 + $0x14] sm:$0x1] %v1913_v3 }
 0x254   : > { %1935 = vst [vmem:[#allocation2 + $0x30] sm:$0xf] %v1934_v4  ;;  %1938 = vst [vmem:[#allocation2 + $0x34] sm:$0x1] %v1937_v5 }
 0x255 PF: > { %p4857_p5 = scmp.ge.s32.totalorder %s5917_s12, 1 }
 0x257   : > { %1954 = sbr.rel (%p4857_p5) target bundleno = 859 (0x35b), region = 64 }
 0x25c   : > { %v5721_v6 = vld [vmem:[%s7732_s3 + $0x38] sm:$0xff]   ;;  %v5722_v7 = vld [vmem:[%s7732_s3 + $0x30] sm:$0xff]   ;;  %v5723_v8 = vld [vmem:[%s7732_s3 + $0x28] sm:$0xff]  }
 0x25d   : > { %5419 = vmatprep.subr.bf16.mxu0 %v5721_v6  ;;  %5571 = vmatprep.subr.bf16.mxu1 %v5721_v6  ;;  %v5724_v9 = vld [vmem:[%s7732_s3 + $0x20] sm:$0xff]   ;;  %v5730_v11 = vld [vmem:[%s6401_s19 + $0x10] sm:$0xff]   ;;  %v5725_v12 = vld [vmem:[%s7732_s3 + $0x18] sm:$0xff]  }
 0x25e   : > { %5420 = vmatpush3.bf16.msra.mxu0 %v5721_v6  ;;  %5579 = vmatpush3.bf16.msra.mxu1 %v5721_v6  ;;  %v5729_v10 = vld [vmem:[%s6401_s19] sm:$0xff]   ;;  %v5726_v13 = vld [vmem:[%s7732_s3 + $0x10] sm:$0xff]   ;;  %v5727_v14 = vld [vmem:[%s7732_s3 + $0x8] sm:$0xff]  }
 0x25f   : > { %5421 = vmatprep.subr.bf16.mxu0 %v5722_v7  ;;  %5572 = vmatprep.subr.bf16.mxu1 %v5722_v7  ;;  %v5728_v15 = vld [vmem:[%s7732_s3] sm:$0xff]   ;;  %v5731_v16 = vld [vmem:[%s6401_s19 + $0x8] sm:$0xff]   ;;  %v5732_v17 = vld [vmem:[%s6401_s19 + $0x18] sm:$0xff]  }
 0x260   : > { %5435 = vmatprep.mubr.bf16.mxu0 %v5729_v10  ;;  %5439 = vmatprep.mubr.bf16.mxu1 %v5730_v11  ;;  %v4858_v18 = vld [vmem:[%s7733_s4] ss:$0 sm:$0xff]  ;;  %v2248_v43 = vld [vmem:[#allocation2 + $0x1a8] sm:$0xf]  ;;  %v2251_v49 = vld [vmem:[#allocation2 + $0x1ac] sm:$0x1] }
 0x261   : > { %v2272_v51 = vld [vmem:[#allocation2 + $0x1c8] sm:$0xf]  ;;  %v2275_v54 = vld [vmem:[#allocation2 + $0x1cc] sm:$0x1]  ;;  %v2236_v2 = vld [vmem:[#allocation2 + $0x198] sm:$0xf] }
 0x262   : > { %5422 = vmatpush3.bf16.msra.mxu0 %v5722_v7  ;;  %5580 = vmatpush3.bf16.msra.mxu1 %v5722_v7  ;;  %v2239_v10 = vld [vmem:[#allocation2 + $0x19c] sm:$0x1]  ;;  %v2260_v11 = vld [vmem:[#allocation2 + $0x1b8] sm:$0xf] }
 0x263   : > { %5423 = vmatprep.subr.bf16.mxu0 %v5723_v8  ;;  %5573 = vmatprep.subr.bf16.mxu1 %v5723_v8 }
 0x266   : > { %5424 = vmatpush3.bf16.msra.mxu0 %v5723_v8  ;;  %5581 = vmatpush3.bf16.msra.mxu1 %v5723_v8 }
 0x267   : > { %5425 = vmatprep.subr.bf16.mxu0 %v5724_v9  ;;  %5574 = vmatprep.subr.bf16.mxu1 %v5724_v9 }
 0x26a   : > { %5426 = vmatpush3.bf16.msra.mxu0 %v5724_v9  ;;  %5582 = vmatpush3.bf16.msra.mxu1 %v5724_v9 }
 0x26b   : > { %5427 = vmatprep.subr.bf16.mxu0 %v5725_v12  ;;  %5575 = vmatprep.subr.bf16.mxu1 %v5725_v12 }
 0x26e   : > { %5428 = vmatpush3.bf16.msra.mxu0 %v5725_v12  ;;  %5583 = vmatpush3.bf16.msra.mxu1 %v5725_v12  ;;  %v2263_v12 = vld [vmem:[#allocation2 + $0x1bc] sm:$0x1] }
 0x26f   : > { %5429 = vmatprep.subr.bf16.mxu0 %v5726_v13  ;;  %5576 = vmatprep.subr.bf16.mxu1 %v5726_v13 }
 0x272   : > { %5430 = vmatpush3.bf16.msra.mxu0 %v5726_v13  ;;  %5584 = vmatpush3.bf16.msra.mxu1 %v5726_v13 }
 0x273   : > { %5431 = vmatprep.subr.bf16.mxu0 %v5727_v14  ;;  %5577 = vmatprep.subr.bf16.mxu1 %v5727_v14 }
 0x276   : > { %5432 = vmatpush3.bf16.msra.mxu0 %v5727_v14  ;;  %5585 = vmatpush3.bf16.msra.mxu1 %v5727_v14 }
 0x277   : > { %5433 = vmatprep.subr.bf16.mxu0 %v5728_v15  ;;  %5578 = vmatprep.subr.bf16.mxu1 %v5728_v15 }
 0x27a   : > { %5434 = vmatpush3.bf16.msra.mxu0 %v5728_v15  ;;  %5586 = vmatpush3.bf16.msra.mxu1 %v5728_v15 }
 0x27d   : > { %5436 = vmatmul.mubr.bf16.vlgmr.msra.gmra.mxu0 %v5731_v16  ;;  %5440 = vmatmul.mubr.bf16.vlgmr.msra.gmra.mxu1 %v5732_v17 }
 0x33d   : > { %v5437_v19 = vpop.f32.mrf.mxu0  ;;  %v5441_v20 = vpop.f32.mrf.mxu1 }
 0x33e   : > { %v2101_v25 = vadd.f32 %v5437_v19, %v4858_v18  ;;  %v2117_v21 = vadd.f32 %v5441_v20, %v4858_v18 }
 0x33f   : > { %v2092_v22 = vpop.f32.mrf.mxu0  ;;  %v2108_v23 = vpop.f32.mrf.mxu1 }
 0x340   : > { %v2125_v24 = vmax.f32 %v2101_v25, 0.0  ;;  %v2129_v26 = vmax.f32 %v2117_v21, 0.0  ;;  %v2093_v27 = vadd.f32 %v4858_v18, %v2092_v22  ;;  %v2109_v28 = vadd.f32 %v4858_v18, %v2108_v23 }
 0x341   : > { %v5438_v29 = vpop.f32.mrf.mxu0  ;;  %v5442_v30 = vpop.f32.mrf.mxu1 }
 0x342   : > { %v5223_v31 = vpack.c.bf16 %v2125_v24, %v2125_v24  ;;  %v5227_v32 = vpack.c.bf16 %v2129_v26, %v2129_v26  ;;  %v2123_v33 = vmax.f32 %v2093_v27, 0.0  ;;  %v2127_v34 = vmax.f32 %v2109_v28, 0.0  ;;  %v2254_v26 = vld [vmem:[#allocation2 + $0x1b0] sm:$0xf] }
 0x343   : > { %v2104_v35 = vadd.f32 %v5438_v29, %v4858_v18  ;;  %v2120_v36 = vadd.f32 %v5442_v30, %v4858_v18  ;;  %v2095_v37 = vpop.f32.mrf.mxu0  ;;  %v2111_v38 = vpop.f32.mrf.mxu1  ;;  %v2257_v30 = vld [vmem:[#allocation2 + $0x1b4] sm:$0x1] }
 0x344   : > { %v2172_v39 = vshrl.u32 %v5223_v31, 16  ;;  %v2175_v40 = vshll.u32 %v5223_v31, 16  ;;  %v2204_v41 = vshrl.u32 %v5227_v32, 16  ;;  %v2207_v42 = vshll.u32 %v5227_v32, 16  ;;  %v2278_v31 = vld [vmem:[#allocation2 + $0x1d0] sm:$0xf] }
 0x345   : > { %v5221_v44 = vpack.c.bf16 %v2123_v33, %v2123_v33  ;;  %v5225_v45 = vpack.c.bf16 %v2127_v34, %v2127_v34  ;;  %v2126_v46 = vmax.f32 %v2104_v35, 0.0  ;;  %v2130_v47 = vmax.f32 %v2120_v36, 0.0  ;;  %v2281_v32 = vld [vmem:[#allocation2 + $0x1d4] sm:$0x1] }
 0x346   : > { %v2174_v48 = vrot.slane %v2172_v39, 7  ;;  %v2206_v50 = vrot.slane %v2204_v41, 7  ;;  %v2096_v52 = vadd.f32 %v4858_v18, %v2095_v37  ;;  %v2112_v53 = vadd.f32 %v4858_v18, %v2111_v38 }
 0x347   : > { %v2156_v55 = vshrl.u32 %v5221_v44, 16  ;;  %v2159_v57 = vshll.u32 %v5221_v44, 16  ;;  %v2188_v58 = vshrl.u32 %v5225_v45, 16  ;;  %v2191_v59 = vshll.u32 %v5225_v45, 16 }
 0x348   : > { %v2177_v60 = vor.u32 %v2175_v40, %v2174_v48  ;;  %v2178_v61 = vrot.slane %v2174_v48, 4  ;;  %v2209_v63 = vor.u32 %v2207_v42, %v2206_v50  ;;  %v2210_v0 = vrot.slane %v2206_v50, 4  ;;  %v2245_v50 = vld [vmem:[#allocation2 + $0x1a4] sm:$0x1] }
 0x349   : > { %v2158_v1 = vrot.slane %v2156_v55, 7  ;;  %v2190_v3 = vrot.slane %v2188_v58, 7  ;;  %v5224_v4 = vpack.c.bf16 %v2126_v46, %v2126_v46  ;;  %v5228_v5 = vpack.c.bf16 %v2130_v47, %v2130_v47  ;;  %v2242_v47 = vld [vmem:[#allocation2 + $0x1a0] sm:$0xf] }
 0x34a   : > { %v2249_v6 = vsel %vm6430_vm4, %v2177_v60, %v2248_v43  ;;  %v2252_v7 = vsel %vm6442_vm5, %v2178_v61, %v2251_v49  ;;  %v2273_v8 = vsel %vm6430_vm4, %v2209_v63, %v2272_v51  ;;  %v2276_v9 = vsel %vm6442_vm5, %v2210_v0, %v2275_v54  ;;  %v2266_v51 = vld [vmem:[#allocation2 + $0x1c0] sm:$0xf] }
 0x34b   : > { %2250 = vst [vmem:[#allocation2 + $0x1a8] sm:$0xf] %v2249_v6  ;;  %2253 = vst [vmem:[#allocation2 + $0x1ac] sm:$0x1] %v2252_v7  ;;  %v2161_v13 = vor.u32 %v2159_v57, %v2158_v1  ;;  %v2162_v14 = vrot.slane %v2158_v1, 4  ;;  %v2193_v15 = vor.u32 %v2191_v59, %v2190_v3  ;;  %v2194_v16 = vrot.slane %v2190_v3, 4 }
 0x34c   : > { %2274 = vst [vmem:[#allocation2 + $0x1c8] sm:$0xf] %v2273_v8  ;;  %2277 = vst [vmem:[#allocation2 + $0x1cc] sm:$0x1] %v2276_v9  ;;  %v2180_v17 = vshrl.u32 %v5224_v4, 16  ;;  %v2183_v18 = vshll.u32 %v5224_v4, 16 }
 0x34d   : > { %v2212_v19 = vshrl.u32 %v5228_v5, 16  ;;  %v2215_v20 = vshll.u32 %v5228_v5, 16  ;;  %v2237_v25 = vsel %vm6430_vm4, %v2161_v13, %v2236_v2  ;;  %v2240_v21 = vsel %vm6442_vm5, %v2162_v14, %v2239_v10 }
 0x34e   : > { %v2261_v22 = vsel %vm6430_vm4, %v2193_v15, %v2260_v11  ;;  %v2264_v23 = vsel %vm6442_vm5, %v2194_v16, %v2263_v12  ;;  %2238 = vst [vmem:[#allocation2 + $0x198] sm:$0xf] %v2237_v25  ;;  %2241 = vst [vmem:[#allocation2 + $0x19c] sm:$0x1] %v2240_v21  ;;  %v2182_v24 = vrot.slane %v2180_v17, 7  ;;  %v2124_v28 = vmax.f32 %v2096_v52, 0.0 }
 0x34f   : > { %2262 = vst [vmem:[#allocation2 + $0x1b8] sm:$0xf] %v2261_v22  ;;  %2265 = vst [vmem:[#allocation2 + $0x1bc] sm:$0x1] %v2264_v23  ;;  %v2214_v27 = vrot.slane %v2212_v19, 7  ;;  %v2128_v29 = vmax.f32 %v2112_v53, 0.0 }
 0x350   : > { %v2185_v33 = vor.u32 %v2183_v18, %v2182_v24  ;;  %v2186_v34 = vrot.slane %v2182_v24, 4  ;;  %v5222_v37 = vpack.c.bf16 %v2124_v28, %v2124_v28  ;;  %v2269_v52 = vld [vmem:[#allocation2 + $0x1c4] sm:$0x1] }
 0x351   : > { %v2217_v35 = vor.u32 %v2215_v20, %v2214_v27  ;;  %v2218_v36 = vrot.slane %v2214_v27, 4  ;;  %v5226_v38 = vpack.c.bf16 %v2128_v29, %v2128_v29 }
 0x352   : > { %v2255_v39 = vsel %vm6430_vm4, %v2185_v33, %v2254_v26  ;;  %v2258_v40 = vsel %vm6442_vm5, %v2186_v34, %v2257_v30  ;;  %v2164_v43 = vshrl.u32 %v5222_v37, 16  ;;  %v2167_v46 = vshll.u32 %v5222_v37, 16 }
 0x353   : > { %v2279_v41 = vsel %vm6430_vm4, %v2217_v35, %v2278_v31  ;;  %v2282_v42 = vsel %vm6442_vm5, %v2218_v36, %v2281_v32  ;;  %2256 = vst [vmem:[#allocation2 + $0x1b0] sm:$0xf] %v2255_v39  ;;  %2259 = vst [vmem:[#allocation2 + $0x1b4] sm:$0x1] %v2258_v40  ;;  %v2196_v44 = vshrl.u32 %v5226_v38, 16  ;;  %v2199_v49 = vshll.u32 %v5226_v38, 16 }
 0x354   : > { %2280 = vst [vmem:[#allocation2 + $0x1d0] sm:$0xf] %v2279_v41  ;;  %2283 = vst [vmem:[#allocation2 + $0x1d4] sm:$0x1] %v2282_v42  ;;  %v2166_v45 = vrot.slane %v2164_v43, 7 }
 0x355   : > { %v2198_v48 = vrot.slane %v2196_v44, 7 }
 0x356   : > { %v2169_v53 = vor.u32 %v2167_v46, %v2166_v45  ;;  %v2170_v54 = vrot.slane %v2166_v45, 4 }
 0x357   : > { %v2201_v55 = vor.u32 %v2199_v49, %v2198_v48  ;;  %v2202_v57 = vrot.slane %v2198_v48, 4 }
 0x358   : > { %v2243_v58 = vsel %vm6430_vm4, %v2169_v53, %v2242_v47  ;;  %v2246_v59 = vsel %vm6442_vm5, %v2170_v54, %v2245_v50 }
 0x359   : > { %v2267_v60 = vsel %vm6430_vm4, %v2201_v55, %v2266_v51  ;;  %v2270_v61 = vsel %vm6442_vm5, %v2202_v57, %v2269_v52  ;;  %2244 = vst [vmem:[#allocation2 + $0x1a0] sm:$0xf] %v2243_v58  ;;  %2247 = vst [vmem:[#allocation2 + $0x1a4] sm:$0x1] %v2246_v59 }
 0x35a   : > { %2268 = vst [vmem:[#allocation2 + $0x1c0] sm:$0xf] %v2267_v60  ;;  %2271 = vst [vmem:[#allocation2 + $0x1c4] sm:$0x1] %v2270_v61 }
 0x35b PF: > { %v6747_v63 = vld [vmem:[#allocation2 + $0x18] sm:$0xff]   ;;  %v6749_v0 = vld [vmem:[#allocation2 + $0x8] sm:$0xff]   ;;  %s5940_s19 = smov 32   ;;  %v6753_v1 = vld [vmem:[#allocation2 + $0x20] sm:$0xff]   ;;  %s5941_s24 = smov 64   ;;  %vm2896_vm6 = vcmask 261120  }
 0x35c   : > { %2678 = vrot.lane.b32.xlu1 %v6747_v63, %s5940_s19  ;;  %2674 = vrot.lane.b32.xlu0 %v6749_v0, %s5940_s19  ;;  %v6757_v56 = vld [vmem:[#allocation2 + $0x10] sm:$0xff]   ;;  %v6765_v2 = vld [vmem:[#allocation2 + $0x28] sm:$0xff]   ;;  %v6769_v3 = vld [vmem:[#allocation2 + $0x40] sm:$0xff]   ;;  %vm3041_vm7 = vcmask 523264   ;;  %vm3474_vm8 = vcmask 781312   ;;  %s7407_s25 = smov 0  }
 0x35d   : > { %v6761_v62 = vld [vmem:[#allocation2 + $0x30] sm:$0xff]   ;;  %v6773_v4 = vld [vmem:[#allocation2 + $0x38] sm:$0xff]   ;;  %v6777_v5 = vld [vmem:[#allocation2 + $0x60] sm:$0xff]  }
 0x35e   : > { %v6781_v6 = vld [vmem:[#allocation2 + $0x58] sm:$0xff]   ;;  %v6785_v7 = vld [vmem:[#allocation2 + $0x70] sm:$0xff]   ;;  %v6789_v8 = vld [vmem:[#allocation2 + $0x68] sm:$0xff]  }
 0x35f   : > { %v6793_v9 = vld [vmem:[#allocation2 + $0x80] sm:$0xff]   ;;  %v6797_v10 = vld [vmem:[#allocation2 + $0x78] sm:$0xff]   ;;  %v6801_v11 = vld [vmem:[#allocation2 + $0x90] sm:$0xff]  }
 0x360   : > { %2680 = vrot.lane.b32.xlu1 %v6753_v1, %s5940_s19  ;;  %2676 = vrot.lane.b32.xlu0 %v6757_v56, %s5940_s19  ;;  %v6805_v12 = vld [vmem:[#allocation2 + $0x88] sm:$0xff]   ;;  %v6809_v13 = vld [vmem:[#allocation2 + $0xb0] sm:$0xff]   ;;  %v6817_v15 = vld [vmem:[#allocation2 + $0xc0] sm:$0xff]  }
 0x361   : > { %v6813_v14 = vld [vmem:[#allocation2 + $0xa8] sm:$0xff]   ;;  %v6821_v16 = vld [vmem:[#allocation2 + $0xb8] sm:$0xff]   ;;  %v6825_v17 = vld [vmem:[#allocation2 + $0xd0] sm:$0xff]  }
 0x362   : > { %v6829_v18 = vld [vmem:[#allocation2 + $0xc8] sm:$0xff]   ;;  %v6833_v19 = vld [vmem:[#allocation2 + $0xe0] sm:$0xff]   ;;  %v6837_v20 = vld [vmem:[#allocation2 + $0xd8] sm:$0xff]  }
 0x363   : > { %v6841_v25 = vld [vmem:[#allocation2 + $0x100] sm:$0xff]   ;;  %v6845_v21 = vld [vmem:[#allocation2 + $0xf8] sm:$0xff]   ;;  %v6849_v22 = vld [vmem:[#allocation2 + $0x110] sm:$0xff]  }
 0x364   : > { %2684 = vrot.lane.b32.xlu1 %v6761_v62, %s5940_s19  ;;  %2682 = vrot.lane.b32.xlu0 %v6765_v2, %s5940_s19  ;;  %7785 = vst [vmem:[#allocation16_spill] sm:$0xff] %v6841_v25  ;;  %7786 = vst [vmem:[#allocation17_spill] sm:$0xff] %v6849_v22  ;;  %v6853_v23 = vld [vmem:[#allocation2 + $0x108] sm:$0xff]   ;;  %v6857_v24 = vld [vmem:[#allocation2 + $0x120] sm:$0xff]  }
 0x365   : > { %7787 = vst [vmem:[#allocation18_spill] sm:$0xff] %v6853_v23  ;;  %7788 = vst [vmem:[#allocation19_spill] sm:$0xff] %v6857_v24  ;;  %v6861_v26 = vld [vmem:[#allocation2 + $0x118] sm:$0xff]   ;;  %v6863_v27 = vld [vmem:[#allocation2 + $0x130] sm:$0xff]  }
 0x366   : > { %7789 = vst [vmem:[#allocation20_spill] sm:$0xff] %v6861_v26  ;;  %v6869_v28 = vld [vmem:[#allocation2 + $0x128] sm:$0xff]   ;;  %v6873_v29 = vld [vmem:[#allocation2 + $0x150] sm:$0xff]   ;;  %v6881_v31 = vld [vmem:[#allocation2 + $0x160] sm:$0xff]  }
 0x367   : > { %7790 = vst [vmem:[#allocation21_spill] sm:$0xff] %v6869_v28  ;;  %7791 = vst [vmem:[#allocation22_spill] sm:$0xff] %v6873_v29  ;;  %v6877_v30 = vld [vmem:[#allocation2 + $0x148] sm:$0xff]   ;;  %v6885_v32 = vld [vmem:[#allocation2 + $0x158] sm:$0xff]  }
 0x368   : > { %2688 = vrot.lane.b32.xlu1 %v6769_v3, %s5940_s19  ;;  %2686 = vrot.lane.b32.xlu0 %v6773_v4, %s5940_s19  ;;  %7792 = vst [vmem:[#allocation23_spill] sm:$0xff] %v6877_v30  ;;  %7793 = vst [vmem:[#allocation24_spill] sm:$0xff] %v6881_v31  ;;  %v6889_v33 = vld [vmem:[#allocation2 + $0x170] sm:$0xff]   ;;  %v6893_v34 = vld [vmem:[#allocation2 + $0x168] sm:$0xff]  }
 0x369   : > { %7794 = vst [vmem:[#allocation25_spill] sm:$0xff] %v6885_v32  ;;  %7795 = vst [vmem:[#allocation26_spill] sm:$0xff] %v6889_v33  ;;  %v6897_v35 = vld [vmem:[#allocation2 + $0x180] sm:$0xff]   ;;  %v6901_v36 = vld [vmem:[#allocation2 + $0x178] sm:$0xff]  }
 0x36a   : > { %7796 = vst [vmem:[#allocation27_spill] sm:$0xff] %v6893_v34  ;;  %7797 = vst [vmem:[#allocation28_spill] sm:$0xff] %v6901_v36  ;;  %v6905_v37 = vld [vmem:[#allocation2 + $0x1a0] sm:$0xff]   ;;  %v6909_v38 = vld [vmem:[#allocation2 + $0x198] sm:$0xff]  }
 0x36b   : > { %7798 = vst [vmem:[#allocation29_spill] sm:$0xff] %v6905_v37  ;;  %7799 = vst [vmem:[#allocation30_spill] sm:$0xff] %v6909_v38  ;;  %v6913_v39 = vld [vmem:[#allocation2 + $0x1b0] sm:$0xff]   ;;  %v6917_v40 = vld [vmem:[#allocation2 + $0x1a8] sm:$0xff]  }
 0x36c   : > { %2692 = vrot.lane.b32.xlu1 %v6777_v5, %s5940_s19  ;;  %2690 = vrot.lane.b32.xlu0 %v6781_v6, %s5940_s19  ;;  %7800 = vst [vmem:[#allocation31_spill] sm:$0xff] %v6913_v39  ;;  %7801 = vst [vmem:[#allocation32_spill] sm:$0xff] %v6917_v40  ;;  %v6921_v41 = vld [vmem:[#allocation2 + $0x1c0] sm:$0xff]   ;;  %v6925_v42 = vld [vmem:[#allocation2 + $0x1b8] sm:$0xff]  }
 0x36d   : > { %7802 = vst [vmem:[#allocation33_spill] sm:$0xff] %v6921_v41  ;;  %7803 = vst [vmem:[#allocation34_spill] sm:$0xff] %v6925_v42  ;;  %v6929_v43 = vld [vmem:[#allocation2 + $0x1d0] sm:$0xff]   ;;  %v6933_v44 = vld [vmem:[#allocation2 + $0x1c8] sm:$0xff]  }
 0x36e   : > { %7804 = vst [vmem:[#allocation35_spill] sm:$0xff] %v6933_v44  ;;  %v5781_v45 = vld [vmem:[#allocation2 + $0x48] sm:$0xff]   ;;  %v5783_v50 = vld [vmem:[#allocation2 + $0x98] sm:$0xff]  }
 0x36f   : > { %v5785_v60 = vld [vmem:[#allocation2 + $0xe8] sm:$0xff]  }
 0x370   : > { %2696 = vrot.lane.b32.xlu1 %v6785_v7, %s5940_s19  ;;  %2694 = vrot.lane.b32.xlu0 %v6789_v8, %s5940_s19 }
 0x374   : > { %2700 = vrot.lane.b32.xlu1 %v6793_v9, %s5940_s19  ;;  %2698 = vrot.lane.b32.xlu0 %v6797_v10, %s5940_s19 }
 0x378   : > { %2704 = vrot.lane.b32.xlu1 %v6801_v11, %s5940_s19  ;;  %2702 = vrot.lane.b32.xlu0 %v6805_v12, %s5940_s19 }
 0x37c   : > { %2708 = vrot.lane.b32.xlu1 %v6809_v13, %s5940_s19  ;;  %2706 = vrot.lane.b32.xlu0 %v6813_v14, %s5940_s19 }
 0x380   : > { %2712 = vrot.lane.b32.xlu1 %v6817_v15, %s5940_s19  ;;  %2710 = vrot.lane.b32.xlu0 %v6821_v16, %s5940_s19 }
 0x384   : > { %2716 = vrot.lane.b32.xlu1 %v6825_v17, %s5940_s19  ;;  %2714 = vrot.lane.b32.xlu0 %v6829_v18, %s5940_s19 }
 0x388   : > { %2720 = vrot.lane.b32.xlu1 %v6833_v19, %s5940_s19  ;;  %2718 = vrot.lane.b32.xlu0 %v6837_v20, %s5940_s19 }
 0x38c   : > { %2724 = vrot.lane.b32.xlu1 %v6841_v25, %s5940_s19  ;;  %2722 = vrot.lane.b32.xlu0 %v6845_v21, %s5940_s19 }
 0x390   : > { %2728 = vrot.lane.b32.xlu1 %v6849_v22, %s5940_s19  ;;  %2726 = vrot.lane.b32.xlu0 %v6853_v23, %s5940_s19 }
 0x394   : > { %2732 = vrot.lane.b32.xlu1 %v6857_v24, %s5940_s19  ;;  %2730 = vrot.lane.b32.xlu0 %v6861_v26, %s5940_s19 }
 0x398   : > { %2736 = vrot.lane.b32.xlu1 %v6863_v27, %s5940_s19  ;;  %2734 = vrot.lane.b32.xlu0 %v6869_v28, %s5940_s19 }
 0x39c   : > { %2740 = vrot.lane.b32.xlu1 %v6873_v29, %s5940_s19  ;;  %2738 = vrot.lane.b32.xlu0 %v6877_v30, %s5940_s19  ;;  %v5787_v30 = vld [vmem:[#allocation2 + $0x138] sm:$0xff]  }
 0x3a0   : > { %2744 = vrot.lane.b32.xlu1 %v6881_v31, %s5940_s19  ;;  %2742 = vrot.lane.b32.xlu0 %v6885_v32, %s5940_s19 }
 0x3a4   : > { %2748 = vrot.lane.b32.xlu1 %v6889_v33, %s5940_s19  ;;  %2746 = vrot.lane.b32.xlu0 %v6893_v34, %s5940_s19 }
 0x3a8   : > { %2752 = vrot.lane.b32.xlu1 %v6897_v35, %s5940_s19  ;;  %2750 = vrot.lane.b32.xlu0 %v6901_v36, %s5940_s19 }
 0x3ac   : > { %2756 = vrot.lane.b32.xlu1 %v6905_v37, %s5940_s19  ;;  %2754 = vrot.lane.b32.xlu0 %v6909_v38, %s5940_s19 }
 0x3b0   : > { %2760 = vrot.lane.b32.xlu1 %v6913_v39, %s5940_s19  ;;  %2758 = vrot.lane.b32.xlu0 %v6917_v40, %s5940_s19 }
 0x3b4   : > { %2764 = vrot.lane.b32.xlu1 %v6921_v41, %s5940_s19  ;;  %2762 = vrot.lane.b32.xlu0 %v6925_v42, %s5940_s19 }
 0x3b8   : > { %2768 = vrot.lane.b32.xlu1 %v6929_v43, %s5940_s19  ;;  %2766 = vrot.lane.b32.xlu0 %v6933_v44, %s5940_s19 }
 0x3bc   : > { %2802 = vrot.lane.b32.xlu1 %v6747_v63, %s5941_s24  ;;  %2800 = vrot.lane.b32.xlu0 %v6757_v56, %s5941_s24 }
 0x3c0   : > { %2806 = vrot.lane.b32.xlu1 %v6765_v2, %s5941_s24  ;;  %2804 = vrot.lane.b32.xlu0 %v6753_v1, %s5941_s24 }
 0x3c4   : > { %2810 = vrot.lane.b32.xlu1 %v6773_v4, %s5941_s24  ;;  %2808 = vrot.lane.b32.xlu0 %v6761_v62, %s5941_s24 }
 0x3c8   : > { %2814 = vrot.lane.b32.xlu1 %v5781_v45, %s5941_s24  ;;  %2812 = vrot.lane.b32.xlu0 %v6769_v3, %s5941_s24 }
 0x3cc   : > { %2818 = vrot.lane.b32.xlu1 %v6789_v8, %s5941_s24  ;;  %2816 = vrot.lane.b32.xlu0 %v6777_v5, %s5941_s24 }
 0x3ce   : > { %v6958_v46 = vpop.permute.xlu1 %2678  ;;  %v6960_v47 = vpop.permute.xlu0 %2674 }
 0x3d0   : > { %2822 = vrot.lane.b32.xlu1 %v6797_v10, %s5941_s24  ;;  %2820 = vrot.lane.b32.xlu0 %v6785_v7, %s5941_s24 }
 0x3d2   : > { %v6966_v48 = vpop.permute.xlu1 %2680  ;;  %v6968_v49 = vpop.permute.xlu0 %2676 }
 0x3d4   : > { %2826 = vrot.lane.b32.xlu1 %v6805_v12, %s5941_s24  ;;  %2824 = vrot.lane.b32.xlu0 %v6793_v9, %s5941_s24 }
 0x3d6   : > { %v6974_v51 = vpop.permute.xlu1 %2684  ;;  %v6976_v52 = vpop.permute.xlu0 %2682 }
 0x3d8   : > { %2830 = vrot.lane.b32.xlu1 %v5783_v50, %s5941_s24  ;;  %2828 = vrot.lane.b32.xlu0 %v6801_v11, %s5941_s24 }
 0x3da   : > { %v6981_v53 = vpop.permute.xlu1 %2688  ;;  %v6983_v54 = vpop.permute.xlu0 %2686 }
 0x3dc   : > { %2834 = vrot.lane.b32.xlu1 %v6821_v16, %s5941_s24  ;;  %2832 = vrot.lane.b32.xlu0 %v6809_v13, %s5941_s24 }
 0x3de   : > { %v6989_v55 = vpop.permute.xlu1 %2692  ;;  %v6991_v57 = vpop.permute.xlu0 %2690 }
 0x3e0   : > { %2838 = vrot.lane.b32.xlu1 %v6829_v18, %s5941_s24  ;;  %2836 = vrot.lane.b32.xlu0 %v6817_v15, %s5941_s24 }
 0x3e2   : > { %v6997_v58 = vpop.permute.xlu1 %2696  ;;  %v6999_v59 = vpop.permute.xlu0 %2694 }
 0x3e4   : > { %2842 = vrot.lane.b32.xlu1 %v6837_v20, %s5941_s24  ;;  %2840 = vrot.lane.b32.xlu0 %v6825_v17, %s5941_s24 }
 0x3e6   : > { %v7005_v61 = vpop.permute.xlu1 %2700  ;;  %v7007_v3 = vpop.permute.xlu0 %2698 }
 0x3e8   : > { %2846 = vrot.lane.b32.xlu1 %v5785_v60, %s5941_s24  ;;  %2844 = vrot.lane.b32.xlu0 %v6833_v19, %s5941_s24 }
 0x3ea   : > { %v7012_v11 = vpop.permute.xlu1 %2704  ;;  %v7014_v45 = vpop.permute.xlu0 %2702 }
 0x3ec   : > { %2850 = vrot.lane.b32.xlu1 %v6853_v23, %s5941_s24  ;;  %2848 = vrot.lane.b32.xlu0 %v6841_v25, %s5941_s24 }
 0x3ee   : > { %v7020_v50 = vpop.permute.xlu1 %2708  ;;  %v7022_v38 = vpop.permute.xlu0 %2706 }
 0x3f0   : > { %2854 = vrot.lane.b32.xlu1 %v6861_v26, %s5941_s24  ;;  %2852 = vrot.lane.b32.xlu0 %v6849_v22, %s5941_s24 }
 0x3f2   : > { %v7028_v19 = vpop.permute.xlu1 %2712  ;;  %v7030_v60 = vpop.permute.xlu0 %2710 }
 0x3f4   : > { %2858 = vrot.lane.b32.xlu1 %v6869_v28, %s5941_s24  ;;  %2856 = vrot.lane.b32.xlu0 %v6857_v24, %s5941_s24 }
 0x3f6   : > { %v7036_v25 = vpop.permute.xlu1 %2716  ;;  %v7038_v23 = vpop.permute.xlu0 %2714 }
 0x3f8   : > { %2862 = vrot.lane.b32.xlu1 %v5787_v30, %s5941_s24  ;;  %2860 = vrot.lane.b32.xlu0 %v6863_v27, %s5941_s24 }
 0x3fa   : > { %v7043_v22 = vpop.permute.xlu1 %2720  ;;  %v7045_v26 = vpop.permute.xlu0 %2718 }
 0x3fc   : > { %2866 = vrot.lane.b32.xlu1 %v6885_v32, %s5941_s24  ;;  %2864 = vrot.lane.b32.xlu0 %v6873_v29, %s5941_s24  ;;  %v5789_v32 = vld [vmem:[#allocation2 + $0x188] sm:$0xff]  }
 0x3fe   : > { %v7051_v24 = vpop.permute.xlu1 %2724  ;;  %v7053_v28 = vpop.permute.xlu0 %2722 }
 0x3ff   : > { %7805 = vst [vmem:[#allocation36_spill] sm:$0xff] %v7053_v28 }
 0x400   : > { %2870 = vrot.lane.b32.xlu1 %v6893_v34, %s5941_s24  ;;  %2868 = vrot.lane.b32.xlu0 %v6881_v31, %s5941_s24 }
 0x402   : > { %v7059_v27 = vpop.permute.xlu1 %2728  ;;  %v7061_v30 = vpop.permute.xlu0 %2726 }
 0x404   : > { %2874 = vrot.lane.b32.xlu1 %v6901_v36, %s5941_s24  ;;  %2872 = vrot.lane.b32.xlu0 %v6889_v33, %s5941_s24 }
 0x406   : > { %v7067_v29 = vpop.permute.xlu1 %2732  ;;  %v7069_v28 = vpop.permute.xlu0 %2730 }
 0x408   : > { %2878 = vrot.lane.b32.xlu1 %v5789_v32, %s5941_s24  ;;  %2876 = vrot.lane.b32.xlu0 %v6897_v35, %s5941_s24 }
 0x40a   : > { %v7074_v31 = vpop.permute.xlu1 %2736  ;;  %v7076_v34 = vpop.permute.xlu0 %2734 }
 0x40b   : > { %7806 = vst [vmem:[#allocation37_spill] sm:$0xff] %v7076_v34  ;;  %v2908_v34 = vsel %vm2896_vm6, %v6747_v63, %v6966_v48 }
 0x40c   : > { %2882 = vrot.lane.b32.xlu1 %v6917_v40, %s5941_s24  ;;  %2880 = vrot.lane.b32.xlu0 %v6905_v37, %s5941_s24  ;;  %v5791_v40 = vld [vmem:[#allocation2 + $0x1d8] sm:$0xff]  }
 0x40e   : > { %v7082_v33 = vpop.permute.xlu1 %2740  ;;  %v7084_v36 = vpop.permute.xlu0 %2738 }
 0x40f   : > { %7807 = vst [vmem:[#allocation38_spill] sm:$0xff] %v7082_v33  ;;  %7808 = vst [vmem:[#allocation39_spill] sm:$0xff] %v7084_v36  ;;  %v5782_v33 = vld [vmem:[#allocation2] sm:$0xff]  }
 0x410   : > { %2886 = vrot.lane.b32.xlu1 %v6925_v42, %s5941_s24  ;;  %2884 = vrot.lane.b32.xlu0 %v6913_v39, %s5941_s24 }
 0x412   : > { %v7090_v32 = vpop.permute.xlu1 %2744  ;;  %v7092_v35 = vpop.permute.xlu0 %2742 }
 0x413   : > { %7809 = vst [vmem:[#allocation40_spill] sm:$0xff] %v7090_v32  ;;  %7810 = vst [vmem:[#allocation41_spill] sm:$0xff] %v7092_v35 }
 0x414   : > { %2890 = vrot.lane.b32.xlu1 %v6933_v44, %s5941_s24  ;;  %2888 = vrot.lane.b32.xlu0 %v6921_v41, %s5941_s24 }
 0x416   : > { %v7098_v37 = vpop.permute.xlu1 %2748  ;;  %v7100_v36 = vpop.permute.xlu0 %2746 }
 0x417   : > { %7811 = vst [vmem:[#allocation42_spill] sm:$0xff] %v7098_v37  ;;  %7812 = vst [vmem:[#allocation43_spill] sm:$0xff] %v7100_v36 }
 0x418   : > { %2894 = vrot.lane.b32.xlu1 %v5791_v40, %s5941_s24  ;;  %2892 = vrot.lane.b32.xlu0 %v6929_v43, %s5941_s24 }
 0x41a   : > { %v7105_v39 = vpop.permute.xlu1 %2752  ;;  %v7107_v42 = vpop.permute.xlu0 %2750 }
 0x41b   : > { %7813 = vst [vmem:[#allocation44_spill] sm:$0xff] %v7105_v39  ;;  %7814 = vst [vmem:[#allocation45_spill] sm:$0xff] %v7107_v42 }
 0x41e   : > { %v7109_v35 = vpop.permute.xlu1 %2756  ;;  %v7111_v44 = vpop.permute.xlu0 %2754 }
 0x41f   : > { %7815 = vst [vmem:[#allocation46_spill] sm:$0xff] %v7109_v35  ;;  %7816 = vst [vmem:[#allocation47_spill] sm:$0xff] %v7111_v44  ;;  %v2902_v35 = vsel %vm2896_vm6, %v6749_v0, %v6968_v49 }
 0x422   : > { %v7113_v32 = vpop.permute.xlu1 %2760  ;;  %v7115_v41 = vpop.permute.xlu0 %2758 }
 0x423   : > { %7817 = vst [vmem:[#allocation48_spill] sm:$0xff] %v7113_v32  ;;  %7818 = vst [vmem:[#allocation49_spill] sm:$0xff] %v7115_v41  ;;  %v2899_v32 = vsel %vm2896_vm6, %v5782_v33, %v6960_v47  ;;  %v2905_v33 = vsel %vm2896_vm6, %v6757_v56, %v6958_v46 }
 0x426   : > { %v7117_v37 = vpop.permute.xlu1 %2764  ;;  %v7119_v36 = vpop.permute.xlu0 %2762 }
 0x427   : > { %7819 = vst [vmem:[#allocation50_spill] sm:$0xff] %v7117_v37  ;;  %7820 = vst [vmem:[#allocation51_spill] sm:$0xff] %v7119_v36 }
 0x42a   : > { %v7121_v40 = vpop.permute.xlu1 %2768  ;;  %v7123_v43 = vpop.permute.xlu0 %2766 }
 0x42b   : > { %7821 = vst [vmem:[#allocation52_spill] sm:$0xff] %v7121_v40  ;;  %7822 = vst [vmem:[#allocation53_spill] sm:$0xff] %v7123_v43 }
 0x42e   : > { %v2803_v44 = vpop.permute.xlu1 %2802  ;;  %v2801_v41 = vpop.permute.xlu0 %2800 }
 0x42f   : > { %v3045_v37 = vsel %vm3041_vm7, %v2902_v35, %v2803_v44  ;;  %v3043_v40 = vsel %vm3041_vm7, %v2899_v32, %v2801_v41 }
 0x430   : > { %v4941_v36 = vcombine.low %v3045_v37, %v3045_v37  ;;  %v4942_v42 = vcombine.high %v3045_v37, %v3045_v37  ;;  %v4939_v39 = vcombine.low %v3043_v40, %v3043_v40  ;;  %v4940_v43 = vcombine.high %v3043_v40, %v3043_v40 }
 0x431   : > { %v2920_v40 = vsel %vm2896_vm6, %v6773_v4, %v6981_v53 }
 0x432   : > { %3477 = vst.msk [vmem:[#allocation3 + $0x8] sm:$0xf] %vm3474_vm8, %v4941_v36  ;;  %3478 = vst.msk [vmem:[#allocation3 + $0xc] sm:$0xf] %vm3474_vm8, %v4942_v42  ;;  %v2807_v0 = vpop.permute.xlu1 %2806  ;;  %v2805_v41 = vpop.permute.xlu0 %2804  ;;  %v2914_v42 = vsel %vm2896_vm6, %v6765_v2, %v6974_v51 }
 0x433   : > { %3475 = vst.msk [vmem:[#allocation3] sm:$0xf] %vm3474_vm8, %v4939_v39  ;;  %3476 = vst.msk [vmem:[#allocation3 + $0x4] sm:$0xf] %vm3474_vm8, %v4940_v43  ;;  %v3049_v37 = vsel %vm3041_vm7, %v2908_v34, %v2807_v0  ;;  %v3047_v63 = vsel %vm3041_vm7, %v2905_v33, %v2805_v41  ;;  %v2911_v34 = vsel %vm2896_vm6, %v6753_v1, %v6976_v52  ;;  %v5784_v43 = vld [vmem:[#allocation2 + $0x50] sm:$0xff]  }
 0x434   : > { %v4945_v44 = vcombine.low %v3049_v37, %v3049_v37  ;;  %v4946_v47 = vcombine.high %v3049_v37, %v3049_v37  ;;  %v4943_v48 = vcombine.low %v3047_v63, %v3047_v63  ;;  %v4944_v36 = vcombine.high %v3047_v63, %v3047_v63 }
 0x435   : > { %v2917_v52 = vsel %vm2896_vm6, %v6761_v62, %v6983_v54  ;;  %v2923_v54 = vsel %vm2896_vm6, %v5784_v43, %v6991_v57 }
 0x436   : > { %3481 = vst.msk [vmem:[#allocation3 + $0x18] sm:$0xf] %vm3474_vm8, %v4945_v44  ;;  %3482 = vst.msk [vmem:[#allocation3 + $0x1c] sm:$0xf] %vm3474_vm8, %v4946_v47  ;;  %v2811_v56 = vpop.permute.xlu1 %2810  ;;  %v2809_v46 = vpop.permute.xlu0 %2808  ;;  %v2926_v47 = vsel %vm2896_vm6, %v6781_v6, %v6989_v55 }
 0x437   : > { %3479 = vst.msk [vmem:[#allocation3 + $0x10] sm:$0xf] %vm3474_vm8, %v4943_v48  ;;  %3480 = vst.msk [vmem:[#allocation3 + $0x14] sm:$0xf] %vm3474_vm8, %v4944_v36  ;;  %v3053_v39 = vsel %vm3041_vm7, %v2914_v42, %v2811_v56  ;;  %v3051_v2 = vsel %vm3041_vm7, %v2911_v34, %v2809_v46  ;;  %v2932_v34 = vsel %vm2896_vm6, %v6789_v8, %v6997_v58 }
 0x438   : > { %v4949_v49 = vcombine.low %v3053_v39, %v3053_v39  ;;  %v4950_v32 = vcombine.high %v3053_v39, %v3053_v39  ;;  %v4947_v51 = vcombine.low %v3051_v2, %v3051_v2  ;;  %v4948_v35 = vcombine.high %v3051_v2, %v3051_v2 }
 0x439   : > { %v2929_v39 = vsel %vm2896_vm6, %v6777_v5, %v6999_v59  ;;  %v2935_v59 = vsel %vm2896_vm6, %v6785_v7, %v7007_v3  ;;  %v2941_v3 = vsel %vm2896_vm6, %v6793_v9, %v7014_v45 }
 0x43a   : > { %3485 = vst.msk [vmem:[#allocation3 + $0x28] sm:$0xf] %vm3474_vm8, %v4949_v49  ;;  %3486 = vst.msk [vmem:[#allocation3 + $0x2c] sm:$0xf] %vm3474_vm8, %v4950_v32  ;;  %v2815_v1 = vpop.permute.xlu1 %2814  ;;  %v2813_v33 = vpop.permute.xlu0 %2812 }
 0x43b   : > { %3483 = vst.msk [vmem:[#allocation3 + $0x20] sm:$0xf] %vm3474_vm8, %v4947_v51  ;;  %3484 = vst.msk [vmem:[#allocation3 + $0x24] sm:$0xf] %vm3474_vm8, %v4948_v35  ;;  %v3057_v0 = vsel %vm3041_vm7, %v2920_v40, %v2815_v1  ;;  %v3055_v4 = vsel %vm3041_vm7, %v2917_v52, %v2813_v33  ;;  %v2938_v35 = vsel %vm2896_vm6, %v6797_v10, %v7005_v61 }
 0x43c   : > { %v4953_v37 = vcombine.low %v3057_v0, %v3057_v0  ;;  %v4954_v41 = vcombine.high %v3057_v0, %v3057_v0  ;;  %v4951_v53 = vcombine.low %v3055_v4, %v3055_v4  ;;  %v4952_v44 = vcombine.high %v3055_v4, %v3055_v4 }
 0x43d   : > { %v2944_v33 = vsel %vm2896_vm6, %v6805_v12, %v7012_v11 }
 0x43e   : > { %3489 = vst.msk [vmem:[#allocation3 + $0x38] sm:$0xf] %vm3474_vm8, %v4953_v37  ;;  %3490 = vst.msk [vmem:[#allocation3 + $0x3c] sm:$0xf] %vm3474_vm8, %v4954_v41  ;;  %v2819_v62 = vpop.permute.xlu1 %2818  ;;  %v2817_v48 = vpop.permute.xlu0 %2816  ;;  %v5786_v37 = vld [vmem:[#allocation2 + $0xa0] sm:$0xff]  }
 0x43f   : > { %3487 = vst.msk [vmem:[#allocation3 + $0x30] sm:$0xf] %vm3474_vm8, %v4951_v53  ;;  %3488 = vst.msk [vmem:[#allocation3 + $0x34] sm:$0xf] %vm3474_vm8, %v4952_v44  ;;  %v3061_v63 = vsel %vm3041_vm7, %v2926_v47, %v2819_v62  ;;  %v3059_v56 = vsel %vm3041_vm7, %v2923_v54, %v2817_v48  ;;  %v2950_v62 = vsel %vm2896_vm6, %v6813_v14, %v7020_v50 }
 0x440   : > { %v4957_v36 = vcombine.low %v3061_v63, %v3061_v63  ;;  %v4958_v42 = vcombine.high %v3061_v63, %v3061_v63  ;;  %v4955_v6 = vcombine.low %v3059_v56, %v3059_v56  ;;  %v4956_v55 = vcombine.high %v3059_v56, %v3059_v56 }
 0x441   : > { %v2947_v45 = vsel %vm2896_vm6, %v5786_v37, %v7022_v38  ;;  %v2956_v56 = vsel %vm2896_vm6, %v6821_v16, %v7028_v19 }
 0x442   : > { %3493 = vst.msk [vmem:[#allocation3 + $0x48] sm:$0xf] %vm3474_vm8, %v4957_v36  ;;  %3494 = vst.msk [vmem:[#allocation3 + $0x4c] sm:$0xf] %vm3474_vm8, %v4958_v42  ;;  %v2823_v57 = vpop.permute.xlu1 %2822  ;;  %v2821_v49 = vpop.permute.xlu0 %2820 }
 0x443   : > { %3491 = vst.msk [vmem:[#allocation3 + $0x40] sm:$0xf] %vm3474_vm8, %v4955_v6  ;;  %3492 = vst.msk [vmem:[#allocation3 + $0x44] sm:$0xf] %vm3474_vm8, %v4956_v55  ;;  %v3065_v46 = vsel %vm3041_vm7, %v2932_v34, %v2823_v57  ;;  %v3063_v8 = vsel %vm3041_vm7, %v2929_v39, %v2821_v49  ;;  %v2953_v6 = vsel %vm2896_vm6, %v6809_v13, %v7030_v60 }
 0x444   : > { %v4961_v32 = vcombine.low %v3065_v46, %v3065_v46  ;;  %v4962_v2 = vcombine.high %v3065_v46, %v3065_v46  ;;  %v4959_v58 = vcombine.low %v3063_v8, %v3063_v8  ;;  %v4960_v51 = vcombine.high %v3063_v8, %v3063_v8 }
 0x445   : > { %v2962_v49 = vsel %vm2896_vm6, %v6829_v18, %v7036_v25  ;;  %v2959_v60 = vsel %vm2896_vm6, %v6817_v15, %v7038_v23  ;;  %v2965_v23 = vsel %vm2896_vm6, %v6825_v17, %v7045_v26  ;;  %v7823_v26 = vld [vmem:[#allocation36_spill] sm:$0xff] }
 0x446   : > { %3497 = vst.msk [vmem:[#allocation3 + $0x58] sm:$0xf] %vm3474_vm8, %v4961_v32  ;;  %3498 = vst.msk [vmem:[#allocation3 + $0x5c] sm:$0xf] %vm3474_vm8, %v4962_v2  ;;  %v2827_v5 = vpop.permute.xlu1 %2826  ;;  %v2825_v1 = vpop.permute.xlu0 %2824 }
 0x447   : > { %3495 = vst.msk [vmem:[#allocation3 + $0x50] sm:$0xf] %vm3474_vm8, %v4959_v58  ;;  %3496 = vst.msk [vmem:[#allocation3 + $0x54] sm:$0xf] %vm3474_vm8, %v4960_v51  ;;  %v3069_v40 = vsel %vm3041_vm7, %v2938_v35, %v2827_v5  ;;  %v3067_v10 = vsel %vm3041_vm7, %v2935_v59, %v2825_v1  ;;  %v2968_v35 = vsel %vm2896_vm6, %v6837_v20, %v7043_v22  ;;  %v5788_v5 = vld [vmem:[#allocation2 + $0xf0] sm:$0xff]  }
 0x448   : > { %v4965_v52 = vcombine.low %v3069_v40, %v3069_v40  ;;  %v4966_v43 = vcombine.high %v3069_v40, %v3069_v40  ;;  %v4963_v61 = vcombine.low %v3067_v10, %v3067_v10  ;;  %v4964_v0 = vcombine.high %v3067_v10, %v3067_v10 }
 0x449   : > { %v2974_v10 = vsel %vm2896_vm6, %v6845_v21, %v7051_v24 }
 0x44a   : > { %3501 = vst.msk [vmem:[#allocation3 + $0x68] sm:$0xf] %vm3474_vm8, %v4965_v52  ;;  %3502 = vst.msk [vmem:[#allocation3 + $0x6c] sm:$0xf] %vm3474_vm8, %v4966_v43  ;;  %v2831_v7 = vpop.permute.xlu1 %2830  ;;  %v2829_v4 = vpop.permute.xlu0 %2828 }
 0x44b   : > { %3499 = vst.msk [vmem:[#allocation3 + $0x60] sm:$0xf] %vm3474_vm8, %v4963_v61  ;;  %3500 = vst.msk [vmem:[#allocation3 + $0x64] sm:$0xf] %vm3474_vm8, %v4964_v0  ;;  %v3073_v41 = vsel %vm3041_vm7, %v2944_v33, %v2831_v7  ;;  %v3071_v12 = vsel %vm3041_vm7, %v2941_v3, %v2829_v4  ;;  %v2971_v61 = vsel %vm2896_vm6, %v5788_v5, %v7823_v26  ;;  %v7836_v26 = vld [vmem:[#allocation41_spill] sm:$0xff] }
 0x44c   : > { %v4969_v53 = vcombine.low %v3073_v41, %v3073_v41  ;;  %v4970_v44 = vcombine.high %v3073_v41, %v3073_v41  ;;  %v4967_v11 = vcombine.low %v3071_v12, %v3071_v12  ;;  %v4968_v47 = vcombine.high %v3071_v12, %v3071_v12  ;;  %v7824_v41 = vld [vmem:[#allocation18_spill] sm:$0xff] }
 0x44d   : > { %v2980_v4 = vsel %vm2896_vm6, %v7824_v41, %v7059_v27 }
 0x44e   : > { %3505 = vst.msk [vmem:[#allocation3 + $0x78] sm:$0xf] %vm3474_vm8, %v4969_v53  ;;  %3506 = vst.msk [vmem:[#allocation3 + $0x7c] sm:$0xf] %vm3474_vm8, %v4970_v44  ;;  %v2835_v9 = vpop.permute.xlu1 %2834  ;;  %v2833_v63 = vpop.permute.xlu0 %2832  ;;  %v7825_v44 = vld [vmem:[#allocation16_spill] sm:$0xff] }
 0x44f   : > { %3503 = vst.msk [vmem:[#allocation3 + $0x70] sm:$0xf] %vm3474_vm8, %v4967_v11  ;;  %3504 = vst.msk [vmem:[#allocation3 + $0x74] sm:$0xf] %vm3474_vm8, %v4968_v47  ;;  %v3077_v54 = vsel %vm3041_vm7, %v2950_v62, %v2835_v9  ;;  %v3075_v42 = vsel %vm3041_vm7, %v2947_v45, %v2833_v63  ;;  %v2977_v12 = vsel %vm2896_vm6, %v7825_v44, %v7061_v30  ;;  %v7826_v63 = vld [vmem:[#allocation20_spill] sm:$0xff] }
 0x450   : > { %v4973_v48 = vcombine.low %v3077_v54, %v3077_v54  ;;  %v4974_v36 = vcombine.high %v3077_v54, %v3077_v54  ;;  %v4971_v14 = vcombine.low %v3075_v42, %v3075_v42  ;;  %v4972_v50 = vcombine.high %v3075_v42, %v3075_v42 }
 0x452   : > { %3509 = vst.msk [vmem:[#allocation3 + $0x88] sm:$0xf] %vm3474_vm8, %v4973_v48  ;;  %3510 = vst.msk [vmem:[#allocation3 + $0x8c] sm:$0xf] %vm3474_vm8, %v4974_v36  ;;  %v2839_v38 = vpop.permute.xlu1 %2838  ;;  %v2837_v34 = vpop.permute.xlu0 %2836  ;;  %v2986_v48 = vsel %vm2896_vm6, %v7826_v63, %v7067_v29  ;;  %v7827_v36 = vld [vmem:[#allocation17_spill] sm:$0xff] }
 0x453   : > { %3507 = vst.msk [vmem:[#allocation3 + $0x80] sm:$0xf] %vm3474_vm8, %v4971_v14  ;;  %3508 = vst.msk [vmem:[#allocation3 + $0x84] sm:$0xf] %vm3474_vm8, %v4972_v50  ;;  %v3081_v55 = vsel %vm3041_vm7, %v2956_v56, %v2839_v38  ;;  %v3079_v16 = vsel %vm3041_vm7, %v2953_v6, %v2837_v34  ;;  %v2983_v42 = vsel %vm2896_vm6, %v7827_v36, %v7069_v28  ;;  %v7828_v34 = vld [vmem:[#allocation21_spill] sm:$0xff]  ;;  %v7842_v36 = vld [vmem:[#allocation44_spill] sm:$0xff] }
 0x454   : > { %v4977_v57 = vcombine.low %v3081_v55, %v3081_v55  ;;  %v4978_v39 = vcombine.high %v3081_v55, %v3081_v55  ;;  %v4975_v19 = vcombine.low %v3079_v16, %v3079_v16  ;;  %v4976_v46 = vcombine.high %v3079_v16, %v3079_v16  ;;  %v7830_v16 = vld [vmem:[#allocation19_spill] sm:$0xff] }
 0x456   : > { %3513 = vst.msk [vmem:[#allocation3 + $0x98] sm:$0xf] %vm3474_vm8, %v4977_v57  ;;  %3514 = vst.msk [vmem:[#allocation3 + $0x9c] sm:$0xf] %vm3474_vm8, %v4978_v39  ;;  %v2843_v13 = vpop.permute.xlu1 %2842  ;;  %v2841_v2 = vpop.permute.xlu0 %2840  ;;  %v2992_v57 = vsel %vm2896_vm6, %v7828_v34, %v7074_v31  ;;  %v7829_v39 = vld [vmem:[#allocation37_spill] sm:$0xff] }
 0x457   : > { %3511 = vst.msk [vmem:[#allocation3 + $0x90] sm:$0xf] %vm3474_vm8, %v4975_v19  ;;  %3512 = vst.msk [vmem:[#allocation3 + $0x94] sm:$0xf] %vm3474_vm8, %v4976_v46  ;;  %v3085_v32 = vsel %vm3041_vm7, %v2962_v49, %v2843_v13  ;;  %v3083_v18 = vsel %vm3041_vm7, %v2959_v60, %v2841_v2  ;;  %v2989_v19 = vsel %vm2896_vm6, %v7830_v16, %v7829_v39  ;;  %v5790_v46 = vld [vmem:[#allocation2 + $0x140] sm:$0xff]  }
 0x458   : > { %v4981_v8 = vcombine.low %v3085_v32, %v3085_v32  ;;  %v4982_v58 = vcombine.high %v3085_v32, %v3085_v32  ;;  %v4979_v25 = vcombine.low %v3083_v18, %v3083_v18  ;;  %v4980_v51 = vcombine.high %v3083_v18, %v3083_v18  ;;  %v7832_v18 = vld [vmem:[#allocation23_spill] sm:$0xff] }
 0x45a   : > { %3517 = vst.msk [vmem:[#allocation3 + $0xa8] sm:$0xf] %vm3474_vm8, %v4981_v8  ;;  %3518 = vst.msk [vmem:[#allocation3 + $0xac] sm:$0xf] %vm3474_vm8, %v4982_v58  ;;  %v2847_v15 = vpop.permute.xlu1 %2846  ;;  %v2845_v40 = vpop.permute.xlu0 %2844  ;;  %v7831_v58 = vld [vmem:[#allocation38_spill] sm:$0xff] }
 0x45b   : > { %3515 = vst.msk [vmem:[#allocation3 + $0xa0] sm:$0xf] %vm3474_vm8, %v4979_v25  ;;  %3516 = vst.msk [vmem:[#allocation3 + $0xa4] sm:$0xf] %vm3474_vm8, %v4980_v51  ;;  %v3089_v59 = vsel %vm3041_vm7, %v2968_v35, %v2847_v15  ;;  %v3087_v20 = vsel %vm3041_vm7, %v2965_v23, %v2845_v40  ;;  %v2998_v25 = vsel %vm2896_vm6, %v7832_v18, %v7831_v58  ;;  %v7833_v35 = vld [vmem:[#allocation39_spill] sm:$0xff] }
 0x45c   : > { %v4985_v1 = vcombine.low %v3089_v59, %v3089_v59  ;;  %v4986_v52 = vcombine.high %v3089_v59, %v3089_v59  ;;  %v4983_v22 = vcombine.low %v3087_v20, %v3087_v20  ;;  %v4984_v43 = vcombine.high %v3087_v20, %v3087_v20 }
 0x45d   : > { %v2995_v15 = vsel %vm2896_vm6, %v5790_v46, %v7833_v35  ;;  %v7846_v46 = vld [vmem:[#allocation46_spill] sm:$0xff] }
 0x45e   : > { %3521 = vst.msk [vmem:[#allocation3 + $0xb8] sm:$0xf] %vm3474_vm8, %v4985_v1  ;;  %3522 = vst.msk [vmem:[#allocation3 + $0xbc] sm:$0xf] %vm3474_vm8, %v4986_v52  ;;  %v2851_v17 = vpop.permute.xlu1 %2850  ;;  %v2849_v33 = vpop.permute.xlu0 %2848 }
 0x45f   : > { %3519 = vst.msk [vmem:[#allocation3 + $0xb0] sm:$0xf] %vm3474_vm8, %v4983_v22  ;;  %3520 = vst.msk [vmem:[#allocation3 + $0xb4] sm:$0xf] %vm3474_vm8, %v4984_v43  ;;  %v3093_v0 = vsel %vm3041_vm7, %v2974_v10, %v2851_v17  ;;  %v3091_v37 = vsel %vm3041_vm7, %v2971_v61, %v2849_v33  ;;  %v7834_v22 = vld [vmem:[#allocation40_spill] sm:$0xff]  ;;  %v7835_v43 = vld [vmem:[#allocation25_spill] sm:$0xff] }
 0x460   : > { %v4989_v7 = vcombine.low %v3093_v0, %v3093_v0  ;;  %v4990_v3 = vcombine.high %v3093_v0, %v3093_v0  ;;  %v4987_v21 = vcombine.low %v3091_v37, %v3091_v37  ;;  %v4988_v24 = vcombine.high %v3091_v37, %v3091_v37  ;;  %v7837_v61 = vld [vmem:[#allocation22_spill] sm:$0xff] }
 0x461   : > { %v3004_v10 = vsel %vm2896_vm6, %v7835_v43, %v7834_v22  ;;  %v3001_v0 = vsel %vm2896_vm6, %v7837_v61, %v7836_v26 }
 0x462   : > { %3525 = vst.msk [vmem:[#allocation3 + $0xc8] sm:$0xf] %vm3474_vm8, %v4989_v7  ;;  %3526 = vst.msk [vmem:[#allocation3 + $0xcc] sm:$0xf] %vm3474_vm8, %v4990_v3  ;;  %v2855_v53 = vpop.permute.xlu1 %2854  ;;  %v2853_v47 = vpop.permute.xlu0 %2852 }
 0x463   : > { %3523 = vst.msk [vmem:[#allocation3 + $0xc0] sm:$0xf] %vm3474_vm8, %v4987_v21  ;;  %3524 = vst.msk [vmem:[#allocation3 + $0xc4] sm:$0xf] %vm3474_vm8, %v4988_v24  ;;  %v3097_v11 = vsel %vm3041_vm7, %v2980_v4, %v2855_v53  ;;  %v3095_v27 = vsel %vm3041_vm7, %v2977_v12, %v2853_v47  ;;  %v7838_v4 = vld [vmem:[#allocation42_spill] sm:$0xff]  ;;  %v7839_v53 = vld [vmem:[#allocation27_spill] sm:$0xff] }
 0x464   : > { %v4993_v62 = vcombine.low %v3097_v11, %v3097_v11  ;;  %v4994_v9 = vcombine.high %v3097_v11, %v3097_v11  ;;  %v4991_v45 = vcombine.low %v3095_v27, %v3095_v27  ;;  %v4992_v54 = vcombine.high %v3095_v27, %v3095_v27  ;;  %v7840_v11 = vld [vmem:[#allocation43_spill] sm:$0xff]  ;;  %v7841_v47 = vld [vmem:[#allocation24_spill] sm:$0xff] }
 0x465   : > { %v3010_v44 = vsel %vm2896_vm6, %v7839_v53, %v7838_v4 }
 0x466   : > { %3529 = vst.msk [vmem:[#allocation3 + $0xd8] sm:$0xf] %vm3474_vm8, %v4993_v62  ;;  %3530 = vst.msk [vmem:[#allocation3 + $0xdc] sm:$0xf] %vm3474_vm8, %v4994_v9  ;;  %v2859_v30 = vpop.permute.xlu1 %2858  ;;  %v2857_v50 = vpop.permute.xlu0 %2856  ;;  %v3007_v62 = vsel %vm2896_vm6, %v7841_v47, %v7840_v11 }
 0x467   : > { %3527 = vst.msk [vmem:[#allocation3 + $0xd0] sm:$0xf] %vm3474_vm8, %v4991_v45  ;;  %3528 = vst.msk [vmem:[#allocation3 + $0xd4] sm:$0xf] %vm3474_vm8, %v4992_v54  ;;  %v3101_v14 = vsel %vm3041_vm7, %v2986_v48, %v2859_v30  ;;  %v3099_v29 = vsel %vm3041_vm7, %v2983_v42, %v2857_v50  ;;  %v7843_v42 = vld [vmem:[#allocation28_spill] sm:$0xff] }
 0x468   : > { %v4997_v56 = vcombine.low %v3101_v14, %v3101_v14  ;;  %v4998_v38 = vcombine.high %v3101_v14, %v3101_v14  ;;  %v4995_v6 = vcombine.low %v3099_v29, %v3099_v29  ;;  %v4996_v55 = vcombine.high %v3099_v29, %v3099_v29 }
 0x469   : > { %v3016_v14 = vsel %vm2896_vm6, %v7843_v42, %v7842_v36 }
 0x46a   : > { %3533 = vst.msk [vmem:[#allocation3 + $0xe8] sm:$0xf] %vm3474_vm8, %v4997_v56  ;;  %3534 = vst.msk [vmem:[#allocation3 + $0xec] sm:$0xf] %vm3474_vm8, %v4998_v38  ;;  %v2863_v28 = vpop.permute.xlu1 %2862  ;;  %v2861_v13 = vpop.permute.xlu0 %2860  ;;  %v7844_v56 = vld [vmem:[#allocation45_spill] sm:$0xff]  ;;  %v7845_v38 = vld [vmem:[#allocation26_spill] sm:$0xff] }
 0x46b   : > { %3531 = vst.msk [vmem:[#allocation3 + $0xe0] sm:$0xf] %vm3474_vm8, %v4995_v6  ;;  %3532 = vst.msk [vmem:[#allocation3 + $0xe4] sm:$0xf] %vm3474_vm8, %v4996_v55  ;;  %v3105_v49 = vsel %vm3041_vm7, %v2992_v57, %v2863_v28  ;;  %v3103_v31 = vsel %vm3041_vm7, %v2989_v19, %v2861_v13  ;;  %v3013_v29 = vsel %vm2896_vm6, %v7845_v38, %v7844_v56  ;;  %v5792_v6 = vld [vmem:[#allocation2 + $0x190] sm:$0xff]  }
 0x46c   : > { %v5001_v60 = vcombine.low %v3105_v49, %v3105_v49  ;;  %v5002_v32 = vcombine.high %v3105_v49, %v3105_v49  ;;  %v4999_v2 = vcombine.low %v3103_v31, %v3103_v31  ;;  %v5000_v8 = vcombine.high %v3103_v31, %v3103_v31  ;;  %v7847_v49 = vld [vmem:[#allocation30_spill] sm:$0xff] }
 0x46d   : > { %v3022_v13 = vsel %vm2896_vm6, %v7847_v49, %v7846_v46 }
 0x46e   : > { %3537 = vst.msk [vmem:[#allocation3 + $0xf8] sm:$0xf] %vm3474_vm8, %v5001_v60  ;;  %3538 = vst.msk [vmem:[#allocation3 + $0xfc] sm:$0xf] %vm3474_vm8, %v5002_v32  ;;  %v2867_v51 = vpop.permute.xlu1 %2866  ;;  %v2865_v5 = vpop.permute.xlu0 %2864  ;;  %v7848_v32 = vld [vmem:[#allocation47_spill] sm:$0xff] }
 0x46f   : > { %3535 = vst.msk [vmem:[#allocation3 + $0xf0] sm:$0xf] %vm3474_vm8, %v4999_v2  ;;  %3536 = vst.msk [vmem:[#allocation3 + $0xf4] sm:$0xf] %vm3474_vm8, %v5000_v8  ;;  %v3109_v23 = vsel %vm3041_vm7, %v2998_v25, %v2867_v51  ;;  %v3107_v1 = vsel %vm3041_vm7, %v2995_v15, %v2865_v5  ;;  %v3019_v31 = vsel %vm2896_vm6, %v5792_v6, %v7848_v32  ;;  %v7849_v15 = vld [vmem:[#allocation48_spill] sm:$0xff] }
 0x470   : > { %v5005_v59 = vcombine.low %v3109_v23, %v3109_v23  ;;  %v5006_v40 = vcombine.high %v3109_v23, %v3109_v23  ;;  %v5003_v52 = vcombine.low %v3107_v1, %v3107_v1  ;;  %v5004_v20 = vcombine.high %v3107_v1, %v3107_v1  ;;  %v7850_v23 = vld [vmem:[#allocation32_spill] sm:$0xff]  ;;  %v7852_v1 = vld [vmem:[#allocation29_spill] sm:$0xff] }
 0x471   : > { %v3028_v5 = vsel %vm2896_vm6, %v7850_v23, %v7849_v15 }
 0x472   : > { %3541 = vst.msk [vmem:[#allocation3 + $0x108] sm:$0xf] %vm3474_vm8, %v5005_v59  ;;  %3542 = vst.msk [vmem:[#allocation3 + $0x10c] sm:$0xf] %vm3474_vm8, %v5006_v40  ;;  %v2871_v17 = vpop.permute.xlu1 %2870  ;;  %v2869_v7 = vpop.permute.xlu0 %2868  ;;  %v7851_v40 = vld [vmem:[#allocation49_spill] sm:$0xff] }
 0x473   : > { %3539 = vst.msk [vmem:[#allocation3 + $0x100] sm:$0xf] %vm3474_vm8, %v5003_v52  ;;  %3540 = vst.msk [vmem:[#allocation3 + $0x104] sm:$0xf] %vm3474_vm8, %v5004_v20  ;;  %v3113_v33 = vsel %vm3041_vm7, %v3004_v10, %v2871_v17  ;;  %v3111_v21 = vsel %vm3041_vm7, %v3001_v0, %v2869_v7  ;;  %v3025_v52 = vsel %vm2896_vm6, %v7852_v1, %v7851_v40  ;;  %v7853_v0 = vld [vmem:[#allocation50_spill] sm:$0xff] }
 0x474   : > { %v5009_v3 = vcombine.low %v3113_v33, %v3113_v33  ;;  %v5010_v37 = vcombine.high %v3113_v33, %v3113_v33  ;;  %v5007_v24 = vcombine.low %v3111_v21, %v3111_v21  ;;  %v5008_v41 = vcombine.high %v3111_v21, %v3111_v21  ;;  %v7854_v33 = vld [vmem:[#allocation34_spill] sm:$0xff]  ;;  %v7856_v21 = vld [vmem:[#allocation31_spill] sm:$0xff] }
 0x475   : > { %v3034_v7 = vsel %vm2896_vm6, %v7854_v33, %v7853_v0 }
 0x476   : > { %3545 = vst.msk [vmem:[#allocation3 + $0x118] sm:$0xf] %vm3474_vm8, %v5009_v3  ;;  %3546 = vst.msk [vmem:[#allocation3 + $0x11c] sm:$0xf] %vm3474_vm8, %v5010_v37  ;;  %v2875_v12 = vpop.permute.xlu1 %2874  ;;  %v2873_v27 = vpop.permute.xlu0 %2872  ;;  %v7855_v37 = vld [vmem:[#allocation51_spill] sm:$0xff] }
 0x477   : > { %3543 = vst.msk [vmem:[#allocation3 + $0x110] sm:$0xf] %vm3474_vm8, %v5007_v24  ;;  %3544 = vst.msk [vmem:[#allocation3 + $0x114] sm:$0xf] %vm3474_vm8, %v5008_v41  ;;  %v3117_v9 = vsel %vm3041_vm7, %v3010_v44, %v2875_v12  ;;  %v3115_v63 = vsel %vm3041_vm7, %v3007_v62, %v2873_v27  ;;  %v3031_v24 = vsel %vm2896_vm6, %v7856_v21, %v7855_v37  ;;  %v7857_v62 = vld [vmem:[#allocation52_spill] sm:$0xff] }
 0x478   : > { %v5013_v45 = vcombine.low %v3117_v9, %v3117_v9  ;;  %v5014_v54 = vcombine.high %v3117_v9, %v3117_v9  ;;  %v5011_v48 = vcombine.low %v3115_v63, %v3115_v63  ;;  %v5012_v30 = vcombine.high %v3115_v63, %v3115_v63  ;;  %v7858_v9 = vld [vmem:[#allocation35_spill] sm:$0xff]  ;;  %v7860_v63 = vld [vmem:[#allocation33_spill] sm:$0xff] }
 0x479   : > { %v3040_v27 = vsel %vm2896_vm6, %v7858_v9, %v7857_v62 }
 0x47a   : > { %3549 = vst.msk [vmem:[#allocation3 + $0x128] sm:$0xf] %vm3474_vm8, %v5013_v45  ;;  %3550 = vst.msk [vmem:[#allocation3 + $0x12c] sm:$0xf] %vm3474_vm8, %v5014_v54  ;;  %v2879_v50 = vpop.permute.xlu1 %2878  ;;  %v2877_v34 = vpop.permute.xlu0 %2876  ;;  %v7859_v54 = vld [vmem:[#allocation53_spill] sm:$0xff] }
 0x47b   : > { %3547 = vst.msk [vmem:[#allocation3 + $0x120] sm:$0xf] %vm3474_vm8, %v5011_v48  ;;  %3548 = vst.msk [vmem:[#allocation3 + $0x124] sm:$0xf] %vm3474_vm8, %v5012_v30  ;;  %v3121_v55 = vsel %vm3041_vm7, %v3016_v14, %v2879_v50  ;;  %v3119_v39 = vsel %vm3041_vm7, %v3013_v29, %v2877_v34  ;;  %v3037_v48 = vsel %vm2896_vm6, %v7860_v63, %v7859_v54 }
 0x47c   : > { %v5017_v57 = vcombine.low %v3121_v55, %v3121_v55  ;;  %v5018_v28 = vcombine.high %v3121_v55, %v3121_v55  ;;  %v5015_v16 = vcombine.low %v3119_v39, %v3119_v39  ;;  %v5016_v19 = vcombine.high %v3119_v39, %v3119_v39 }
 0x47e   : > { %3553 = vst.msk [vmem:[#allocation3 + $0x138] sm:$0xf] %vm3474_vm8, %v5017_v57  ;;  %3554 = vst.msk [vmem:[#allocation3 + $0x13c] sm:$0xf] %vm3474_vm8, %v5018_v28  ;;  %v2883_v60 = vpop.permute.xlu1 %2882  ;;  %v2881_v8 = vpop.permute.xlu0 %2880 }
 0x47f   : > { %3551 = vst.msk [vmem:[#allocation3 + $0x130] sm:$0xf] %vm3474_vm8, %v5015_v16  ;;  %3552 = vst.msk [vmem:[#allocation3 + $0x134] sm:$0xf] %vm3474_vm8, %v5016_v19  ;;  %v3125_v2 = vsel %vm3041_vm7, %v3022_v13, %v2883_v60  ;;  %v3123_v25 = vsel %vm3041_vm7, %v3019_v31, %v2881_v8 }
 0x480   : > { %v5021_v58 = vcombine.low %v3125_v2, %v3125_v2  ;;  %v5022_v18 = vcombine.high %v3125_v2, %v3125_v2  ;;  %v5019_v51 = vcombine.low %v3123_v25, %v3123_v25  ;;  %v5020_v35 = vcombine.high %v3123_v25, %v3123_v25 }
 0x482   : > { %3557 = vst.msk [vmem:[#allocation3 + $0x148] sm:$0xf] %vm3474_vm8, %v5021_v58  ;;  %3558 = vst.msk [vmem:[#allocation3 + $0x14c] sm:$0xf] %vm3474_vm8, %v5022_v18  ;;  %v2887_v59 = vpop.permute.xlu1 %2886  ;;  %v2885_v22 = vpop.permute.xlu0 %2884 }
 0x483   : > { %3555 = vst.msk [vmem:[#allocation3 + $0x140] sm:$0xf] %vm3474_vm8, %v5019_v51  ;;  %3556 = vst.msk [vmem:[#allocation3 + $0x144] sm:$0xf] %vm3474_vm8, %v5020_v35  ;;  %v3129_v20 = vsel %vm3041_vm7, %v3028_v5, %v2887_v59  ;;  %v3127_v17 = vsel %vm3041_vm7, %v3025_v52, %v2885_v22 }
 0x484   : > { %v5025_v43 = vcombine.low %v3129_v20, %v3129_v20  ;;  %v5026_v10 = vcombine.high %v3129_v20, %v3129_v20  ;;  %v5023_v26 = vcombine.low %v3127_v17, %v3127_v17  ;;  %v5024_v61 = vcombine.high %v3127_v17, %v3127_v17 }
 0x486   : > { %3561 = vst.msk [vmem:[#allocation3 + $0x158] sm:$0xf] %vm3474_vm8, %v5025_v43  ;;  %3562 = vst.msk [vmem:[#allocation3 + $0x15c] sm:$0xf] %vm3474_vm8, %v5026_v10  ;;  %v2891_v3 = vpop.permute.xlu1 %2890  ;;  %v2889_v4 = vpop.permute.xlu0 %2888 }
 0x487   : > { %3559 = vst.msk [vmem:[#allocation3 + $0x150] sm:$0xf] %vm3474_vm8, %v5023_v26  ;;  %3560 = vst.msk [vmem:[#allocation3 + $0x154] sm:$0xf] %vm3474_vm8, %v5024_v61  ;;  %v3133_v41 = vsel %vm3041_vm7, %v3034_v7, %v2891_v3  ;;  %v3131_v12 = vsel %vm3041_vm7, %v3031_v24, %v2889_v4 }
 0x488   : > { %v5029_v53 = vcombine.low %v3133_v41, %v3133_v41  ;;  %v5030_v44 = vcombine.high %v3133_v41, %v3133_v41  ;;  %v5027_v11 = vcombine.low %v3131_v12, %v3131_v12  ;;  %v5028_v47 = vcombine.high %v3131_v12, %v3131_v12 }
 0x48a   : > { %3565 = vst.msk [vmem:[#allocation3 + $0x168] sm:$0xf] %vm3474_vm8, %v5029_v53  ;;  %3566 = vst.msk [vmem:[#allocation3 + $0x16c] sm:$0xf] %vm3474_vm8, %v5030_v44  ;;  %v2895_v45 = vpop.permute.xlu1 %2894  ;;  %v2893_v36 = vpop.permute.xlu0 %2892 }
 0x48b   : > { %3563 = vst.msk [vmem:[#allocation3 + $0x160] sm:$0xf] %vm3474_vm8, %v5027_v11  ;;  %3564 = vst.msk [vmem:[#allocation3 + $0x164] sm:$0xf] %vm3474_vm8, %v5028_v47  ;;  %v3137_v30 = vsel %vm3041_vm7, %v3040_v27, %v2895_v45  ;;  %v3135_v50 = vsel %vm3041_vm7, %v3037_v48, %v2893_v36 }
 0x48c   : > { %v5033_v42 = vcombine.low %v3137_v30, %v3137_v30  ;;  %v5034_v14 = vcombine.high %v3137_v30, %v3137_v30  ;;  %v5031_v56 = vcombine.low %v3135_v50, %v3135_v50  ;;  %v5032_v38 = vcombine.high %v3135_v50, %v3135_v50 }
 0x48e   : > { %3569 = vst.msk [vmem:[#allocation3 + $0x178] sm:$0xf] %vm3474_vm8, %v5033_v42  ;;  %3570 = vst.msk [vmem:[#allocation3 + $0x17c] sm:$0xf] %vm3474_vm8, %v5034_v14 }
 0x48f   : > { %3567 = vst.msk [vmem:[#allocation3 + $0x170] sm:$0xf] %vm3474_vm8, %v5031_v56  ;;  %3568 = vst.msk [vmem:[#allocation3 + $0x174] sm:$0xf] %vm3474_vm8, %v5032_v38 }
 0x490 LB: >> { %v5793_v29 = vld [vmem:[%s7734_s5 + $0x58] sm:$0xff]   ;;  %v5794_v6 = vld [vmem:[%s7734_s5 + $0x28] sm:$0xff]   ;;  %v5795_v55 = vld [vmem:[%s7734_s5 + $0x50] sm:$0xff]   ;;  %s5229_s24 = sshll.u32 %s5937_s25, 6  ;;  %vm3717_vm9 = vcmask 785408   ;;  %vm4355_vm10 = vcmask 1045504   ;;  %s5937_s25 = sphi %s7407_s25, %s3576_s25  }
 0x491   : >> { %5443 = vmatprep.subr.bf16.mxu0 %v5793_v29  ;;  %5471 = vmatprep.subr.bf16.mxu1 %v5794_v6  ;;  %v5796_v34 = vld [vmem:[%s7734_s5 + $0x20] sm:$0xff]   ;;  %v5797_v57 = vld [vmem:[%s7734_s5 + $0x48] sm:$0xff]   ;;  %v5798_v28 = vld [vmem:[%s7734_s5 + $0x18] sm:$0xff]   ;;  %s7445_s20 = scalar_lea.vmem [#allocation3], %s5229_s24  ;;  %vm4298_vm11 = vcmask 1046528   ;;  %s5943_s14 = smov 96  }
 0x492   : >> { %5444 = vmatpush3.bf16.msra.mxu0 %v5793_v29  ;;  %5472 = vmatpush3.bf16.msra.mxu1 %v5794_v6  ;;  %v5799_v39 = vld [vmem:[%s7734_s5 + $0x40] sm:$0xff]   ;;  %v5800_v16 = vld [vmem:[%s7734_s5 + $0x10] sm:$0xff]   ;;  %v5801_v19 = vld [vmem:[%s7734_s5 + $0x38] sm:$0xff]   ;;  %s5230_s28 = sshll.u32 %s5937_s25, 5  ;;  %s3576_s25 = sadd.s32 1, %s5937_s25  }
 0x493   : >> { %5445 = vmatprep.subr.bf16.mxu0 %v5795_v55  ;;  %5473 = vmatprep.subr.bf16.mxu1 %v5796_v34  ;;  %v5802_v46 = vld [vmem:[%s7734_s5 + $0x8] sm:$0xff]   ;;  %v5803_v60 = vld [vmem:[%s7734_s5 + $0x30] sm:$0xff]   ;;  %v5804_v32 = vld [vmem:[%s7734_s5] sm:$0xff]   ;;  %s4445_s19 = scalar_lea.vmem %s6383_s16, %s5230_s28  ;;  %p3573_p6 = scmp.ge.s32.totalorder %s3576_s25, 4  }
 0x494   : >> { %v5809_v31 = vld [vmem:[%s7734_s5 + $0x88] sm:$0xff]   ;;  %v5810_v58 = vld [vmem:[%s7734_s5 + $0x80] sm:$0xff]   ;;  %v5815_v51 = vld [vmem:[%s7734_s5 + $0x78] sm:$0xff]   ;;  %s4601_s30 = sshll.u32 (%p3573_p6), %s442_s17, 4  ;;  %s7861_s16 = sand.u32 (%p3573_p6), 1, %s5909_s10   ;;  %s7669_s30 = int_to_ptr.vmem [resolvable:$true] %s4601_s30 }
 0x495   : >> { %v5820_v59 = vld [vmem:[%s7734_s5 + $0x70] sm:$0xff]   ;;  %v5821_v40 = vld [vmem:[%s7734_s5 + $0x68] sm:$0xff]   ;;  %v5826_v43 = vld [vmem:[%s7734_s5 + $0x60] sm:$0xff]   ;;  %s7678_s29 = scalar_lea.sflag (%p3573_p6), [#allocation5], %s7861_s16  ;;  %s5837_s28 = scalar_lea.vmem (%p3573_p6), %s7669_s30, 4096 }
 0x496   : >> { %5446 = vmatpush3.bf16.msra.mxu0 %v5795_v55  ;;  %5474 = vmatpush3.bf16.msra.mxu1 %v5796_v34  ;;  %v5805_v49 = vld [vmem:[%s7445_s20 + $0x40] sm:$0xff]   ;;  %v5807_v2 = vld [vmem:[%s7445_s20 + $0x48] sm:$0xff]   ;;  %v5811_v18 = vld [vmem:[%s7445_s20 + $0x50] sm:$0xff]   ;;  %p5838_p7 = scmp.ne.s32.totalorder (%p3573_p6), %s7669_s30, %s5837_s28 }
 0x497   : >> { %5447 = vmatprep.subr.bf16.mxu0 %v5797_v57  ;;  %5475 = vmatprep.subr.bf16.mxu1 %v5798_v28  ;;  %v5806_v13 = vld [vmem:[%s7445_s20] sm:$0xff]   ;;  %v5808_v8 = vld [vmem:[%s7445_s20 + $0x8] sm:$0xff]   ;;  %v5812_v25 = vld [vmem:[%s7445_s20 + $0x10] sm:$0xff]  }
 0x498   : >> { %5455 = vmatprep.mubr.msk.bf16.mxu0 %vm3717_vm9, %v5805_v49  ;;  %5483 = vmatprep.mubr.msk.bf16.mxu1 %vm3717_vm9, %v5806_v13  ;;  %v5813_v35 = vld [vmem:[%s7445_s20 + $0x58] sm:$0xff]   ;;  %v5816_v23 = vld [vmem:[%s7445_s20 + $0x60] sm:$0xff]   ;;  %v5818_v1 = vld [vmem:[%s7445_s20 + $0x68] sm:$0xff]   ;;  %p5839_p9 = pnand (%p3573_p6), %p5838_p7, %p6048_p3 }
 0x499   : >> { %v5814_v15 = vld [vmem:[%s7445_s20 + $0x18] sm:$0xff]   ;;  %v5817_v5 = vld [vmem:[%s7445_s20 + $0x20] sm:$0xff]   ;;  %v5819_v52 = vld [vmem:[%s7445_s20 + $0x28] sm:$0xff]  }
 0x49a   : >> { %5448 = vmatpush3.bf16.msra.mxu0 %v5797_v57  ;;  %5476 = vmatpush3.bf16.msra.mxu1 %v5798_v28  ;;  %v5822_v20 = vld [vmem:[%s7445_s20 + $0x70] sm:$0xff]   ;;  %v5824_v10 = vld [vmem:[%s7445_s20 + $0x78] sm:$0xff]   ;;  %v5827_v26 = vld [vmem:[%s7445_s20 + $0x80] sm:$0xff]   ;;  %p5840_p10 = pneg (%p3573_p6), %p5839_p9 }
 0x49b   : >> { %5449 = vmatprep.subr.bf16.mxu0 %v5799_v39  ;;  %5477 = vmatprep.subr.bf16.mxu1 %v5800_v16  ;;  %v5823_v22 = vld [vmem:[%s7445_s20 + $0x30] sm:$0xff]   ;;  %v5825_v17 = vld [vmem:[%s7445_s20 + $0x38] sm:$0xff]   ;;  %v5829_v0 = vld [vmem:[%s7445_s20 + $0x88] sm:$0xff]  }
 0x49c   : >> { %v5828_v61 = vld [vmem:[%s7445_s20 + $0xb0] sm:$0xff]   ;;  %v5830_v33 = vld [vmem:[%s7445_s20 + $0xb8] sm:$0xff]   ;;  %v5833_v37 = vld [vmem:[%s7445_s20 + $0xa0] sm:$0xff]  }
 0x49d   : >> { %v5831_v7 = vld [vmem:[%s7445_s20 + $0x90] sm:$0xff]   ;;  %v5832_v3 = vld [vmem:[%s7445_s20 + $0x98] sm:$0xff]   ;;  %v5834_v21 = vld [vmem:[%s7445_s20 + $0xa8] sm:$0xff]   ;;  %s5942_s20 = smov 64  }
 0x49e   : >> { %5450 = vmatpush3.bf16.msra.mxu0 %v5799_v39  ;;  %5478 = vmatpush3.bf16.msra.mxu1 %v5800_v16 }
 0x49f   : >> { %5451 = vmatprep.subr.bf16.mxu0 %v5801_v19  ;;  %5479 = vmatprep.subr.bf16.mxu1 %v5802_v46 }
 0x4a2   : >> { %5452 = vmatpush3.bf16.msra.mxu0 %v5801_v19  ;;  %5480 = vmatpush3.bf16.msra.mxu1 %v5802_v46 }
 0x4a3   : >> { %5453 = vmatprep.subr.bf16.mxu0 %v5803_v60  ;;  %5481 = vmatprep.subr.bf16.mxu1 %v5804_v32 }
 0x4a6   : >> { %5454 = vmatpush3.bf16.msra.mxu0 %v5803_v60  ;;  %5482 = vmatpush3.bf16.msra.mxu1 %v5804_v32 }
 0x4a7   : >> { %5499 = vmatprep.subr.bf16.mxu0 %v5809_v31  ;;  %5587 = vmatprep.subr.bf16.mxu1 %v5809_v31 }
 0x4a9   : >> { %5456 = vmatmul.mubr.msk.bf16.vlgmr.msra.gmra.mxu0 %vm3717_vm9, %v5807_v2  ;;  %5484 = vmatmul.mubr.msk.bf16.vlgmr.msra.gmra.mxu1 %vm3717_vm9, %v5808_v8 }
 0x4aa   : >> { %5500 = vmatpush3.bf16.msra.mxu0 %v5809_v31  ;;  %5593 = vmatpush3.bf16.msra.mxu1 %v5809_v31 }
 0x4ab   : >> { %5501 = vmatprep.subr.bf16.mxu0 %v5810_v58  ;;  %5459 = vmatprep.mubr.msk.bf16.mxu0 %vm3717_vm9, %v5811_v18 }
 0x4ac   : >> { %5487 = vmatprep.mubr.msk.bf16.mxu1 %vm3717_vm9, %v5812_v25  ;;  %5588 = vmatprep.subr.bf16.mxu1 %v5810_v58 }
 0x4ae   : >> { %5502 = vmatpush3.bf16.msra.mxu0 %v5810_v58  ;;  %5594 = vmatpush3.bf16.msra.mxu1 %v5810_v58 }
 0x4af   : >> { %5503 = vmatprep.subr.bf16.mxu0 %v5815_v51  ;;  %5589 = vmatprep.subr.bf16.mxu1 %v5815_v51 }
 0x4b1   : >> { %5460 = vmatmul.mubr.msk.bf16.gmra.mxu0 %vm3717_vm9, %v5813_v35  ;;  %5488 = vmatmul.mubr.msk.bf16.gmra.mxu1 %vm3717_vm9, %v5814_v15 }
 0x4b2   : >> { %5504 = vmatpush3.bf16.msra.mxu0 %v5815_v51  ;;  %5463 = vmatprep.mubr.msk.bf16.mxu0 %vm3717_vm9, %v5816_v23 }
 0x4b3   : >> { %5491 = vmatprep.mubr.msk.bf16.mxu1 %vm3717_vm9, %v5817_v5  ;;  %5595 = vmatpush3.bf16.msra.mxu1 %v5815_v51 }
 0x4b4   : >> { %5505 = vmatprep.subr.bf16.mxu0 %v5820_v59  ;;  %5590 = vmatprep.subr.bf16.mxu1 %v5820_v59 }
 0x4b6   : >> { %5506 = vmatpush3.bf16.msra.mxu0 %v5820_v59 }
 0x4b7   : >> { %5507 = vmatprep.subr.bf16.mxu0 %v5821_v40  ;;  %5596 = vmatpush3.bf16.msra.mxu1 %v5820_v59 }
 0x4b8   : >> { %5591 = vmatprep.subr.bf16.mxu1 %v5821_v40 }
 0x4b9   : >> { %5464 = vmatmul.mubr.msk.bf16.gmra.mxu0 %vm3717_vm9, %v5818_v1  ;;  %5492 = vmatmul.mubr.msk.bf16.gmra.mxu1 %vm3717_vm9, %v5819_v52 }
 0x4ba   : >> { %5467 = vmatprep.mubr.msk.bf16.mxu0 %vm3717_vm9, %v5822_v20  ;;  %5495 = vmatprep.mubr.msk.bf16.mxu1 %vm3717_vm9, %v5823_v22 }
 0x4bb   : >> { %5508 = vmatpush3.bf16.msra.mxu0 %v5821_v40  ;;  %5597 = vmatpush3.bf16.msra.mxu1 %v5821_v40 }
 0x4bc   : >> { %5509 = vmatprep.subr.bf16.mxu0 %v5826_v43  ;;  %5592 = vmatprep.subr.bf16.mxu1 %v5826_v43 }
 0x4bf   : >> { %5510 = vmatpush3.bf16.msra.mxu0 %v5826_v43  ;;  %5598 = vmatpush3.bf16.msra.mxu1 %v5826_v43 }
 0x4c1   : >> { %5468 = vmatmul.mubr.msk.bf16.gmra.mxu0 %vm3717_vm9, %v5824_v10  ;;  %5496 = vmatmul.mubr.msk.bf16.gmra.mxu1 %vm3717_vm9, %v5825_v17 }
 0x4c2   : >> { %5511 = vmatprep.mubr.msk.bf16.mxu0 %vm3717_vm9, %v5827_v26  ;;  %5523 = vmatprep.mubr.msk.bf16.mxu1 %vm3717_vm9, %v5828_v61 }
 0x4c9   : >> { %5512 = vmatmul.mubr.msk.bf16.vlgmr.msra.gmra.mxu0 %vm3717_vm9, %v5829_v0  ;;  %5524 = vmatmul.mubr.msk.bf16.vlgmr.msra.gmra.mxu1 %vm3717_vm9, %v5830_v33 }
 0x4ca   : >> { %5515 = vmatprep.mubr.msk.bf16.mxu0 %vm3717_vm9, %v5831_v7 }
 0x4d1   : >> { %5516 = vmatmul.mubr.msk.bf16.gmra.mxu0 %vm3717_vm9, %v5832_v3 }
 0x4d2   : >> { %5519 = vmatprep.mubr.msk.bf16.mxu0 %vm3717_vm9, %v5833_v37 }
 0x4d9   : >> { %5520 = vmatmul.mubr.msk.bf16.gmra.mxu0 %vm3717_vm9, %v5834_v21 }
 0x569   : >> { %v5457_v24 = vpop.f32.mrf.mxu0  ;;  %v5485_v41 = vpop.f32.mrf.mxu1 }
 0x56a   : >> { %v3982_v13 = vadd.f32 %v5485_v41, %v5457_v24 }
 0x56b   : >> { %v3776_v4 = vpop.f32.mrf.mxu0  ;;  %v3973_v53 = vpop.f32.mrf.mxu1 }
 0x56c   : >> { %v3974_v23 = vadd.f32 %v3973_v53, %v3776_v4 }
 0x56d   : >> { %v5458_v44 = vpop.f32.mrf.mxu0  ;;  %v5486_v12 = vpop.f32.mrf.mxu1 }
 0x56e   : >> { %v3985_v31 = vadd.f32 %v5486_v12, %v5458_v44 }
 0x56f   : >> { %v3779_v11 = vpop.f32.mrf.mxu0  ;;  %v3976_v47 = vpop.f32.mrf.mxu1 }
 0x570   : >> { %v3977_v51 = vadd.f32 %v3976_v47, %v3779_v11 }
 0x571   : >> { %v5461_v62 = vpop.f32.mrf.mxu0  ;;  %v5489_v9 = vpop.f32.mrf.mxu1 }
 0x572   : >> { %v3998_v26 = vadd.f32 %v5489_v9, %v5461_v62 }
 0x573   : >> { %v7519_v27 = vpop.f32.mrf.mxu0  ;;  %v7521_v45 = vpop.f32.mrf.mxu1 }
 0x575   : >> { %v5462_v54 = vpop.f32.mrf.mxu0  ;;  %v5490_v63 = vpop.f32.mrf.mxu1 }
 0x576   : >> { %v4001_v37 = vadd.f32 %v5490_v63, %v5462_v54 }
 0x577   : >> { %v7523_v48 = vpop.f32.mrf.mxu0  ;;  %v7525_v30 = vpop.f32.mrf.mxu1 }
 0x579   : >> { %v7527_v36 = vpop.f32.mrf.mxu0  ;;  %v7529_v42 = vpop.f32.mrf.mxu1 }
 0x57b   : >> { %v7531_v14 = vpop.f32.mrf.mxu0  ;;  %v7533_v50 = vpop.f32.mrf.mxu1 }
 0x57d   : >> { %v7535_v56 = vpop.f32.mrf.mxu0  ;;  %v7537_v38 = vpop.f32.mrf.mxu1 }
 0x57f   : >> { %v7539_v29 = vpop.f32.mrf.mxu0  ;;  %v7541_v6 = vpop.f32.mrf.mxu1 }
 0x581   : >> { %v5469_v55 = vpop.f32.mrf.mxu0  ;;  %v5497_v34 = vpop.f32.mrf.mxu1 }
 0x582   : >> { %v4030_v58 = vadd.f32 %v5497_v34, %v5469_v55  ;;  %v3993_v55 = vadd.f32 %v7525_v30, %v7523_v48 }
 0x583   : >> { %v3824_v57 = vpop.f32.mrf.mxu0  ;;  %v4021_v28 = vpop.f32.mrf.mxu1 }
 0x584   : >> { %v4022_v47 = vadd.f32 %v4021_v28, %v3824_v57  ;;  %v5835_v28 = vld [vmem:[%s7736_s7 + $0x8] sm:$0xff]  }
 0x585   : >> { %v5470_v39 = vpop.f32.mrf.mxu0  ;;  %v5498_v16 = vpop.f32.mrf.mxu1  ;;  %5527 = vmatprep.subr.bf16.mxu1 %v5835_v28 }
 0x586   : >> { %v4033_v18 = vadd.f32 %v5498_v16, %v5470_v39  ;;  %5528 = vmatpush3.bf16.msra.mxu1 %v5835_v28 }
 0x587   : >> { %v3827_v19 = vpop.f32.mrf.mxu0  ;;  %v4024_v46 = vpop.f32.mrf.mxu1 }
 0x588   : >> { %v4025_v4 = vadd.f32 %v4024_v46, %v3827_v19  ;;  %v3990_v46 = vadd.f32 %v7521_v45, %v7519_v27  ;;  %v4014_v27 = vadd.f32 %v7529_v42, %v7527_v36 }
 0x589   : >> { %v5513_v49 = vpop.f32.mrf.mxu0  ;;  %v5525_v60 = vpop.f32.mrf.mxu1 }
 0x58a   : >> { %v7543_v2 = vadd.f32 %v5513_v49, %v3982_v13  ;;  %v7545_v5 = vadd.f32 %v5525_v60, %v4030_v58 }
 0x58b   : >> { %v4203_v32 = vpop.f32.mrf.mxu0  ;;  %v4251_v8 = vpop.f32.mrf.mxu1 }
 0x58c   : >> { %v4359_v22 = vrot.slane %v7543_v2, 2  ;;  %v7550_v43 = vadd.f32 %v4203_v32, %v3974_v23  ;;  %v4302_v17 = vrot.slane %v7543_v2, 1  ;;  %v4320_v21 = vrot.slane %v7545_v5, 1 }
 0x58d   : >> { %v5514_v25 = vpop.f32.mrf.mxu0  ;;  %v5526_v15 = vpop.f32.mrf.mxu1  ;;  %v7572_v19 = vadd.f32 %v4251_v8, %v4022_v47 }
 0x58e   : >> { %v4269_v35 = vadd.f32 %v5514_v25, %v3985_v31  ;;  %v7547_v59 = vadd.f32 %v5526_v15, %v4033_v18  ;;  %v4299_v53 = vrot.slane %v7550_v43, 1  ;;  %v4356_v16 = vrot.slane %v7550_v43, 2  ;;  %v5836_v25 = vld [vmem:[%s7736_s7] sm:$0xff]  }
 0x58f   : >> { %v4206_v40 = vpop.f32.mrf.mxu0  ;;  %v4254_v24 = vpop.f32.mrf.mxu1  ;;  %v4017_v31 = vadd.f32 %v7537_v38, %v7535_v56  ;;  %v4317_v45 = vrot.slane %v7572_v19, 1  ;;  %v4009_v56 = vadd.f32 %v7541_v6, %v7539_v29  ;;  %v4006_v15 = vadd.f32 %v7533_v50, %v7531_v14  ;;  %5529 = vmatprep.subr.bf16.mxu1 %v5836_v25 }
 0x590   : >> { %v4303_v1 = vrot.slane %v4269_v35, 1  ;;  %v4360_v52 = vrot.slane %v4269_v35, 2  ;;  %v4267_v20 = vadd.f32 %v4206_v40, %v3977_v51  ;;  %v4321_v61 = vrot.slane %v7547_v59, 1  ;;  %5530 = vmatpush3.bf16.msra.mxu1 %v5836_v25 }
 0x591   : >> { %v5517_v10 = vpop.f32.mrf.mxu0  ;;  %v7563_v9 = vadd.f32 %v4254_v24, %v4025_v4 }
 0x592   : >> { %v4361_v0 = vsel %vm4355_vm10, %v4359_v22, %v4360_v52  ;;  %v4300_v33 = vrot.slane %v4267_v20, 1  ;;  %v4304_v3 = vsel %vm4298_vm11, %v4302_v17, %v4303_v1  ;;  %v7558_v41 = vadd.f32 %v5517_v10, %v3998_v26 }
 0x593   : >> { %v4219_v7 = vpop.f32.mrf.mxu0  ;;  %4382 = vrot.lane.b32.xlu1 %v4361_v0, %s5942_s20  ;;  %4325 = vrot.lane.b32.xlu0 %v4304_v3, %s5943_s14  ;;  %v4322_v11 = vsel %vm4298_vm11, %v4320_v21, %v4321_v61  ;;  %v4357_v62 = vrot.slane %v4267_v20, 2  ;;  %v4318_v30 = vrot.slane %v7563_v9, 1  ;;  %v4375_v24 = vrot.slane %v7563_v9, 2 }
 0x594   : >> { %v4301_v63 = vsel %vm4298_vm11, %v4299_v53, %v4300_v33  ;;  %v4308_v34 = vrot.slane %v7558_v41, 1  ;;  %v4365_v8 = vrot.slane %v7558_v41, 2  ;;  %v7586_v58 = vadd.f32 %v4219_v7, %v3990_v46 }
 0x595   : >> { %v5518_v44 = vpop.f32.mrf.mxu0  ;;  %v4358_v32 = vsel %vm4355_vm10, %v4356_v16, %v4357_v62  ;;  %v4319_v36 = vsel %vm4298_vm11, %v4317_v45, %v4318_v30  ;;  %v4377_v53 = vrot.slane %v7545_v5, 2 }
 0x596   : >> { %v4273_v12 = vadd.f32 %v5518_v44, %v4001_v37  ;;  %v4305_v42 = vrot.slane %v7586_v58, 1  ;;  %v4362_v29 = vrot.slane %v7586_v58, 2  ;;  %v4378_v37 = vrot.slane %v7547_v59, 2 }
 0x597   : >> { %v4222_v54 = vpop.f32.mrf.mxu0  ;;  %4337 = vrot.lane.b32.xlu1 %v4322_v11, %s5943_s14  ;;  %4323 = vrot.lane.b32.xlu0 %v4301_v63, %s5943_s14  ;;  %v4374_v44 = vrot.slane %v7572_v19, 2 }
 0x598   : >> { %v4309_v39 = vrot.slane %v4273_v12, 1  ;;  %v4366_v49 = vrot.slane %v4273_v12, 2  ;;  %v4271_v13 = vadd.f32 %v4222_v54, %v3993_v55  ;;  %v4379_v12 = vsel %vm4355_vm10, %v4377_v53, %v4378_v37  ;;  %v5161_v55 = vld [vmem:[%s7735_s6] ss:$0 sm:$0xff] }
 0x599   : >> { %v5521_v57 = vpop.f32.mrf.mxu0  ;;  %v4376_v59 = vsel %vm4355_vm10, %v4374_v44, %v4375_v24 }
 0x59a   : >> { %v4310_v48 = vsel %vm4298_vm11, %v4308_v34, %v4309_v39  ;;  %v4306_v38 = vrot.slane %v4271_v13, 1  ;;  %v4367_v35 = vsel %vm4355_vm10, %v4365_v8, %v4366_v49  ;;  %v4363_v23 = vrot.slane %v4271_v13, 2 }
 0x59b   : >> { %v4235_v60 = vpop.f32.mrf.mxu0  ;;  %4329 = vrot.lane.b32.xlu1 %v4310_v48, %s5943_s14  ;;  %4380 = vrot.lane.b32.xlu0 %v4358_v32, %s5942_s20  ;;  %v7603_v1 = vadd.f32 %v5521_v57, %v4014_v27 }
 0x59c   : >> { %v4274_v6 = vadd.f32 %v4235_v60, %v4006_v15  ;;  %v4307_v14 = vsel %vm4298_vm11, %v4305_v42, %v4306_v38  ;;  %v4364_v22 = vsel %vm4355_vm10, %v4362_v29, %v4363_v23 }
 0x59d   : >> { %v5522_v18 = vpop.f32.mrf.mxu0  ;;  %v4314_v10 = vrot.slane %v7603_v1, 1  ;;  %v4371_v7 = vrot.slane %v7603_v1, 2 }
 0x59e   : >> { %v4277_v51 = vadd.f32 %v5522_v18, %v4017_v31  ;;  %v4311_v17 = vrot.slane %v4274_v6, 1  ;;  %v4368_v3 = vrot.slane %v4274_v6, 2 }
 0x59f   : >> { %v4238_v40 = vpop.f32.mrf.mxu0  ;;  %4386 = vrot.lane.b32.xlu1 %v4367_v35, %s5942_s20  ;;  %4335 = vrot.lane.b32.xlu0 %v4319_v36, %s5943_s14 }
 0x5a0   : >> { %v4275_v52 = vadd.f32 %v4238_v40, %v4009_v56  ;;  %v4315_v20 = vrot.slane %v4277_v51, 1  ;;  %v4372_v26 = vrot.slane %v4277_v51, 2 }
 0x5a2   : >> { %v4312_v50 = vrot.slane %v4275_v52, 1  ;;  %v4316_v61 = vsel %vm4298_vm11, %v4314_v10, %v4315_v20  ;;  %v4369_v0 = vrot.slane %v4275_v52, 2  ;;  %v4373_v21 = vsel %vm4355_vm10, %v4371_v7, %v4372_v26  ;;  %v5164_v7 = vld [vmem:[%s7737_s8] ss:$0 sm:$0xff] }
 0x5a3   : >> { %4327 = vrot.lane.b32.xlu1 %v4307_v14, %s5943_s14  ;;  %4384 = vrot.lane.b32.xlu0 %v4364_v22, %s5942_s20 }
 0x5a4   : >> { %v4313_v33 = vsel %vm4298_vm11, %v4311_v17, %v4312_v50  ;;  %v4370_v4 = vsel %vm4355_vm10, %v4368_v3, %v4369_v0  ;;  %v5233_v3 = vld [vmem:[%s4445_s19] sm:$0xff]  }
 0x5a7   : >> { %4333 = vrot.lane.b32.xlu1 %v4316_v61, %s5943_s14  ;;  %4331 = vrot.lane.b32.xlu0 %v4313_v33, %s5943_s14  ;;  %s5175_s14 = sshll.u32 (%p3573_p6), %s5921_s13, 6 }
 0x5ab   : >> { %4390 = vrot.lane.b32.xlu1 %v4373_v21, %s5942_s20  ;;  %4388 = vrot.lane.b32.xlu0 %v4370_v4, %s5942_s20  ;;  %v5234_v4 = vunpack.c.l.bf16 %v5233_v3 }
 0x5af   : >> { %4394 = vrot.lane.b32.xlu1 %v4379_v12, %s5942_s20  ;;  %4392 = vrot.lane.b32.xlu0 %v4376_v59, %s5942_s20  ;;  %s7652_s20 = scalar_lea.vmem %s442_s17, %s5229_s24 [#allocation4]  ;;  %s5231_s24 = sshll.u32 (%p3573_p6), %s5917_s12, 5 }
 0x5b0   : > { %s4598_s15 = sadd.s32 (%p3573_p6), %s5231_s24, %s5175_s14  ;;  %s5944_s12 = smov (%p3573_p6), [#allocation4]  }
 0x5b1   : > { %s5176_s27 = sshll.u32 (%p3573_p6), %s4598_s15, 7  ;;  %s5841_s13 = sshll.u32 (%p3573_p6), %s5944_s12, 4  ;;  %s5842_s13 = int_to_ptr.vmem [resolvable:$false] %s5841_s13 }
 0x5b2   : > { %s7674_s25 = scalar_lea.hbm (%p3573_p6), %s7738_s9, %s5176_s27  ;;  %s5843_s18 = scalar_lea.vmem (%p3573_p6), %s5842_s13, 8192 }
 0x5b3   : > { %p5844_p11 = scmp.lt.s32.totalorder (%p3573_p6), %s7669_s30, %s5842_s13  ;;  %p5845_p12 = scmp.lt.s32.totalorder (%p3573_p6), %s5843_s18, %s5837_s28 }
 0x5b5   : > { %p5846_p13 = por (%p3573_p6), %p5845_p12, %p5844_p11 }
 0x5b7   : > { %p5847_p0 = pnand (%p3573_p6), %p5846_p13, %p5840_p10 }
 0x605   : >> { %v4383_v11 = vpop.permute.xlu1 %4382  ;;  %v4326_v47 = vpop.permute.xlu0 %4325 }
 0x606   : >> { %v4348_v62 = vadd.f32 %v4326_v47, %v7543_v2 }
 0x608   : >> { %v4405_v63 = vadd.f32 %v4383_v11, %v4348_v62 }
 0x609   : >> { %v4338_v9 = vpop.permute.xlu1 %4337  ;;  %v4324_v54 = vpop.permute.xlu0 %4323 }
 0x60a   : >> { %v4347_v34 = vadd.f32 %v4324_v54, %v7550_v43  ;;  %v4420_v57 = vadd.f32 %v5161_v55, %v4405_v63  ;;  %v5235_v54 = vunpack.c.h.bf16 %v5233_v3 }
 0x60c   : >> { %v4428_v30 = vmax.f32 %v4420_v57, 0.0 }
 0x60d   : >> { %v4330_v39 = vpop.permute.xlu1 %4329  ;;  %v4381_v16 = vpop.permute.xlu0 %4380 }
 0x60e   : >> { %v4404_v28 = vadd.f32 %v4381_v16, %v4347_v34  ;;  %v4350_v13 = vadd.f32 %v4330_v39, %v7558_v41  ;;  %v5250_v16 = vld [vmem:[%s4445_s19 + $0x18] sm:$0xff]  }
 0x610   : >> { %v4419_v46 = vadd.f32 %v5161_v55, %v4404_v28 }
 0x611   : >> { %v4387_v49 = vpop.permute.xlu1 %4386  ;;  %v4336_v48 = vpop.permute.xlu0 %4335 }
 0x612   : >> { %v4427_v2 = vmax.f32 %v4419_v46, 0.0  ;;  %v4407_v60 = vadd.f32 %v4387_v49, %v4350_v13  ;;  %v4353_v29 = vadd.f32 %v4336_v48, %v7572_v19  ;;  %v5248_v19 = vld [vmem:[%s4445_s19 + $0x8] sm:$0xff]   ;;  %v5249_v46 = vld [vmem:[%s4445_s19 + $0x10] sm:$0xff]   ;;  %v5246_v49 = vunpack.c.l.bf16 %v5250_v16 }
 0x613   : >> { %v5238_v37 = vunpack.c.l.bf16 %v5248_v19  ;;  %v5239_v59 = vunpack.c.h.bf16 %v5248_v19 }
 0x614   : >> { %v4435_v31 = vpack.c.bf16 %v4428_v30, %v4427_v2  ;;  %v4422_v43 = vadd.f32 %v5161_v55, %v4407_v60  ;;  %v5242_v2 = vunpack.c.l.bf16 %v5249_v46 }
 0x615   : >> { %v4328_v32 = vpop.permute.xlu1 %4327  ;;  %v4385_v27 = vpop.permute.xlu0 %4384 }
 0x616   : >> { %v4349_v8 = vadd.f32 %v4328_v32, %v7586_v58  ;;  %5531 = vmatprep.mubr.msk.bf16.mxu1 %vm2896_vm6, %v4435_v31  ;;  %v4430_v38 = vmax.f32 %v4422_v43, 0.0  ;;  %v4354_v58 = vadd.f32 %v4338_v9, %v7545_v5 }
 0x618   : >> { %v4406_v45 = vadd.f32 %v4385_v27, %v4349_v8  ;;  %v5247_v8 = vunpack.c.h.bf16 %v5250_v16 }
 0x619   : >> { %v4334_v18 = vpop.permute.xlu1 %4333  ;;  %v4332_v56 = vpop.permute.xlu0 %4331 }
 0x61a   : >> { %v4421_v25 = vadd.f32 %v5161_v55, %v4406_v45  ;;  %v4352_v41 = vadd.f32 %v4334_v18, %v7603_v1  ;;  %v4351_v35 = vadd.f32 %v4332_v56, %v4274_v6 }
 0x61c   : >> { %v4429_v51 = vmax.f32 %v4421_v25, 0.0  ;;  %v5243_v25 = vunpack.c.h.bf16 %v5249_v46 }
 0x61d   : >> { %v4391_v15 = vpop.permute.xlu1 %4390  ;;  %v4389_v36 = vpop.permute.xlu0 %4388 }
 0x61e   : >> { %v4436_v23 = vpack.c.bf16 %v4430_v38, %v4429_v51  ;;  %v4409_v40 = vadd.f32 %v4391_v15, %v4352_v41  ;;  %v4408_v42 = vadd.f32 %v4389_v36, %v4351_v35 }
 0x620   : >> { %v4424_v52 = vadd.f32 %v5161_v55, %v4409_v40  ;;  %5532 = vmatmul.mubr.msk.bf16.vlgmr.msra.gmra.mxu1 %vm2896_vm6, %v4436_v23  ;;  %v4423_v20 = vadd.f32 %v5161_v55, %v4408_v42 }
 0x621   : >> { %v4395_v14 = vpop.permute.xlu1 %4394  ;;  %v4393_v1 = vpop.permute.xlu0 %4392 }
 0x622   : >> { %v4432_v50 = vmax.f32 %v4424_v52, 0.0  ;;  %v4411_v22 = vadd.f32 %v4395_v14, %v4354_v58  ;;  %v4431_v6 = vmax.f32 %v4423_v20, 0.0  ;;  %v4410_v10 = vadd.f32 %v4393_v1, %v4353_v29 }
 0x624   : >> { %v4426_v17 = vadd.f32 %v5161_v55, %v4411_v22  ;;  %v4425_v26 = vadd.f32 %v5161_v55, %v4410_v10  ;;  %v4437_v61 = vpack.c.bf16 %v4432_v50, %v4431_v6 }
 0x626   : >> { %v4434_v0 = vmax.f32 %v4426_v17, 0.0  ;;  %v4433_v33 = vmax.f32 %v4425_v26, 0.0  ;;  %5535 = vmatprep.mubr.msk.bf16.mxu1 %vm2896_vm6, %v4437_v61 }
 0x628   : >> { %v4438_v5 = vpack.c.bf16 %v4434_v0, %v4433_v33 }
 0x62a   : >> { %5536 = vmatmul.mubr.msk.bf16.gmra.mxu1 %vm2896_vm6, %v4438_v5 }
 0x6e0   : >> { %v5533_v21 = vpop.f32.mrf.mxu1 }
 0x6e1   : >> { %v4536_v24 = vadd.f32 %v5533_v21, %v5164_v7 }
 0x6e2   : >> { %v4527_v53 = vpop.f32.mrf.mxu1 }
 0x6e3   : >> { %v4560_v44 = vadd.f32 %v5238_v37, %v4536_v24  ;;  %v4528_v12 = vadd.f32 %v5164_v7, %v4527_v53 }
 0x6e4   : >> { %v5534_v11 = vpop.f32.mrf.mxu1 }
 0x6e5   : >> { %v4568_v47 = vmax.f32 %v4560_v44, 0.0  ;;  %v4558_v62 = vadd.f32 %v5234_v4, %v4528_v12  ;;  %v4539_v9 = vadd.f32 %v5534_v11, %v5164_v7 }
 0x6e6   : >> { %v4530_v63 = vpop.f32.mrf.mxu1 }
 0x6e7   : >> { %4578 = vst [vmem:[%s7652_s20 + $0x10] sm:$0xff] %v4568_v47  ;;  %v4566_v55 = vmax.f32 %v4558_v62, 0.0  ;;  %v4561_v34 = vadd.f32 %v5239_v59, %v4539_v9  ;;  %v4531_v39 = vadd.f32 %v5164_v7, %v4530_v63 }
 0x6e9   : >> { %4576 = vst [vmem:[%s7652_s20] sm:$0xff] %v4566_v55  ;;  %v4569_v57 = vmax.f32 %v4561_v34, 0.0  ;;  %v4559_v28 = vadd.f32 %v5235_v54, %v4531_v39 }
 0x6ea   : >> { %v5537_v48 = vpop.f32.mrf.mxu1 }
 0x6eb   : >> { %4579 = vst [vmem:[%s7652_s20 + $0x18] sm:$0xff] %v4569_v57  ;;  %v4567_v13 = vmax.f32 %v4559_v28, 0.0  ;;  %v4552_v30 = vadd.f32 %v5537_v48, %v5164_v7 }
 0x6ec   : >> { %v4543_v60 = vpop.f32.mrf.mxu1 }
 0x6ed   : >> { %4577 = vst [vmem:[%s7652_s20 + $0x8] sm:$0xff] %v4567_v13  ;;  %v4564_v32 = vadd.f32 %v5246_v49, %v4552_v30  ;;  %v4544_v31 = vadd.f32 %v5164_v7, %v4543_v60 }
 0x6ee   : >> { %v5538_v27 = vpop.f32.mrf.mxu1 }
 0x6ef   : >> { %v4572_v43 = vmax.f32 %v4564_v32, 0.0  ;;  %v4562_v45 = vadd.f32 %v5242_v2, %v4544_v31  ;;  %v4555_v18 = vadd.f32 %v5538_v27, %v5164_v7 }
 0x6f0   : >> { %v4546_v56 = vpop.f32.mrf.mxu1 }
 0x6f1   : >> { %4582 = vst [vmem:[%s7652_s20 + $0x30] sm:$0xff] %v4572_v43  ;;  %v4570_v38 = vmax.f32 %v4562_v45, 0.0  ;;  %v4565_v51 = vadd.f32 %v5247_v8, %v4555_v18  ;;  %v4547_v41 = vadd.f32 %v5164_v7, %v4546_v56 }
 0x6f3   : >> { %4580 = vst [vmem:[%s7652_s20 + $0x20] sm:$0xff] %v4570_v38  ;;  %v4573_v35 = vmax.f32 %v4565_v51, 0.0  ;;  %v4563_v15 = vadd.f32 %v5243_v25, %v4547_v41  ;;  %3575 = sbr.rel (!%p3573_p6) target bundleno = 1168 (0x490), region = 122 }
 0x6f5   : >> { %4583 = vst [vmem:[%s7652_s20 + $0x38] sm:$0xff] %v4573_v35  ;;  %v4571_v23 = vmax.f32 %v4563_v15, 0.0 }
 0x6f7   : >> { %4581 = vst [vmem:[%s7652_s20 + $0x28] sm:$0xff] %v4571_v23 }
 0x6f8   : > { %5850 = shalt.err (!%p5847_p0)
}
 0x6f9   : > { %s5851_s17 = scalar_lea.hbm %s7674_s25, 4096  ;;  %s5855_s11 = scalar_lea.hbm %s7738_s9, 16384 }
 0x6fa   : > { %p5852_p1 = scmp.ne.s32.totalorder %s7674_s25, %s5851_s17  ;;  %p5856_p5 = scmp.lt.s32.totalorder %s7674_s25, %s7738_s9 }
 0x6fb   : > { %p5857_p6 = scmp.lt.s32.totalorder %s5855_s11, %s5851_s17 }
 0x6fc   : > { %p5853_p2 = pnand %p5852_p1, %p6048_p3 }
 0x6fd   : > { %p5858_p7 = por %p5857_p6, %p5856_p5 }
 0x6fe   : > { %p5854_p4 = pneg %p5853_p2 }
 0x700   : > { %p5859_p9 = pnand %p5858_p7, %p5854_p4 }
 0x702   : > { %5862 = shalt.err (!%p5859_p9)
}
 0x703   : > { %s5945_s14 = smov 128   ;;  %s5946_s15 = smov 8  }
 0x704   : > { %5599 = dma.vmem_to_hbm [thread:$0]  (%p6048_p3), %s7669_s30, 4096, %s7674_s25, %s7678_s29, %s5945_s14, %s5945_s14, %s5946_s15  }
 0x705 PF: > { %s7862_s27 = sld [smem:[#allocation11_spill]] }
 0x706   : > { %s7863_s23 = sld [smem:[#allocation7_spill]] }
 0x70b   : > { %p5605_p10 = scmp.ge.s32.totalorder %s7862_s27, 2 }
 0x70c   : > { %s4616_s16 = sand.u32 1, %s7863_s23  }
 0x70d   : > { %p5602_p11 = pnand %p5605_p10, %p6057_p8  ;;  %s4617_s28 = scalar_lea.sflag [#allocation5], %s4616_s16 }
 0x70f   : > { %p5603_p12 = pneg %p5602_p11 }
 0x711   : > { %5900 = dma.done.wait (%p5603_p12), %s4617_s28, 4096  }
 0x712   : > { %5902 = vsyncadd (%p5603_p12), %s4617_s28, 4294963200  ;;  %s22_s16 = sadd.s32 1, %s7862_s27   ;;  %s7865_s12 = sld [smem:[#allocation8_spill]] }
 0x713   : > { %p19_p13 = scmp.ge.s32.totalorder %s22_s16, 6   ;;  %s7866_s11 = sld [smem:[#allocation15_spill]] }
 0x714   : > { %s7867_s22 = sld [smem:[#allocation9_spill]]  ;;  %s7871_s30 = smov %s5909_s10 }
 0x715   : > { %s7868_s13 = sld [smem:[#allocation10_spill]] }
 0x716   : > { %s7869_s14 = sld [smem:[#allocation12_spill]]  ;;  %21 = sbr.rel (!%p19_p13) target bundleno = 5 (0x5), region = 133 }
 0x717   : > { %s7870_s15 = sld [smem:[#allocation13_spill]] }
 0x718   : > { %s7872_s10 = smov %s7865_s12 }
 0x71a   : > { %s7873_s12 = smov %s7867_s22 }
 0x71b   :  { %4622 = vsyncpa [#allocation5], 1 }
 0x71c   :  { %4624 = vsyncpa [#allocation5 + $0x1], 1 }

</bundles_post_ra>
